<compile_context>
chip_gen: v7x
topology: tpu7x:2x2x1
jax: 0.10.0
libtpu: 0.0.40
codegen_flags: <defaults>
</compile_context>

<pallas_src>
from functools import partial

import numpy as np
import jax
import jax.numpy as jnp
from jax.experimental import pallas as pl
from jax.experimental.pallas import tpu as pltpu

KS = 3        # kernel size per spatial dim
STRIDE = 2    # stride per spatial dim
PAD = 1       # padding per spatial dim
TAPS = KS ** 4


def _round_up(n, m):
    return (n + m - 1) // m * m


def _output_dims(spatial):
    return tuple((d + 2 * PAD - KS) // STRIDE + 1 for d in spatial)


# --------------------------- exact GELU (erf) -------------------------------
def _erf(x):
    # Abramowitz-Stegun 7.1.26 (|err| < 1.5e-7) -> torch.nn.GELU() semantics
    # at f32, using only Mosaic-supported elementwise ops.
    a1, a2, a3, a4, a5 = 0.254829592, -0.284496736, 1.421413741, -1.453152027, 1.061405429
    p = 0.3275911
    sgn = jnp.where(x >= 0.0, 1.0, -1.0)
    ax = jnp.abs(x)
    t = 1.0 / (1.0 + p * ax)
    poly = ((((a5 * t + a4) * t + a3) * t + a2) * t + a1) * t
    return sgn * (1.0 - poly * jnp.exp(-ax * ax))


def _gelu_exact(x):
    return 0.5 * x * (1.0 + _erf(x * 0.7071067811865476))


# ------------------------ lane-roll direction probe --------------------------
_ROLL_MATCHES_JNP = None


def _roll_matches_jnp():
    """Cached probe: True iff pltpu.roll follows jnp.roll's shift direction."""
    global _ROLL_MATCHES_JNP
    if _ROLL_MATCHES_JNP is None:
        def probe(o_ref):
            o_ref[...] = pltpu.roll(
                jax.lax.broadcasted_iota(jnp.int32, (8, 128), 1), 1, axis=1)
        try:
            out = pl.pallas_call(
                probe, out_shape=jax.ShapeDtypeStruct((8, 128), jnp.int32))()
            val = int(np.asarray(jax.block_until_ready(out))[0, 0])
            _ROLL_MATCHES_JNP = (val == 127)      # jnp.roll(iota, 1)[0] == 127
        except Exception:                          # conservative fallback
            _ROLL_MATCHES_JNP = True
    return _ROLL_MATCHES_JNP


def _shift_left(x, s):
    """out[:, j] = x[:, (j + s) % n] — a cheap lane rotation on the XLU."""
    n = x.shape[-1]
    amt = (n - s) if _roll_matches_jnp() else s
    return pltpu.roll(x, amt, axis=1)


# ------------------------------ Pallas kernel --------------------------------
def _conv4d_kernel(planes_ref, w_ref, b_ref, o_ref, patches_ref, acc_ref,
                   *, taps, cin_pad, apply_gelu):
    g = pl.program_id(1)                          # tap-group (= k1) index

    # Fused im2col: build this tap group's (27*cin_pad, lanes) patch matrix in
    # VMEM from the resident plane block.  Nothing is ever written back to HBM.
    for j, (plane, shift) in enumerate(taps):     # 27 static taps per group
        blk = planes_ref[plane, 0]                # (cin_pad, lanes)
        if shift:
            blk = _shift_left(blk, shift)
        patches_ref[pl.ds(j * cin_pad, cin_pad), :] = blk

    @pl.when(g == 0)
    def _init():
        acc_ref[...] = jnp.zeros_like(acc_ref)

    # One MXU matmul per tap group; K sits on the sublane axis of the patch
    # matrix, output is lane-dense (Cout_pad, lanes).
    acc_ref[...] += jnp.dot(w_ref[0], patches_ref[...],
                            preferred_element_type=jnp.float32)

    @pl.when(g == pl.num_programs(1) - 1)
    def _finalize():
        r = acc_ref[...] + b_ref[...]
        if apply_gelu:
            r = _gelu_exact(r)
        o_ref[0] = r.astype(o_ref.dtype)


# ------------------------ plain-JAX layout glue ------------------------------
def _build_planes(x, out_dims, cin_pad, lanes):
    """Compact fused-im2col input of shape (24, B, cin_pad, lanes).

    Plane q1*8 + p2*4 + p3*2 + p4 holds, for each output position
    (o1, o2, o3, o4) flattened over (O1, O2+1, O3+1, O4+1) on the lane axis,
    the padded-input value at (2*o1 + q1, 2*o2 + p2, 2*o3 + p3, 2*o4 + p4).
    Any tap then only needs a small lane shift of (k2//2)*S2+(k3//2)*S3+(k4//2).
    Total size is ~2.5-3x the raw input (vs ~5x write + ~5x read for HBM im2col).
    """
    B, C, D1, D2, D3, D4 = x.shape
    O1, O2, O3, O4 = out_dims
    xp = jnp.pad(x, ((0, 0), (0, 0),
                     (PAD, 2 * O1 - D1),
                     (PAD, 2 * O2 + 1 - D2),
                     (PAD, 2 * O3 + 1 - D3),
                     (PAD, 2 * O4 + 1 - D4)))
    plane_list = []
    for q1 in range(KS):
        for p2 in range(2):
            for p3 in range(2):
                for p4 in range(2):
                    plane_list.append(
                        xp[:, :,
                           q1: q1 + 2 * O1 - 1: 2,
                           p2: p2 + 2 * O2 + 1: 2,
                           p3: p3 + 2 * O3 + 1: 2,
                           p4: p4 + 2 * O4 + 1: 2])
    planes = jnp.stack(plane_list, axis=0)        # (24, B, C, O1, O2+1, O3+1, O4+1)
    l0 = O1 * (O2 + 1) * (O3 + 1) * (O4 + 1)
    planes = planes.reshape(KS * 8, B, C, l0)
    return jnp.pad(planes, ((0, 0), (0, 0),
                            (0, cin_pad - C), (0, lanes - l0)))


def _prep_weight(weight, cin_pad, cout_pad):
    cout, cin = weight.shape[:2]
    w = weight.reshape(cout, cin, KS, KS ** 3)    # (co, ci, k1, k234)
    w = jnp.transpose(w, (2, 0, 3, 1))            # (k1, co, k234, ci)
    w = jnp.pad(w, ((0, 0), (0, cout_pad - cout), (0, 0), (0, cin_pad - cin)))
    return w.reshape(KS, cout_pad, (KS ** 3) * cin_pad)


def _prep_bias(bias, cout_pad):
    return jnp.pad(bias, (0, cout_pad - bias.shape[0])).reshape(cout_pad, 1)


# ------------------------------- conv wrapper --------------------------------
def conv4d(x, weight, bias, apply_gelu=False):
    """4-D conv (stride 2, pad 1, kernel 3^4) with im2col fused into the kernel."""
    B, C = x.shape[:2]
    out_dims = _output_dims(x.shape[2:])
    O1, O2, O3, O4 = out_dims
    cout = weight.shape[0]

    cin_pad = _round_up(C, 8)
    cout_pad = _round_up(cout, 8)
    l0 = O1 * (O2 + 1) * (O3 + 1) * (O4 + 1)
    lanes = _round_up(l0, 128)
    # NOTE: for very large spatial volumes, additionally tile `lanes` (with a
    # halo of S2 + S3 + 1 columns for the in-group shifts) to bound VMEM.

    planes = _build_planes(x, out_dims, cin_pad, lanes)   # (24, B, cin_pad, lanes)
    wmat = _prep_weight(weight, cin_pad, cout_pad)        # (3, cout_pad, 27*cin_pad)
    bvec = _prep_bias(bias, cout_pad)                     # (cout_pad, 1)

    s2 = (O3 + 1) * (O4 + 1)
    s3 = O4 + 1
    taps = tuple(((k2 & 1) * 4 + (k3 & 1) * 2 + (k4 & 1),
                  (k2 >> 1) * s2 + (k3 >> 1) * s3 + (k4 >> 1))
                 for k2 in range(KS) for k3 in range(KS) for k4 in range(KS))

    kgroup = (KS ** 3) * cin_pad
    itemsize = jnp.dtype(x.dtype).itemsize
    est_bytes = (2 * (8 * cin_pad * lanes + cout_pad * kgroup + cout_pad * lanes)
                 * itemsize
                 + kgroup * lanes * itemsize + cout_pad * lanes * 4)
    vmem_bytes = int(min(96 * 2 ** 20, max(32 * 2 ** 20, 2 * est_bytes)))

    kernel = partial(_conv4d_kernel, taps=taps, cin_pad=cin_pad,
                     apply_gelu=apply_gelu)

    y = pl.pallas_call(
        kernel,
        out_shape=jax.ShapeDtypeStruct((B, cout_pad, lanes), x.dtype),
        grid_spec=pltpu.PrefetchScalarGridSpec(
            num_scalar_prefetch=0,
            grid=(B, KS),                                   # (batch, tap-group)
            in_specs=[
                pl.BlockSpec((8, 1, cin_pad, lanes), lambda b, g: (g, b, 0, 0)),
                pl.BlockSpec((1, cout_pad, kgroup), lambda b, g: (g, 0, 0)),
                pl.BlockSpec((cout_pad, 1), lambda b, g: (0, 0)),
            ],
            out_specs=pl.BlockSpec((1, cout_pad, lanes), lambda b, g: (b, 0, 0)),
            scratch_shapes=[
                pltpu.VMEM((kgroup, lanes), x.dtype),        # in-VMEM patch matrix
                pltpu.VMEM((cout_pad, lanes), jnp.float32),  # f32 accumulator
            ],
        ),
        compiler_params=pltpu.CompilerParams(
            dimension_semantics=("parallel", "arbitrary"),
            vmem_limit_bytes=vmem_bytes),
    )(planes, wmat, bvec)

    # Lane-dense (Cout, lanes) output is already channels-first: just crop.
    y = y[:, :cout, :l0].reshape(B, cout, O1, O2 + 1, O3 + 1, O4 + 1)
    return y[:, :, :, :O2, :O3, :O4]


def mlp_conv4d(x, params):
    """MLPConv4d.forward: Conv4d -> GELU -> Conv4d (GELU fused in 1st kernel)."""
    h = conv4d(x, params["w1"], params["b1"], apply_gelu=True)
    return conv4d(h, params["w2"], params["b2"], apply_gelu=False)


# ---------------- pure-jnp reference (same math, no Pallas) ------------------
def _conv4d_ref(x, weight, bias):
    B, C = x.shape[:2]
    O = _output_dims(x.shape[2:])
    cout = weight.shape[0]
    xp = jnp.pad(x, ((0, 0), (0, 0)) + ((PAD, PAD),) * 4)
    out = jnp.zeros((B, cout) + O, jnp.float32) + bias.reshape(1, cout, 1, 1, 1, 1)
    for k1 in range(KS):
        for k2 in range(KS):
            for k3 in range(KS):
                for k4 in range(KS):
                    patch = xp[:, :,
                               k1:k1 + 2 * O[0] - 1:2,
                               k2:k2 + 2 * O[1] - 1:2,
                               k3:k3 + 2 * O[2] - 1:2,
                               k4:k4 + 2 * O[3] - 1:2]
                    out = out + jnp.einsum('oc,bcwxyz->bowxyz',
                                           weight[:, :, k1, k2, k3, k4], patch)
    return out


def _mlp_conv4d_ref(x, params):
    h = _gelu_exact(_conv4d_ref(x, params["w1"], params["b1"]))
    return _conv4d_ref(h, params["w2"], params["b2"])


# --------------------------------- params ------------------------------------
def init_params(key, in_channel=4, mlp_ratio=4.0):
    hidden = int(in_channel * mlp_ratio)
    k1, k2, k3, k4 = jax.random.split(key, 4)

    def conv_init(kw, kb, cout, cin):
        fan_in = cin * TAPS
        bound = 1.0 / np.sqrt(fan_in)       # PyTorch-style kaiming-uniform bound
        w = jax.random.uniform(kw, (cout, cin, KS, KS, KS, KS),
                               jnp.float32, -bound, bound)
        b = jax.random.uniform(kb, (cout,), jnp.float32, -bound, bound)
        return w, b

    w1, b1 = conv_init(k1, k2, hidden, in_channel)
    w2, b2 = conv_init(k3, k4, in_channel, hidden)
    return {"w1": w1, "b1": b1, "w2": w2, "b2": b2}


if __name__ == "__main__":
    key = jax.random.PRNGKey(0)
    kp, kx = jax.random.split(key)

    in_channel = 4
    params = init_params(kp, in_channel=in_channel, mlp_ratio=4.0)

    # x: (B, C, D1, D2, D3, D4) = (2, 4, 8, 8, 8, 8)
    x = jax.random.normal(kx, (2, in_channel, 8, 8, 8, 8), jnp.float32)

    _roll_matches_jnp()     # resolve lane-roll convention eagerly (outside jit)

    y = jax.block_until_ready(jax.jit(mlp_conv4d)(x, params))
    assert y.shape == (2, in_channel, 2, 2, 2, 2), y.shape

    y_ref = jax.block_until_ready(jax.jit(_mlp_conv4d_ref)(x, params))
    np.testing.assert_allclose(np.asarray(y), np.asarray(y_ref),
                               rtol=3e-5, atol=3e-5)

    print("KERNEL_OK")
</pallas_src>

<mosaic_0001>
module attributes {stable_mosaic.version = 11 : i64} {
  func.func @_conv4d_kernel(%arg0: i32, %arg1: i32, %arg2: memref<8x1x8x512xf32, #tpu.memory_space<vmem>>, %arg3: memref<1x16x216xf32, #tpu.memory_space<vmem>>, %arg4: memref<16x1xf32, #tpu.memory_space<vmem>>, %arg5: memref<1x16x512xf32, #tpu.memory_space<vmem>>, %arg6: memref<216x512xf32, #tpu.memory_space<vmem>>, %arg7: memref<16x512xf32, #tpu.memory_space<vmem>>) attributes {dimension_semantics = [#tpu.dimension_semantics<parallel>, #tpu.dimension_semantics<arbitrary>], iteration_bounds = array<i64: 2, 3>, scalar_prefetch = 0 : i64, scratch_operands = 2 : i64, tpu.core_type = #tpu.core_type<tc>, window_params = [{transform_indices = @transform_0, window_bounds = array<i64: 8, 1, 8, 512>}, {transform_indices = @transform_1, window_bounds = array<i64: 1, 16, 216>}, {pipeline_mode = #tpu.pipeline_mode<synchronous>, transform_indices = @transform_2, window_bounds = array<i64: 16, 1>}, {transform_indices = @transform_3, window_bounds = array<i64: 1, 16, 512>}]} {
    %c0 = arith.constant 0 : index
    %c0_0 = arith.constant 0 : index
    %c0_1 = arith.constant 0 : index
    %c0_2 = arith.constant 0 : index
    %0 = vector.load %arg2[%c0, %c0_0, %c0_1, %c0_2] : memref<8x1x8x512xf32, #tpu.memory_space<vmem>>, vector<1x1x8x512xf32>
    %1 = vector.shape_cast %0 : vector<1x1x8x512xf32> to vector<8x512xf32>
    %c0_3 = arith.constant 0 : index
    %c0_4 = arith.constant 0 : index
    %2 = vector.load %arg6[%c0_3, %c0_4] : memref<216x512xf32, #tpu.memory_space<vmem>>, vector<8x512xf32>
    tpu.vector_store %arg6[%c0_3, %c0_4], %1 {strides = array<i32>} : memref<216x512xf32, #tpu.memory_space<vmem>>, vector<8x512xf32>,
    %c1 = arith.constant 1 : index
    %c0_5 = arith.constant 0 : index
    %c0_6 = arith.constant 0 : index
    %c0_7 = arith.constant 0 : index
    %3 = vector.load %arg2[%c1, %c0_5, %c0_6, %c0_7] : memref<8x1x8x512xf32, #tpu.memory_space<vmem>>, vector<1x1x8x512xf32>
    %4 = vector.shape_cast %3 : vector<1x1x8x512xf32> to vector<8x512xf32>
    %c8 = arith.constant 8 : index
    %c0_8 = arith.constant 0 : index
    %5 = vector.load %arg6[%c8, %c0_8] : memref<216x512xf32, #tpu.memory_space<vmem>>, vector<8x512xf32>
    tpu.vector_store %arg6[%c8, %c0_8], %4 {strides = array<i32>} : memref<216x512xf32, #tpu.memory_space<vmem>>, vector<8x512xf32>,
    %c0_9 = arith.constant 0 : index
    %c0_10 = arith.constant 0 : index
    %c0_11 = arith.constant 0 : index
    %c0_12 = arith.constant 0 : index
    %6 = vector.load %arg2[%c0_9, %c0_10, %c0_11, %c0_12] : memref<8x1x8x512xf32, #tpu.memory_space<vmem>>, vector<1x1x8x512xf32>
    %7 = vector.shape_cast %6 : vector<1x1x8x512xf32> to vector<8x512xf32>
    %c511_i32 = arith.constant 511 : i32
    %8 = tpu.dynamic_rotate %7 by %c511_i32 dim 1 : vector<8x512xf32>, i32 -> vector<8x512xf32>
    %c16 = arith.constant 16 : index
    %c0_13 = arith.constant 0 : index
    %9 = vector.load %arg6[%c16, %c0_13] : memref<216x512xf32, #tpu.memory_space<vmem>>, vector<8x512xf32>
    tpu.vector_store %arg6[%c16, %c0_13], %8 {strides = array<i32>} : memref<216x512xf32, #tpu.memory_space<vmem>>, vector<8x512xf32>,
    %c2 = arith.constant 2 : index
    %c0_14 = arith.constant 0 : index
    %c0_15 = arith.constant 0 : index
    %c0_16 = arith.constant 0 : index
    %10 = vector.load %arg2[%c2, %c0_14, %c0_15, %c0_16] : memref<8x1x8x512xf32, #tpu.memory_space<vmem>>, vector<1x1x8x512xf32>
    %11 = vector.shape_cast %10 : vector<1x1x8x512xf32> to vector<8x512xf32>
    %c24 = arith.constant 24 : index
    %c0_17 = arith.constant 0 : index
    %12 = vector.load %arg6[%c24, %c0_17] : memref<216x512xf32, #tpu.memory_space<vmem>>, vector<8x512xf32>
    tpu.vector_store %arg6[%c24, %c0_17], %11 {strides = array<i32>} : memref<216x512xf32, #tpu.memory_space<vmem>>, vector<8x512xf32>,
    %c3 = arith.constant 3 : index
    %c0_18 = arith.constant 0 : index
    %c0_19 = arith.constant 0 : index
    %c0_20 = arith.constant 0 : index
    %13 = vector.load %arg2[%c3, %c0_18, %c0_19, %c0_20] : memref<8x1x8x512xf32, #tpu.memory_space<vmem>>, vector<1x1x8x512xf32>
    %14 = vector.shape_cast %13 : vector<1x1x8x512xf32> to vector<8x512xf32>
    %c32 = arith.constant 32 : index
    %c0_21 = arith.constant 0 : index
    %15 = vector.load %arg6[%c32, %c0_21] : memref<216x512xf32, #tpu.memory_space<vmem>>, vector<8x512xf32>
    tpu.vector_store %arg6[%c32, %c0_21], %14 {strides = array<i32>} : memref<216x512xf32, #tpu.memory_space<vmem>>, vector<8x512xf32>,
    %c2_22 = arith.constant 2 : index
    %c0_23 = arith.constant 0 : index
    %c0_24 = arith.constant 0 : index
    %c0_25 = arith.constant 0 : index
    %16 = vector.load %arg2[%c2_22, %c0_23, %c0_24, %c0_25] : memref<8x1x8x512xf32, #tpu.memory_space<vmem>>, vector<1x1x8x512xf32>
    %17 = vector.shape_cast %16 : vector<1x1x8x512xf32> to vector<8x512xf32>
    %c511_i32_26 = arith.constant 511 : i32
    %18 = tpu.dynamic_rotate %17 by %c511_i32_26 dim 1 : vector<8x512xf32>, i32 -> vector<8x512xf32>
    %c40 = arith.constant 40 : index
    %c0_27 = arith.constant 0 : index
    %19 = vector.load %arg6[%c40, %c0_27] : memref<216x512xf32, #tpu.memory_space<vmem>>, vector<8x512xf32>
    tpu.vector_store %arg6[%c40, %c0_27], %18 {strides = array<i32>} : memref<216x512xf32, #tpu.memory_space<vmem>>, vector<8x512xf32>,
    %c0_28 = arith.constant 0 : index
    %c0_29 = arith.constant 0 : index
    %c0_30 = arith.constant 0 : index
    %c0_31 = arith.constant 0 : index
    %20 = vector.load %arg2[%c0_28, %c0_29, %c0_30, %c0_31] : memref<8x1x8x512xf32, #tpu.memory_space<vmem>>, vector<1x1x8x512xf32>
    %21 = vector.shape_cast %20 : vector<1x1x8x512xf32> to vector<8x512xf32>
    %c507_i32 = arith.constant 507 : i32
    %22 = tpu.dynamic_rotate %21 by %c507_i32 dim 1 : vector<8x512xf32>, i32 -> vector<8x512xf32>
    %c48 = arith.constant 48 : index
    %c0_32 = arith.constant 0 : index
    %23 = vector.load %arg6[%c48, %c0_32] : memref<216x512xf32, #tpu.memory_space<vmem>>, vector<8x512xf32>
    tpu.vector_store %arg6[%c48, %c0_32], %22 {strides = array<i32>} : memref<216x512xf32, #tpu.memory_space<vmem>>, vector<8x512xf32>,
    %c1_33 = arith.constant 1 : index
    %c0_34 = arith.constant 0 : index
    %c0_35 = arith.constant 0 : index
    %c0_36 = arith.constant 0 : index
    %24 = vector.load %arg2[%c1_33, %c0_34, %c0_35, %c0_36] : memref<8x1x8x512xf32, #tpu.memory_space<vmem>>, vector<1x1x8x512xf32>
    %25 = vector.shape_cast %24 : vector<1x1x8x512xf32> to vector<8x512xf32>
    %c507_i32_37 = arith.constant 507 : i32
    %26 = tpu.dynamic_rotate %25 by %c507_i32_37 dim 1 : vector<8x512xf32>, i32 -> vector<8x512xf32>
    %c56 = arith.constant 56 : index
    %c0_38 = arith.constant 0 : index
    %27 = vector.load %arg6[%c56, %c0_38] : memref<216x512xf32, #tpu.memory_space<vmem>>, vector<8x512xf32>
    tpu.vector_store %arg6[%c56, %c0_38], %26 {strides = array<i32>} : memref<216x512xf32, #tpu.memory_space<vmem>>, vector<8x512xf32>,
    %c0_39 = arith.constant 0 : index
    %c0_40 = arith.constant 0 : index
    %c0_41 = arith.constant 0 : index
    %c0_42 = arith.constant 0 : index
    %28 = vector.load %arg2[%c0_39, %c0_40, %c0_41, %c0_42] : memref<8x1x8x512xf32, #tpu.memory_space<vmem>>, vector<1x1x8x512xf32>
    %29 = vector.shape_cast %28 : vector<1x1x8x512xf32> to vector<8x512xf32>
    %c506_i32 = arith.constant 506 : i32
    %30 = tpu.dynamic_rotate %29 by %c506_i32 dim 1 : vector<8x512xf32>, i32 -> vector<8x512xf32>
    %c64 = arith.constant 64 : index
    %c0_43 = arith.constant 0 : index
    %31 = vector.load %arg6[%c64, %c0_43] : memref<216x512xf32, #tpu.memory_space<vmem>>, vector<8x512xf32>
    tpu.vector_store %arg6[%c64, %c0_43], %30 {strides = array<i32>} : memref<216x512xf32, #tpu.memory_space<vmem>>, vector<8x512xf32>,
    %c4 = arith.constant 4 : index
    %c0_44 = arith.constant 0 : index
    %c0_45 = arith.constant 0 : index
    %c0_46 = arith.constant 0 : index
    %32 = vector.load %arg2[%c4, %c0_44, %c0_45, %c0_46] : memref<8x1x8x512xf32, #tpu.memory_space<vmem>>, vector<1x1x8x512xf32>
    %33 = vector.shape_cast %32 : vector<1x1x8x512xf32> to vector<8x512xf32>
    %c72 = arith.constant 72 : index
    %c0_47 = arith.constant 0 : index
    %34 = vector.load %arg6[%c72, %c0_47] : memref<216x512xf32, #tpu.memory_space<vmem>>, vector<8x512xf32>
    tpu.vector_store %arg6[%c72, %c0_47], %33 {strides = array<i32>} : memref<216x512xf32, #tpu.memory_space<vmem>>, vector<8x512xf32>,
    %c5 = arith.constant 5 : index
    %c0_48 = arith.constant 0 : index
    %c0_49 = arith.constant 0 : index
    %c0_50 = arith.constant 0 : index
    %35 = vector.load %arg2[%c5, %c0_48, %c0_49, %c0_50] : memref<8x1x8x512xf32, #tpu.memory_space<vmem>>, vector<1x1x8x512xf32>
    %36 = vector.shape_cast %35 : vector<1x1x8x512xf32> to vector<8x512xf32>
    %c80 = arith.constant 80 : index
    %c0_51 = arith.constant 0 : index
    %37 = vector.load %arg6[%c80, %c0_51] : memref<216x512xf32, #tpu.memory_space<vmem>>, vector<8x512xf32>
    tpu.vector_store %arg6[%c80, %c0_51], %36 {strides = array<i32>} : memref<216x512xf32, #tpu.memory_space<vmem>>, vector<8x512xf32>,
    %c4_52 = arith.constant 4 : index
    %c0_53 = arith.constant 0 : index
    %c0_54 = arith.constant 0 : index
    %c0_55 = arith.constant 0 : index
    %38 = vector.load %arg2[%c4_52, %c0_53, %c0_54, %c0_55] : memref<8x1x8x512xf32, #tpu.memory_space<vmem>>, vector<1x1x8x512xf32>
    %39 = vector.shape_cast %38 : vector<1x1x8x512xf32> to vector<8x512xf32>
    %c511_i32_56 = arith.constant 511 : i32
    %40 = tpu.dynamic_rotate %39 by %c511_i32_56 dim 1 : vector<8x512xf32>, i32 -> vector<8x512xf32>
    %c88 = arith.constant 88 : index
    %c0_57 = arith.constant 0 : index
    %41 = vector.load %arg6[%c88, %c0_57] : memref<216x512xf32, #tpu.memory_space<vmem>>, vector<8x512xf32>
    tpu.vector_store %arg6[%c88, %c0_57], %40 {strides = array<i32>} : memref<216x512xf32, #tpu.memory_space<vmem>>, vector<8x512xf32>,
    %c6 = arith.constant 6 : index
    %c0_58 = arith.constant 0 : index
    %c0_59 = arith.constant 0 : index
    %c0_60 = arith.constant 0 : index
    %42 = vector.load %arg2[%c6, %c0_58, %c0_59, %c0_60] : memref<8x1x8x512xf32, #tpu.memory_space<vmem>>, vector<1x1x8x512xf32>
    %43 = vector.shape_cast %42 : vector<1x1x8x512xf32> to vector<8x512xf32>
    %c96 = arith.constant 96 : index
    %c0_61 = arith.constant 0 : index
    %44 = vector.load %arg6[%c96, %c0_61] : memref<216x512xf32, #tpu.memory_space<vmem>>, vector<8x512xf32>
    tpu.vector_store %arg6[%c96, %c0_61], %43 {strides = array<i32>} : memref<216x512xf32, #tpu.memory_space<vmem>>, vector<8x512xf32>,
    %c7 = arith.constant 7 : index
    %c0_62 = arith.constant 0 : index
    %c0_63 = arith.constant 0 : index
    %c0_64 = arith.constant 0 : index
    %45 = vector.load %arg2[%c7, %c0_62, %c0_63, %c0_64] : memref<8x1x8x512xf32, #tpu.memory_space<vmem>>, vector<1x1x8x512xf32>
    %46 = vector.shape_cast %45 : vector<1x1x8x512xf32> to vector<8x512xf32>
    %c104 = arith.constant 104 : index
    %c0_65 = arith.constant 0 : index
    %47 = vector.load %arg6[%c104, %c0_65] : memref<216x512xf32, #tpu.memory_space<vmem>>, vector<8x512xf32>
    tpu.vector_store %arg6[%c104, %c0_65], %46 {strides = array<i32>} : memref<216x512xf32, #tpu.memory_space<vmem>>, vector<8x512xf32>,
    %c6_66 = arith.constant 6 : index
    %c0_67 = arith.constant 0 : index
    %c0_68 = arith.constant 0 : index
    %c0_69 = arith.constant 0 : index
    %48 = vector.load %arg2[%c6_66, %c0_67, %c0_68, %c0_69] : memref<8x1x8x512xf32, #tpu.memory_space<vmem>>, vector<1x1x8x512xf32>
    %49 = vector.shape_cast %48 : vector<1x1x8x512xf32> to vector<8x512xf32>
    %c511_i32_70 = arith.constant 511 : i32
    %50 = tpu.dynamic_rotate %49 by %c511_i32_70 dim 1 : vector<8x512xf32>, i32 -> vector<8x512xf32>
    %c112 = arith.constant 112 : index
    %c0_71 = arith.constant 0 : index
    %51 = vector.load %arg6[%c112, %c0_71] : memref<216x512xf32, #tpu.memory_space<vmem>>, vector<8x512xf32>
    tpu.vector_store %arg6[%c112, %c0_71], %50 {strides = array<i32>} : memref<216x512xf32, #tpu.memory_space<vmem>>, vector<8x512xf32>,
    %c4_72 = arith.constant 4 : index
    %c0_73 = arith.constant 0 : index
    %c0_74 = arith.constant 0 : index
    %c0_75 = arith.constant 0 : index
    %52 = vector.load %arg2[%c4_72, %c0_73, %c0_74, %c0_75] : memref<8x1x8x512xf32, #tpu.memory_space<vmem>>, vector<1x1x8x512xf32>
    %53 = vector.shape_cast %52 : vector<1x1x8x512xf32> to vector<8x512xf32>
    %c507_i32_76 = arith.constant 507 : i32
    %54 = tpu.dynamic_rotate %53 by %c507_i32_76 dim 1 : vector<8x512xf32>, i32 -> vector<8x512xf32>
    %c120 = arith.constant 120 : index
    %c0_77 = arith.constant 0 : index
    %55 = vector.load %arg6[%c120, %c0_77] : memref<216x512xf32, #tpu.memory_space<vmem>>, vector<8x512xf32>
    tpu.vector_store %arg6[%c120, %c0_77], %54 {strides = array<i32>} : memref<216x512xf32, #tpu.memory_space<vmem>>, vector<8x512xf32>,
    %c5_78 = arith.constant 5 : index
    %c0_79 = arith.constant 0 : index
    %c0_80 = arith.constant 0 : index
    %c0_81 = arith.constant 0 : index
    %56 = vector.load %arg2[%c5_78, %c0_79, %c0_80, %c0_81] : memref<8x1x8x512xf32, #tpu.memory_space<vmem>>, vector<1x1x8x512xf32>
    %57 = vector.shape_cast %56 : vector<1x1x8x512xf32> to vector<8x512xf32>
    %c507_i32_82 = arith.constant 507 : i32
    %58 = tpu.dynamic_rotate %57 by %c507_i32_82 dim 1 : vector<8x512xf32>, i32 -> vector<8x512xf32>
    %c128 = arith.constant 128 : index
    %c0_83 = arith.constant 0 : index
    %59 = vector.load %arg6[%c128, %c0_83] : memref<216x512xf32, #tpu.memory_space<vmem>>, vector<8x512xf32>
    tpu.vector_store %arg6[%c128, %c0_83], %58 {strides = array<i32>} : memref<216x512xf32, #tpu.memory_space<vmem>>, vector<8x512xf32>,
    %c4_84 = arith.constant 4 : index
    %c0_85 = arith.constant 0 : index
    %c0_86 = arith.constant 0 : index
    %c0_87 = arith.constant 0 : index
    %60 = vector.load %arg2[%c4_84, %c0_85, %c0_86, %c0_87] : memref<8x1x8x512xf32, #tpu.memory_space<vmem>>, vector<1x1x8x512xf32>
    %61 = vector.shape_cast %60 : vector<1x1x8x512xf32> to vector<8x512xf32>
    %c506_i32_88 = arith.constant 506 : i32
    %62 = tpu.dynamic_rotate %61 by %c506_i32_88 dim 1 : vector<8x512xf32>, i32 -> vector<8x512xf32>
    %c136 = arith.constant 136 : index
    %c0_89 = arith.constant 0 : index
    %63 = vector.load %arg6[%c136, %c0_89] : memref<216x512xf32, #tpu.memory_space<vmem>>, vector<8x512xf32>
    tpu.vector_store %arg6[%c136, %c0_89], %62 {strides = array<i32>} : memref<216x512xf32, #tpu.memory_space<vmem>>, vector<8x512xf32>,
    %c0_90 = arith.constant 0 : index
    %c0_91 = arith.constant 0 : index
    %c0_92 = arith.constant 0 : index
    %c0_93 = arith.constant 0 : index
    %64 = vector.load %arg2[%c0_90, %c0_91, %c0_92, %c0_93] : memref<8x1x8x512xf32, #tpu.memory_space<vmem>>, vector<1x1x8x512xf32>
    %65 = vector.shape_cast %64 : vector<1x1x8x512xf32> to vector<8x512xf32>
    %c487_i32 = arith.constant 487 : i32
    %66 = tpu.dynamic_rotate %65 by %c487_i32 dim 1 : vector<8x512xf32>, i32 -> vector<8x512xf32>
    %c144 = arith.constant 144 : index
    %c0_94 = arith.constant 0 : index
    %67 = vector.load %arg6[%c144, %c0_94] : memref<216x512xf32, #tpu.memory_space<vmem>>, vector<8x512xf32>
    tpu.vector_store %arg6[%c144, %c0_94], %66 {strides = array<i32>} : memref<216x512xf32, #tpu.memory_space<vmem>>, vector<8x512xf32>,
    %c1_95 = arith.constant 1 : index
    %c0_96 = arith.constant 0 : index
    %c0_97 = arith.constant 0 : index
    %c0_98 = arith.constant 0 : index
    %68 = vector.load %arg2[%c1_95, %c0_96, %c0_97, %c0_98] : memref<8x1x8x512xf32, #tpu.memory_space<vmem>>, vector<1x1x8x512xf32>
    %69 = vector.shape_cast %68 : vector<1x1x8x512xf32> to vector<8x512xf32>
    %c487_i32_99 = arith.constant 487 : i32
    %70 = tpu.dynamic_rotate %69 by %c487_i32_99 dim 1 : vector<8x512xf32>, i32 -> vector<8x512xf32>
    %c152 = arith.constant 152 : index
    %c0_100 = arith.constant 0 : index
    %71 = vector.load %arg6[%c152, %c0_100] : memref<216x512xf32, #tpu.memory_space<vmem>>, vector<8x512xf32>
    tpu.vector_store %arg6[%c152, %c0_100], %70 {strides = array<i32>} : memref<216x512xf32, #tpu.memory_space<vmem>>, vector<8x512xf32>,
    %c0_101 = arith.constant 0 : index
    %c0_102 = arith.constant 0 : index
    %c0_103 = arith.constant 0 : index
    %c0_104 = arith.constant 0 : index
    %72 = vector.load %arg2[%c0_101, %c0_102, %c0_103, %c0_104] : memref<8x1x8x512xf32, #tpu.memory_space<vmem>>, vector<1x1x8x512xf32>
    %73 = vector.shape_cast %72 : vector<1x1x8x512xf32> to vector<8x512xf32>
    %c486_i32 = arith.constant 486 : i32
    %74 = tpu.dynamic_rotate %73 by %c486_i32 dim 1 : vector<8x512xf32>, i32 -> vector<8x512xf32>
    %c160 = arith.constant 160 : index
    %c0_105 = arith.constant 0 : index
    %75 = vector.load %arg6[%c160, %c0_105] : memref<216x512xf32, #tpu.memory_space<vmem>>, vector<8x512xf32>
    tpu.vector_store %arg6[%c160, %c0_105], %74 {strides = array<i32>} : memref<216x512xf32, #tpu.memory_space<vmem>>, vector<8x512xf32>,
    %c2_106 = arith.constant 2 : index
    %c0_107 = arith.constant 0 : index
    %c0_108 = arith.constant 0 : index
    %c0_109 = arith.constant 0 : index
    %76 = vector.load %arg2[%c2_106, %c0_107, %c0_108, %c0_109] : memref<8x1x8x512xf32, #tpu.memory_space<vmem>>, vector<1x1x8x512xf32>
    %77 = vector.shape_cast %76 : vector<1x1x8x512xf32> to vector<8x512xf32>
    %c487_i32_110 = arith.constant 487 : i32
    %78 = tpu.dynamic_rotate %77 by %c487_i32_110 dim 1 : vector<8x512xf32>, i32 -> vector<8x512xf32>
    %c168 = arith.constant 168 : index
    %c0_111 = arith.constant 0 : index
    %79 = vector.load %arg6[%c168, %c0_111] : memref<216x512xf32, #tpu.memory_space<vmem>>, vector<8x512xf32>
    tpu.vector_store %arg6[%c168, %c0_111], %78 {strides = array<i32>} : memref<216x512xf32, #tpu.memory_space<vmem>>, vector<8x512xf32>,
    %c3_112 = arith.constant 3 : index
    %c0_113 = arith.constant 0 : index
    %c0_114 = arith.constant 0 : index
    %c0_115 = arith.constant 0 : index
    %80 = vector.load %arg2[%c3_112, %c0_113, %c0_114, %c0_115] : memref<8x1x8x512xf32, #tpu.memory_space<vmem>>, vector<1x1x8x512xf32>
    %81 = vector.shape_cast %80 : vector<1x1x8x512xf32> to vector<8x512xf32>
    %c487_i32_116 = arith.constant 487 : i32
    %82 = tpu.dynamic_rotate %81 by %c487_i32_116 dim 1 : vector<8x512xf32>, i32 -> vector<8x512xf32>
    %c176 = arith.constant 176 : index
    %c0_117 = arith.constant 0 : index
    %83 = vector.load %arg6[%c176, %c0_117] : memref<216x512xf32, #tpu.memory_space<vmem>>, vector<8x512xf32>
    tpu.vector_store %arg6[%c176, %c0_117], %82 {strides = array<i32>} : memref<216x512xf32, #tpu.memory_space<vmem>>, vector<8x512xf32>,
    %c2_118 = arith.constant 2 : index
    %c0_119 = arith.constant 0 : index
    %c0_120 = arith.constant 0 : index
    %c0_121 = arith.constant 0 : index
    %84 = vector.load %arg2[%c2_118, %c0_119, %c0_120, %c0_121] : memref<8x1x8x512xf32, #tpu.memory_space<vmem>>, vector<1x1x8x512xf32>
    %85 = vector.shape_cast %84 : vector<1x1x8x512xf32> to vector<8x512xf32>
    %c486_i32_122 = arith.constant 486 : i32
    %86 = tpu.dynamic_rotate %85 by %c486_i32_122 dim 1 : vector<8x512xf32>, i32 -> vector<8x512xf32>
    %c184 = arith.constant 184 : index
    %c0_123 = arith.constant 0 : index
    %87 = vector.load %arg6[%c184, %c0_123] : memref<216x512xf32, #tpu.memory_space<vmem>>, vector<8x512xf32>
    tpu.vector_store %arg6[%c184, %c0_123], %86 {strides = array<i32>} : memref<216x512xf32, #tpu.memory_space<vmem>>, vector<8x512xf32>,
    %c0_124 = arith.constant 0 : index
    %c0_125 = arith.constant 0 : index
    %c0_126 = arith.constant 0 : index
    %c0_127 = arith.constant 0 : index
    %88 = vector.load %arg2[%c0_124, %c0_125, %c0_126, %c0_127] : memref<8x1x8x512xf32, #tpu.memory_space<vmem>>, vector<1x1x8x512xf32>
    %89 = vector.shape_cast %88 : vector<1x1x8x512xf32> to vector<8x512xf32>
    %c482_i32 = arith.constant 482 : i32
    %90 = tpu.dynamic_rotate %89 by %c482_i32 dim 1 : vector<8x512xf32>, i32 -> vector<8x512xf32>
    %c192 = arith.constant 192 : index
    %c0_128 = arith.constant 0 : index
    %91 = vector.load %arg6[%c192, %c0_128] : memref<216x512xf32, #tpu.memory_space<vmem>>, vector<8x512xf32>
    tpu.vector_store %arg6[%c192, %c0_128], %90 {strides = array<i32>} : memref<216x512xf32, #tpu.memory_space<vmem>>, vector<8x512xf32>,
    %c1_129 = arith.constant 1 : index
    %c0_130 = arith.constant 0 : index
    %c0_131 = arith.constant 0 : index
    %c0_132 = arith.constant 0 : index
    %92 = vector.load %arg2[%c1_129, %c0_130, %c0_131, %c0_132] : memref<8x1x8x512xf32, #tpu.memory_space<vmem>>, vector<1x1x8x512xf32>
    %93 = vector.shape_cast %92 : vector<1x1x8x512xf32> to vector<8x512xf32>
    %c482_i32_133 = arith.constant 482 : i32
    %94 = tpu.dynamic_rotate %93 by %c482_i32_133 dim 1 : vector<8x512xf32>, i32 -> vector<8x512xf32>
    %c200 = arith.constant 200 : index
    %c0_134 = arith.constant 0 : index
    %95 = vector.load %arg6[%c200, %c0_134] : memref<216x512xf32, #tpu.memory_space<vmem>>, vector<8x512xf32>
    tpu.vector_store %arg6[%c200, %c0_134], %94 {strides = array<i32>} : memref<216x512xf32, #tpu.memory_space<vmem>>, vector<8x512xf32>,
    %c0_135 = arith.constant 0 : index
    %c0_136 = arith.constant 0 : index
    %c0_137 = arith.constant 0 : index
    %c0_138 = arith.constant 0 : index
    %96 = vector.load %arg2[%c0_135, %c0_136, %c0_137, %c0_138] : memref<8x1x8x512xf32, #tpu.memory_space<vmem>>, vector<1x1x8x512xf32>
    %97 = vector.shape_cast %96 : vector<1x1x8x512xf32> to vector<8x512xf32>
    %c481_i32 = arith.constant 481 : i32
    %98 = tpu.dynamic_rotate %97 by %c481_i32 dim 1 : vector<8x512xf32>, i32 -> vector<8x512xf32>
    %c208 = arith.constant 208 : index
    %c0_139 = arith.constant 0 : index
    %99 = vector.load %arg6[%c208, %c0_139] : memref<216x512xf32, #tpu.memory_space<vmem>>, vector<8x512xf32>
    tpu.vector_store %arg6[%c208, %c0_139], %98 {strides = array<i32>} : memref<216x512xf32, #tpu.memory_space<vmem>>, vector<8x512xf32>,
    %c0_i32 = arith.constant 0 : i32
    %100 = arith.cmpi eq, %arg1, %c0_i32 : i32
    %101 = arith.extui %100 : i1 to i32
    %c0_i32_140 = arith.constant 0 : i32
    %102 = arith.cmpi ne, %101, %c0_i32_140 : i32
    scf.if %102 {
      %cst_151 = arith.constant 0.000000e+00 : f32
      %113 = vector.broadcast %cst_151 : f32 to vector<16x512xf32>
      %c0_152 = arith.constant 0 : index
      %c0_153 = arith.constant 0 : index
      %114 = vector.load %arg7[%c0_152, %c0_153] : memref<16x512xf32, #tpu.memory_space<vmem>>, vector<16x512xf32>
      tpu.vector_store %arg7[%c0_152, %c0_153], %113 {strides = array<i32>} : memref<16x512xf32, #tpu.memory_space<vmem>>, vector<16x512xf32>,
    } else {
    }
    %c0_141 = arith.constant 0 : index
    %c0_142 = arith.constant 0 : index
    %103 = vector.load %arg7[%c0_141, %c0_142] : memref<16x512xf32, #tpu.memory_space<vmem>>, vector<16x512xf32>
    %c0_143 = arith.constant 0 : index
    %c0_144 = arith.constant 0 : index
    %c0_145 = arith.constant 0 : index
    %104 = vector.load %arg3[%c0_143, %c0_144, %c0_145] : memref<1x16x216xf32, #tpu.memory_space<vmem>>, vector<1x16x216xf32>
    %105 = vector.shape_cast %104 : vector<1x16x216xf32> to vector<16x216xf32>
    %c0_146 = arith.constant 0 : index
    %c0_147 = arith.constant 0 : index
    %106 = vector.load %arg6[%c0_146, %c0_147] : memref<216x512xf32, #tpu.memory_space<vmem>>, vector<216x512xf32>
    %cst = arith.constant dense<0.000000e+00> : vector<16x512xf32>
    %107 = tpu.matmul %105, %106, %cst {dimension_numbers = #tpu.dot_dimension_numbers<[1], [0], [0], [1], [0, 0, 1, 1], [], []>} : vector<16x216xf32>, vector<216x512xf32>, vector<16x512xf32> -> vector<16x512xf32>
    %108 = arith.addf %103, %107 : vector<16x512xf32>
    %c0_148 = arith.constant 0 : index
    %c0_149 = arith.constant 0 : index
    %109 = vector.load %arg7[%c0_148, %c0_149] : memref<16x512xf32, #tpu.memory_space<vmem>>, vector<16x512xf32>
    tpu.vector_store %arg7[%c0_148, %c0_149], %108 {strides = array<i32>} : memref<16x512xf32, #tpu.memory_space<vmem>>, vector<16x512xf32>,
    %c2_i32 = arith.constant 2 : i32
    %110 = arith.cmpi eq, %arg1, %c2_i32 : i32
    %111 = arith.extui %110 : i1 to i32
    %c0_i32_150 = arith.constant 0 : i32
    %112 = arith.cmpi ne, %111, %c0_i32_150 : i32
    scf.if %112 {
      %c0_151 = arith.constant 0 : index
      %c0_152 = arith.constant 0 : index
      %113 = vector.load %arg7[%c0_151, %c0_152] : memref<16x512xf32, #tpu.memory_space<vmem>>, vector<16x512xf32>
      %c0_153 = arith.constant 0 : index
      %c0_154 = arith.constant 0 : index
      %114 = vector.load %arg4[%c0_153, %c0_154] : memref<16x1xf32, #tpu.memory_space<vmem>>, vector<16x1xf32>
      %115 = vector.broadcast %114 : vector<16x1xf32> to vector<16x512xf32>
      %116 = arith.addf %113, %115 : vector<16x512xf32>
      %cst_155 = arith.constant 5.000000e-01 : f32
      %117 = vector.broadcast %cst_155 : f32 to vector<16x512xf32>
      %118 = arith.mulf %117, %116 : vector<16x512xf32>
      %cst_156 = arith.constant 0.707106769 : f32
      %119 = vector.broadcast %cst_156 : f32 to vector<16x512xf32>
      %120 = arith.mulf %116, %119 : vector<16x512xf32>
      %cst_157 = arith.constant 0.000000e+00 : f32
      %121 = vector.broadcast %cst_157 : f32 to vector<16x512xf32>
      %122 = arith.cmpf oge, %120, %121 : vector<16x512xf32>
      %cst_158 = arith.constant 1.000000e+00 : f32
      %cst_159 = arith.constant -1.000000e+00 : f32
      %123 = vector.broadcast %cst_158 : f32 to vector<16x512xf32>
      %124 = vector.broadcast %cst_159 : f32 to vector<16x512xf32>
      %125 = arith.select %122, %123, %124 : vector<16x512xi1>, vector<16x512xf32>
      %126 = math.absf %120 : vector<16x512xf32>
      %cst_160 = arith.constant 0.327591091 : f32
      %127 = vector.broadcast %cst_160 : f32 to vector<16x512xf32>
      %128 = arith.mulf %127, %126 : vector<16x512xf32>
      %cst_161 = arith.constant 1.000000e+00 : f32
      %129 = vector.broadcast %cst_161 : f32 to vector<16x512xf32>
      %130 = arith.addf %129, %128 : vector<16x512xf32>
      %cst_162 = arith.constant 1.000000e+00 : f32
      %131 = vector.broadcast %cst_162 : f32 to vector<16x512xf32>
      %132 = arith.divf %131, %130 : vector<16x512xf32>
      %cst_163 = arith.constant 1.06140542 : f32
      %133 = vector.broadcast %cst_163 : f32 to vector<16x512xf32>
      %134 = arith.mulf %133, %132 : vector<16x512xf32>
      %cst_164 = arith.constant -1.45315206 : f32
      %135 = vector.broadcast %cst_164 : f32 to vector<16x512xf32>
      %136 = arith.addf %134, %135 : vector<16x512xf32>
      %137 = arith.mulf %136, %132 : vector<16x512xf32>
      %cst_165 = arith.constant 1.42141378 : f32
      %138 = vector.broadcast %cst_165 : f32 to vector<16x512xf32>
      %139 = arith.addf %137, %138 : vector<16x512xf32>
      %140 = arith.mulf %139, %132 : vector<16x512xf32>
      %cst_166 = arith.constant -0.284496725 : f32
      %141 = vector.broadcast %cst_166 : f32 to vector<16x512xf32>
      %142 = arith.addf %140, %141 : vector<16x512xf32>
      %143 = arith.mulf %142, %132 : vector<16x512xf32>
      %cst_167 = arith.constant 0.254829586 : f32
      %144 = vector.broadcast %cst_167 : f32 to vector<16x512xf32>
      %145 = arith.addf %143, %144 : vector<16x512xf32>
      %146 = arith.mulf %145, %132 : vector<16x512xf32>
      %cst_168 = arith.constant 0.000000e+00 : f32
      %147 = vector.broadcast %cst_168 : f32 to vector<16x512xf32>
      %148 = arith.subf %147, %126 : vector<16x512xf32>
      %149 = arith.mulf %148, %126 : vector<16x512xf32>
      %150 = math.exp %149 : vector<16x512xf32>
      %151 = arith.mulf %146, %150 : vector<16x512xf32>
      %cst_169 = arith.constant 1.000000e+00 : f32
      %152 = vector.broadcast %cst_169 : f32 to vector<16x512xf32>
      %153 = arith.subf %152, %151 : vector<16x512xf32>
      %154 = arith.mulf %125, %153 : vector<16x512xf32>
      %cst_170 = arith.constant 1.000000e+00 : f32
      %155 = vector.broadcast %cst_170 : f32 to vector<16x512xf32>
      %156 = arith.addf %155, %154 : vector<16x512xf32>
      %157 = arith.mulf %118, %156 : vector<16x512xf32>
      %c0_171 = arith.constant 0 : index
      %c0_172 = arith.constant 0 : index
      %c0_173 = arith.constant 0 : index
      %158 = vector.load %arg5[%c0_171, %c0_172, %c0_173] : memref<1x16x512xf32, #tpu.memory_space<vmem>>, vector<1x16x512xf32>
      %159 = vector.shape_cast %158 : vector<1x16x512xf32> to vector<16x512xf32>
      %160 = vector.shape_cast %157 : vector<16x512xf32> to vector<1x16x512xf32>
      tpu.vector_store %arg5[%c0_171, %c0_172, %c0_173], %160 {strides = array<i32>} : memref<1x16x512xf32, #tpu.memory_space<vmem>>, vector<1x16x512xf32>,
    } else {
    }
    return
  }
  func.func @transform_0(%arg0: i32, %arg1: i32) -> (i32, i32, i32, i32) {
    %c0_i32 = arith.constant 0 : i32
    %c0_i32_0 = arith.constant 0 : i32
    %c0_i32_1 = arith.constant 0 : i32
    return %arg1, %arg0, %c0_i32, %c0_i32_0 : i32, i32, i32, i32
  }
  func.func @transform_1(%arg0: i32, %arg1: i32) -> (i32, i32, i32) {
    %c0_i32 = arith.constant 0 : i32
    %c0_i32_0 = arith.constant 0 : i32
    %c0_i32_1 = arith.constant 0 : i32
    return %arg1, %c0_i32, %c0_i32_0 : i32, i32, i32
  }
  func.func @transform_2(%arg0: i32, %arg1: i32) -> (i32, i32) {
    %c0_i32 = arith.constant 0 : i32
    %c0_i32_0 = arith.constant 0 : i32
    %c0_i32_1 = arith.constant 0 : i32
    return %c0_i32, %c0_i32_0 : i32, i32
  }
  func.func @transform_3(%arg0: i32, %arg1: i32) -> (i32, i32, i32) {
    %c0_i32 = arith.constant 0 : i32
    %c0_i32_0 = arith.constant 0 : i32
    %c0_i32_1 = arith.constant 0 : i32
    return %arg0, %c0_i32, %c0_i32_0 : i32, i32, i32
  }
}

module attributes {stable_mosaic.version = 11 : i64} {
  func.func @_conv4d_kernel(%arg0: i32, %arg1: i32, %arg2: memref<8x1x16x128xf32, #tpu.memory_space<vmem>>, %arg3: memref<1x8x432xf32, #tpu.memory_space<vmem>>, %arg4: memref<8x1xf32, #tpu.memory_space<vmem>>, %arg5: memref<1x8x128xf32, #tpu.memory_space<vmem>>, %arg6: memref<432x128xf32, #tpu.memory_space<vmem>>, %arg7: memref<8x128xf32, #tpu.memory_space<vmem>>) attributes {dimension_semantics = [#tpu.dimension_semantics<parallel>, #tpu.dimension_semantics<arbitrary>], iteration_bounds = array<i64: 2, 3>, scalar_prefetch = 0 : i64, scratch_operands = 2 : i64, tpu.core_type = #tpu.core_type<tc>, window_params = [{transform_indices = @transform_0, window_bounds = array<i64: 8, 1, 16, 128>}, {transform_indices = @transform_1, window_bounds = array<i64: 1, 8, 432>}, {pipeline_mode = #tpu.pipeline_mode<synchronous>, transform_indices = @transform_2, window_bounds = array<i64: 8, 1>}, {transform_indices = @transform_3, window_bounds = array<i64: 1, 8, 128>}]} {
    %c0 = arith.constant 0 : index
    %c0_0 = arith.constant 0 : index
    %c0_1 = arith.constant 0 : index
    %c0_2 = arith.constant 0 : index
    %0 = vector.load %arg2[%c0, %c0_0, %c0_1, %c0_2] : memref<8x1x16x128xf32, #tpu.memory_space<vmem>>, vector<1x1x16x128xf32>
    %1 = vector.shape_cast %0 : vector<1x1x16x128xf32> to vector<16x128xf32>
    %c0_3 = arith.constant 0 : index
    %c0_4 = arith.constant 0 : index
    %2 = vector.load %arg6[%c0_3, %c0_4] : memref<432x128xf32, #tpu.memory_space<vmem>>, vector<16x128xf32>
    tpu.vector_store %arg6[%c0_3, %c0_4], %1 {strides = array<i32>} : memref<432x128xf32, #tpu.memory_space<vmem>>, vector<16x128xf32>,
    %c1 = arith.constant 1 : index
    %c0_5 = arith.constant 0 : index
    %c0_6 = arith.constant 0 : index
    %c0_7 = arith.constant 0 : index
    %3 = vector.load %arg2[%c1, %c0_5, %c0_6, %c0_7] : memref<8x1x16x128xf32, #tpu.memory_space<vmem>>, vector<1x1x16x128xf32>
    %4 = vector.shape_cast %3 : vector<1x1x16x128xf32> to vector<16x128xf32>
    %c16 = arith.constant 16 : index
    %c0_8 = arith.constant 0 : index
    %5 = vector.load %arg6[%c16, %c0_8] : memref<432x128xf32, #tpu.memory_space<vmem>>, vector<16x128xf32>
    tpu.vector_store %arg6[%c16, %c0_8], %4 {strides = array<i32>} : memref<432x128xf32, #tpu.memory_space<vmem>>, vector<16x128xf32>,
    %c0_9 = arith.constant 0 : index
    %c0_10 = arith.constant 0 : index
    %c0_11 = arith.constant 0 : index
    %c0_12 = arith.constant 0 : index
    %6 = vector.load %arg2[%c0_9, %c0_10, %c0_11, %c0_12] : memref<8x1x16x128xf32, #tpu.memory_space<vmem>>, vector<1x1x16x128xf32>
    %7 = vector.shape_cast %6 : vector<1x1x16x128xf32> to vector<16x128xf32>
    %c127_i32 = arith.constant 127 : i32
    %8 = tpu.dynamic_rotate %7 by %c127_i32 dim 1 : vector<16x128xf32>, i32 -> vector<16x128xf32>
    %c32 = arith.constant 32 : index
    %c0_13 = arith.constant 0 : index
    %9 = vector.load %arg6[%c32, %c0_13] : memref<432x128xf32, #tpu.memory_space<vmem>>, vector<16x128xf32>
    tpu.vector_store %arg6[%c32, %c0_13], %8 {strides = array<i32>} : memref<432x128xf32, #tpu.memory_space<vmem>>, vector<16x128xf32>,
    %c2 = arith.constant 2 : index
    %c0_14 = arith.constant 0 : index
    %c0_15 = arith.constant 0 : index
    %c0_16 = arith.constant 0 : index
    %10 = vector.load %arg2[%c2, %c0_14, %c0_15, %c0_16] : memref<8x1x16x128xf32, #tpu.memory_space<vmem>>, vector<1x1x16x128xf32>
    %11 = vector.shape_cast %10 : vector<1x1x16x128xf32> to vector<16x128xf32>
    %c48 = arith.constant 48 : index
    %c0_17 = arith.constant 0 : index
    %12 = vector.load %arg6[%c48, %c0_17] : memref<432x128xf32, #tpu.memory_space<vmem>>, vector<16x128xf32>
    tpu.vector_store %arg6[%c48, %c0_17], %11 {strides = array<i32>} : memref<432x128xf32, #tpu.memory_space<vmem>>, vector<16x128xf32>,
    %c3 = arith.constant 3 : index
    %c0_18 = arith.constant 0 : index
    %c0_19 = arith.constant 0 : index
    %c0_20 = arith.constant 0 : index
    %13 = vector.load %arg2[%c3, %c0_18, %c0_19, %c0_20] : memref<8x1x16x128xf32, #tpu.memory_space<vmem>>, vector<1x1x16x128xf32>
    %14 = vector.shape_cast %13 : vector<1x1x16x128xf32> to vector<16x128xf32>
    %c64 = arith.constant 64 : index
    %c0_21 = arith.constant 0 : index
    %15 = vector.load %arg6[%c64, %c0_21] : memref<432x128xf32, #tpu.memory_space<vmem>>, vector<16x128xf32>
    tpu.vector_store %arg6[%c64, %c0_21], %14 {strides = array<i32>} : memref<432x128xf32, #tpu.memory_space<vmem>>, vector<16x128xf32>,
    %c2_22 = arith.constant 2 : index
    %c0_23 = arith.constant 0 : index
    %c0_24 = arith.constant 0 : index
    %c0_25 = arith.constant 0 : index
    %16 = vector.load %arg2[%c2_22, %c0_23, %c0_24, %c0_25] : memref<8x1x16x128xf32, #tpu.memory_space<vmem>>, vector<1x1x16x128xf32>
    %17 = vector.shape_cast %16 : vector<1x1x16x128xf32> to vector<16x128xf32>
    %c127_i32_26 = arith.constant 127 : i32
    %18 = tpu.dynamic_rotate %17 by %c127_i32_26 dim 1 : vector<16x128xf32>, i32 -> vector<16x128xf32>
    %c80 = arith.constant 80 : index
    %c0_27 = arith.constant 0 : index
    %19 = vector.load %arg6[%c80, %c0_27] : memref<432x128xf32, #tpu.memory_space<vmem>>, vector<16x128xf32>
    tpu.vector_store %arg6[%c80, %c0_27], %18 {strides = array<i32>} : memref<432x128xf32, #tpu.memory_space<vmem>>, vector<16x128xf32>,
    %c0_28 = arith.constant 0 : index
    %c0_29 = arith.constant 0 : index
    %c0_30 = arith.constant 0 : index
    %c0_31 = arith.constant 0 : index
    %20 = vector.load %arg2[%c0_28, %c0_29, %c0_30, %c0_31] : memref<8x1x16x128xf32, #tpu.memory_space<vmem>>, vector<1x1x16x128xf32>
    %21 = vector.shape_cast %20 : vector<1x1x16x128xf32> to vector<16x128xf32>
    %c125_i32 = arith.constant 125 : i32
    %22 = tpu.dynamic_rotate %21 by %c125_i32 dim 1 : vector<16x128xf32>, i32 -> vector<16x128xf32>
    %c96 = arith.constant 96 : index
    %c0_32 = arith.constant 0 : index
    %23 = vector.load %arg6[%c96, %c0_32] : memref<432x128xf32, #tpu.memory_space<vmem>>, vector<16x128xf32>
    tpu.vector_store %arg6[%c96, %c0_32], %22 {strides = array<i32>} : memref<432x128xf32, #tpu.memory_space<vmem>>, vector<16x128xf32>,
    %c1_33 = arith.constant 1 : index
    %c0_34 = arith.constant 0 : index
    %c0_35 = arith.constant 0 : index
    %c0_36 = arith.constant 0 : index
    %24 = vector.load %arg2[%c1_33, %c0_34, %c0_35, %c0_36] : memref<8x1x16x128xf32, #tpu.memory_space<vmem>>, vector<1x1x16x128xf32>
    %25 = vector.shape_cast %24 : vector<1x1x16x128xf32> to vector<16x128xf32>
    %c125_i32_37 = arith.constant 125 : i32
    %26 = tpu.dynamic_rotate %25 by %c125_i32_37 dim 1 : vector<16x128xf32>, i32 -> vector<16x128xf32>
    %c112 = arith.constant 112 : index
    %c0_38 = arith.constant 0 : index
    %27 = vector.load %arg6[%c112, %c0_38] : memref<432x128xf32, #tpu.memory_space<vmem>>, vector<16x128xf32>
    tpu.vector_store %arg6[%c112, %c0_38], %26 {strides = array<i32>} : memref<432x128xf32, #tpu.memory_space<vmem>>, vector<16x128xf32>,
    %c0_39 = arith.constant 0 : index
    %c0_40 = arith.constant 0 : index
    %c0_41 = arith.constant 0 : index
    %c0_42 = arith.constant 0 : index
    %28 = vector.load %arg2[%c0_39, %c0_40, %c0_41, %c0_42] : memref<8x1x16x128xf32, #tpu.memory_space<vmem>>, vector<1x1x16x128xf32>
    %29 = vector.shape_cast %28 : vector<1x1x16x128xf32> to vector<16x128xf32>
    %c124_i32 = arith.constant 124 : i32
    %30 = tpu.dynamic_rotate %29 by %c124_i32 dim 1 : vector<16x128xf32>, i32 -> vector<16x128xf32>
    %c128 = arith.constant 128 : index
    %c0_43 = arith.constant 0 : index
    %31 = vector.load %arg6[%c128, %c0_43] : memref<432x128xf32, #tpu.memory_space<vmem>>, vector<16x128xf32>
    tpu.vector_store %arg6[%c128, %c0_43], %30 {strides = array<i32>} : memref<432x128xf32, #tpu.memory_space<vmem>>, vector<16x128xf32>,
    %c4 = arith.constant 4 : index
    %c0_44 = arith.constant 0 : index
    %c0_45 = arith.constant 0 : index
    %c0_46 = arith.constant 0 : index
    %32 = vector.load %arg2[%c4, %c0_44, %c0_45, %c0_46] : memref<8x1x16x128xf32, #tpu.memory_space<vmem>>, vector<1x1x16x128xf32>
    %33 = vector.shape_cast %32 : vector<1x1x16x128xf32> to vector<16x128xf32>
    %c144 = arith.constant 144 : index
    %c0_47 = arith.constant 0 : index
    %34 = vector.load %arg6[%c144, %c0_47] : memref<432x128xf32, #tpu.memory_space<vmem>>, vector<16x128xf32>
    tpu.vector_store %arg6[%c144, %c0_47], %33 {strides = array<i32>} : memref<432x128xf32, #tpu.memory_space<vmem>>, vector<16x128xf32>,
    %c5 = arith.constant 5 : index
    %c0_48 = arith.constant 0 : index
    %c0_49 = arith.constant 0 : index
    %c0_50 = arith.constant 0 : index
    %35 = vector.load %arg2[%c5, %c0_48, %c0_49, %c0_50] : memref<8x1x16x128xf32, #tpu.memory_space<vmem>>, vector<1x1x16x128xf32>
    %36 = vector.shape_cast %35 : vector<1x1x16x128xf32> to vector<16x128xf32>
    %c160 = arith.constant 160 : index
    %c0_51 = arith.constant 0 : index
    %37 = vector.load %arg6[%c160, %c0_51] : memref<432x128xf32, #tpu.memory_space<vmem>>, vector<16x128xf32>
    tpu.vector_store %arg6[%c160, %c0_51], %36 {strides = array<i32>} : memref<432x128xf32, #tpu.memory_space<vmem>>, vector<16x128xf32>,
    %c4_52 = arith.constant 4 : index
    %c0_53 = arith.constant 0 : index
    %c0_54 = arith.constant 0 : index
    %c0_55 = arith.constant 0 : index
    %38 = vector.load %arg2[%c4_52, %c0_53, %c0_54, %c0_55] : memref<8x1x16x128xf32, #tpu.memory_space<vmem>>, vector<1x1x16x128xf32>
    %39 = vector.shape_cast %38 : vector<1x1x16x128xf32> to vector<16x128xf32>
    %c127_i32_56 = arith.constant 127 : i32
    %40 = tpu.dynamic_rotate %39 by %c127_i32_56 dim 1 : vector<16x128xf32>, i32 -> vector<16x128xf32>
    %c176 = arith.constant 176 : index
    %c0_57 = arith.constant 0 : index
    %41 = vector.load %arg6[%c176, %c0_57] : memref<432x128xf32, #tpu.memory_space<vmem>>, vector<16x128xf32>
    tpu.vector_store %arg6[%c176, %c0_57], %40 {strides = array<i32>} : memref<432x128xf32, #tpu.memory_space<vmem>>, vector<16x128xf32>,
    %c6 = arith.constant 6 : index
    %c0_58 = arith.constant 0 : index
    %c0_59 = arith.constant 0 : index
    %c0_60 = arith.constant 0 : index
    %42 = vector.load %arg2[%c6, %c0_58, %c0_59, %c0_60] : memref<8x1x16x128xf32, #tpu.memory_space<vmem>>, vector<1x1x16x128xf32>
    %43 = vector.shape_cast %42 : vector<1x1x16x128xf32> to vector<16x128xf32>
    %c192 = arith.constant 192 : index
    %c0_61 = arith.constant 0 : index
    %44 = vector.load %arg6[%c192, %c0_61] : memref<432x128xf32, #tpu.memory_space<vmem>>, vector<16x128xf32>
    tpu.vector_store %arg6[%c192, %c0_61], %43 {strides = array<i32>} : memref<432x128xf32, #tpu.memory_space<vmem>>, vector<16x128xf32>,
    %c7 = arith.constant 7 : index
    %c0_62 = arith.constant 0 : index
    %c0_63 = arith.constant 0 : index
    %c0_64 = arith.constant 0 : index
    %45 = vector.load %arg2[%c7, %c0_62, %c0_63, %c0_64] : memref<8x1x16x128xf32, #tpu.memory_space<vmem>>, vector<1x1x16x128xf32>
    %46 = vector.shape_cast %45 : vector<1x1x16x128xf32> to vector<16x128xf32>
    %c208 = arith.constant 208 : index
    %c0_65 = arith.constant 0 : index
    %47 = vector.load %arg6[%c208, %c0_65] : memref<432x128xf32, #tpu.memory_space<vmem>>, vector<16x128xf32>
    tpu.vector_store %arg6[%c208, %c0_65], %46 {strides = array<i32>} : memref<432x128xf32, #tpu.memory_space<vmem>>, vector<16x128xf32>,
    %c6_66 = arith.constant 6 : index
    %c0_67 = arith.constant 0 : index
    %c0_68 = arith.constant 0 : index
    %c0_69 = arith.constant 0 : index
    %48 = vector.load %arg2[%c6_66, %c0_67, %c0_68, %c0_69] : memref<8x1x16x128xf32, #tpu.memory_space<vmem>>, vector<1x1x16x128xf32>
    %49 = vector.shape_cast %48 : vector<1x1x16x128xf32> to vector<16x128xf32>
    %c127_i32_70 = arith.constant 127 : i32
    %50 = tpu.dynamic_rotate %49 by %c127_i32_70 dim 1 : vector<16x128xf32>, i32 -> vector<16x128xf32>
    %c224 = arith.constant 224 : index
    %c0_71 = arith.constant 0 : index
    %51 = vector.load %arg6[%c224, %c0_71] : memref<432x128xf32, #tpu.memory_space<vmem>>, vector<16x128xf32>
    tpu.vector_store %arg6[%c224, %c0_71], %50 {strides = array<i32>} : memref<432x128xf32, #tpu.memory_space<vmem>>, vector<16x128xf32>,
    %c4_72 = arith.constant 4 : index
    %c0_73 = arith.constant 0 : index
    %c0_74 = arith.constant 0 : index
    %c0_75 = arith.constant 0 : index
    %52 = vector.load %arg2[%c4_72, %c0_73, %c0_74, %c0_75] : memref<8x1x16x128xf32, #tpu.memory_space<vmem>>, vector<1x1x16x128xf32>
    %53 = vector.shape_cast %52 : vector<1x1x16x128xf32> to vector<16x128xf32>
    %c125_i32_76 = arith.constant 125 : i32
    %54 = tpu.dynamic_rotate %53 by %c125_i32_76 dim 1 : vector<16x128xf32>, i32 -> vector<16x128xf32>
    %c240 = arith.constant 240 : index
    %c0_77 = arith.constant 0 : index
    %55 = vector.load %arg6[%c240, %c0_77] : memref<432x128xf32, #tpu.memory_space<vmem>>, vector<16x128xf32>
    tpu.vector_store %arg6[%c240, %c0_77], %54 {strides = array<i32>} : memref<432x128xf32, #tpu.memory_space<vmem>>, vector<16x128xf32>,
    %c5_78 = arith.constant 5 : index
    %c0_79 = arith.constant 0 : index
    %c0_80 = arith.constant 0 : index
    %c0_81 = arith.constant 0 : index
    %56 = vector.load %arg2[%c5_78, %c0_79, %c0_80, %c0_81] : memref<8x1x16x128xf32, #tpu.memory_space<vmem>>, vector<1x1x16x128xf32>
    %57 = vector.shape_cast %56 : vector<1x1x16x128xf32> to vector<16x128xf32>
    %c125_i32_82 = arith.constant 125 : i32
    %58 = tpu.dynamic_rotate %57 by %c125_i32_82 dim 1 : vector<16x128xf32>, i32 -> vector<16x128xf32>
    %c256 = arith.constant 256 : index
    %c0_83 = arith.constant 0 : index
    %59 = vector.load %arg6[%c256, %c0_83] : memref<432x128xf32, #tpu.memory_space<vmem>>, vector<16x128xf32>
    tpu.vector_store %arg6[%c256, %c0_83], %58 {strides = array<i32>} : memref<432x128xf32, #tpu.memory_space<vmem>>, vector<16x128xf32>,
    %c4_84 = arith.constant 4 : index
    %c0_85 = arith.constant 0 : index
    %c0_86 = arith.constant 0 : index
    %c0_87 = arith.constant 0 : index
    %60 = vector.load %arg2[%c4_84, %c0_85, %c0_86, %c0_87] : memref<8x1x16x128xf32, #tpu.memory_space<vmem>>, vector<1x1x16x128xf32>
    %61 = vector.shape_cast %60 : vector<1x1x16x128xf32> to vector<16x128xf32>
    %c124_i32_88 = arith.constant 124 : i32
    %62 = tpu.dynamic_rotate %61 by %c124_i32_88 dim 1 : vector<16x128xf32>, i32 -> vector<16x128xf32>
    %c272 = arith.constant 272 : index
    %c0_89 = arith.constant 0 : index
    %63 = vector.load %arg6[%c272, %c0_89] : memref<432x128xf32, #tpu.memory_space<vmem>>, vector<16x128xf32>
    tpu.vector_store %arg6[%c272, %c0_89], %62 {strides = array<i32>} : memref<432x128xf32, #tpu.memory_space<vmem>>, vector<16x128xf32>,
    %c0_90 = arith.constant 0 : index
    %c0_91 = arith.constant 0 : index
    %c0_92 = arith.constant 0 : index
    %c0_93 = arith.constant 0 : index
    %64 = vector.load %arg2[%c0_90, %c0_91, %c0_92, %c0_93] : memref<8x1x16x128xf32, #tpu.memory_space<vmem>>, vector<1x1x16x128xf32>
    %65 = vector.shape_cast %64 : vector<1x1x16x128xf32> to vector<16x128xf32>
    %c119_i32 = arith.constant 119 : i32
    %66 = tpu.dynamic_rotate %65 by %c119_i32 dim 1 : vector<16x128xf32>, i32 -> vector<16x128xf32>
    %c288 = arith.constant 288 : index
    %c0_94 = arith.constant 0 : index
    %67 = vector.load %arg6[%c288, %c0_94] : memref<432x128xf32, #tpu.memory_space<vmem>>, vector<16x128xf32>
    tpu.vector_store %arg6[%c288, %c0_94], %66 {strides = array<i32>} : memref<432x128xf32, #tpu.memory_space<vmem>>, vector<16x128xf32>,
    %c1_95 = arith.constant 1 : index
    %c0_96 = arith.constant 0 : index
    %c0_97 = arith.constant 0 : index
    %c0_98 = arith.constant 0 : index
    %68 = vector.load %arg2[%c1_95, %c0_96, %c0_97, %c0_98] : memref<8x1x16x128xf32, #tpu.memory_space<vmem>>, vector<1x1x16x128xf32>
    %69 = vector.shape_cast %68 : vector<1x1x16x128xf32> to vector<16x128xf32>
    %c119_i32_99 = arith.constant 119 : i32
    %70 = tpu.dynamic_rotate %69 by %c119_i32_99 dim 1 : vector<16x128xf32>, i32 -> vector<16x128xf32>
    %c304 = arith.constant 304 : index
    %c0_100 = arith.constant 0 : index
    %71 = vector.load %arg6[%c304, %c0_100] : memref<432x128xf32, #tpu.memory_space<vmem>>, vector<16x128xf32>
    tpu.vector_store %arg6[%c304, %c0_100], %70 {strides = array<i32>} : memref<432x128xf32, #tpu.memory_space<vmem>>, vector<16x128xf32>,
    %c0_101 = arith.constant 0 : index
    %c0_102 = arith.constant 0 : index
    %c0_103 = arith.constant 0 : index
    %c0_104 = arith.constant 0 : index
    %72 = vector.load %arg2[%c0_101, %c0_102, %c0_103, %c0_104] : memref<8x1x16x128xf32, #tpu.memory_space<vmem>>, vector<1x1x16x128xf32>
    %73 = vector.shape_cast %72 : vector<1x1x16x128xf32> to vector<16x128xf32>
    %c118_i32 = arith.constant 118 : i32
    %74 = tpu.dynamic_rotate %73 by %c118_i32 dim 1 : vector<16x128xf32>, i32 -> vector<16x128xf32>
    %c320 = arith.constant 320 : index
    %c0_105 = arith.constant 0 : index
    %75 = vector.load %arg6[%c320, %c0_105] : memref<432x128xf32, #tpu.memory_space<vmem>>, vector<16x128xf32>
    tpu.vector_store %arg6[%c320, %c0_105], %74 {strides = array<i32>} : memref<432x128xf32, #tpu.memory_space<vmem>>, vector<16x128xf32>,
    %c2_106 = arith.constant 2 : index
    %c0_107 = arith.constant 0 : index
    %c0_108 = arith.constant 0 : index
    %c0_109 = arith.constant 0 : index
    %76 = vector.load %arg2[%c2_106, %c0_107, %c0_108, %c0_109] : memref<8x1x16x128xf32, #tpu.memory_space<vmem>>, vector<1x1x16x128xf32>
    %77 = vector.shape_cast %76 : vector<1x1x16x128xf32> to vector<16x128xf32>
    %c119_i32_110 = arith.constant 119 : i32
    %78 = tpu.dynamic_rotate %77 by %c119_i32_110 dim 1 : vector<16x128xf32>, i32 -> vector<16x128xf32>
    %c336 = arith.constant 336 : index
    %c0_111 = arith.constant 0 : index
    %79 = vector.load %arg6[%c336, %c0_111] : memref<432x128xf32, #tpu.memory_space<vmem>>, vector<16x128xf32>
    tpu.vector_store %arg6[%c336, %c0_111], %78 {strides = array<i32>} : memref<432x128xf32, #tpu.memory_space<vmem>>, vector<16x128xf32>,
    %c3_112 = arith.constant 3 : index
    %c0_113 = arith.constant 0 : index
    %c0_114 = arith.constant 0 : index
    %c0_115 = arith.constant 0 : index
    %80 = vector.load %arg2[%c3_112, %c0_113, %c0_114, %c0_115] : memref<8x1x16x128xf32, #tpu.memory_space<vmem>>, vector<1x1x16x128xf32>
    %81 = vector.shape_cast %80 : vector<1x1x16x128xf32> to vector<16x128xf32>
    %c119_i32_116 = arith.constant 119 : i32
    %82 = tpu.dynamic_rotate %81 by %c119_i32_116 dim 1 : vector<16x128xf32>, i32 -> vector<16x128xf32>
    %c352 = arith.constant 352 : index
    %c0_117 = arith.constant 0 : index
    %83 = vector.load %arg6[%c352, %c0_117] : memref<432x128xf32, #tpu.memory_space<vmem>>, vector<16x128xf32>
    tpu.vector_store %arg6[%c352, %c0_117], %82 {strides = array<i32>} : memref<432x128xf32, #tpu.memory_space<vmem>>, vector<16x128xf32>,
    %c2_118 = arith.constant 2 : index
    %c0_119 = arith.constant 0 : index
    %c0_120 = arith.constant 0 : index
    %c0_121 = arith.constant 0 : index
    %84 = vector.load %arg2[%c2_118, %c0_119, %c0_120, %c0_121] : memref<8x1x16x128xf32, #tpu.memory_space<vmem>>, vector<1x1x16x128xf32>
    %85 = vector.shape_cast %84 : vector<1x1x16x128xf32> to vector<16x128xf32>
    %c118_i32_122 = arith.constant 118 : i32
    %86 = tpu.dynamic_rotate %85 by %c118_i32_122 dim 1 : vector<16x128xf32>, i32 -> vector<16x128xf32>
    %c368 = arith.constant 368 : index
    %c0_123 = arith.constant 0 : index
    %87 = vector.load %arg6[%c368, %c0_123] : memref<432x128xf32, #tpu.memory_space<vmem>>, vector<16x128xf32>
    tpu.vector_store %arg6[%c368, %c0_123], %86 {strides = array<i32>} : memref<432x128xf32, #tpu.memory_space<vmem>>, vector<16x128xf32>,
    %c0_124 = arith.constant 0 : index
    %c0_125 = arith.constant 0 : index
    %c0_126 = arith.constant 0 : index
    %c0_127 = arith.constant 0 : index
    %88 = vector.load %arg2[%c0_124, %c0_125, %c0_126, %c0_127] : memref<8x1x16x128xf32, #tpu.memory_space<vmem>>, vector<1x1x16x128xf32>
    %89 = vector.shape_cast %88 : vector<1x1x16x128xf32> to vector<16x128xf32>
    %c116_i32 = arith.constant 116 : i32
    %90 = tpu.dynamic_rotate %89 by %c116_i32 dim 1 : vector<16x128xf32>, i32 -> vector<16x128xf32>
    %c384 = arith.constant 384 : index
    %c0_128 = arith.constant 0 : index
    %91 = vector.load %arg6[%c384, %c0_128] : memref<432x128xf32, #tpu.memory_space<vmem>>, vector<16x128xf32>
    tpu.vector_store %arg6[%c384, %c0_128], %90 {strides = array<i32>} : memref<432x128xf32, #tpu.memory_space<vmem>>, vector<16x128xf32>,
    %c1_129 = arith.constant 1 : index
    %c0_130 = arith.constant 0 : index
    %c0_131 = arith.constant 0 : index
    %c0_132 = arith.constant 0 : index
    %92 = vector.load %arg2[%c1_129, %c0_130, %c0_131, %c0_132] : memref<8x1x16x128xf32, #tpu.memory_space<vmem>>, vector<1x1x16x128xf32>
    %93 = vector.shape_cast %92 : vector<1x1x16x128xf32> to vector<16x128xf32>
    %c116_i32_133 = arith.constant 116 : i32
    %94 = tpu.dynamic_rotate %93 by %c116_i32_133 dim 1 : vector<16x128xf32>, i32 -> vector<16x128xf32>
    %c400 = arith.constant 400 : index
    %c0_134 = arith.constant 0 : index
    %95 = vector.load %arg6[%c400, %c0_134] : memref<432x128xf32, #tpu.memory_space<vmem>>, vector<16x128xf32>
    tpu.vector_store %arg6[%c400, %c0_134], %94 {strides = array<i32>} : memref<432x128xf32, #tpu.memory_space<vmem>>, vector<16x128xf32>,
    %c0_135 = arith.constant 0 : index
    %c0_136 = arith.constant 0 : index
    %c0_137 = arith.constant 0 : index
    %c0_138 = arith.constant 0 : index
    %96 = vector.load %arg2[%c0_135, %c0_136, %c0_137, %c0_138] : memref<8x1x16x128xf32, #tpu.memory_space<vmem>>, vector<1x1x16x128xf32>
    %97 = vector.shape_cast %96 : vector<1x1x16x128xf32> to vector<16x128xf32>
    %c115_i32 = arith.constant 115 : i32
    %98 = tpu.dynamic_rotate %97 by %c115_i32 dim 1 : vector<16x128xf32>, i32 -> vector<16x128xf32>
    %c416 = arith.constant 416 : index
    %c0_139 = arith.constant 0 : index
    %99 = vector.load %arg6[%c416, %c0_139] : memref<432x128xf32, #tpu.memory_space<vmem>>, vector<16x128xf32>
    tpu.vector_store %arg6[%c416, %c0_139], %98 {strides = array<i32>} : memref<432x128xf32, #tpu.memory_space<vmem>>, vector<16x128xf32>,
    %c0_i32 = arith.constant 0 : i32
    %100 = arith.cmpi eq, %arg1, %c0_i32 : i32
    %101 = arith.extui %100 : i1 to i32
    %c0_i32_140 = arith.constant 0 : i32
    %102 = arith.cmpi ne, %101, %c0_i32_140 : i32
    scf.if %102 {
      %cst_151 = arith.constant 0.000000e+00 : f32
      %113 = vector.broadcast %cst_151 : f32 to vector<8x128xf32>
      %c0_152 = arith.constant 0 : index
      %c0_153 = arith.constant 0 : index
      %114 = vector.load %arg7[%c0_152, %c0_153] : memref<8x128xf32, #tpu.memory_space<vmem>>, vector<8x128xf32>
      tpu.vector_store %arg7[%c0_152, %c0_153], %113 {strides = array<i32>} : memref<8x128xf32, #tpu.memory_space<vmem>>, vector<8x128xf32>,
    } else {
    }
    %c0_141 = arith.constant 0 : index
    %c0_142 = arith.constant 0 : index
    %103 = vector.load %arg7[%c0_141, %c0_142] : memref<8x128xf32, #tpu.memory_space<vmem>>, vector<8x128xf32>
    %c0_143 = arith.constant 0 : index
    %c0_144 = arith.constant 0 : index
    %c0_145 = arith.constant 0 : index
    %104 = vector.load %arg3[%c0_143, %c0_144, %c0_145] : memref<1x8x432xf32, #tpu.memory_space<vmem>>, vector<1x8x432xf32>
    %105 = vector.shape_cast %104 : vector<1x8x432xf32> to vector<8x432xf32>
    %c0_146 = arith.constant 0 : index
    %c0_147 = arith.constant 0 : index
    %106 = vector.load %arg6[%c0_146, %c0_147] : memref<432x128xf32, #tpu.memory_space<vmem>>, vector<432x128xf32>
    %cst = arith.constant dense<0.000000e+00> : vector<8x128xf32>
    %107 = tpu.matmul %105, %106, %cst {dimension_numbers = #tpu.dot_dimension_numbers<[1], [0], [0], [1], [0, 0, 1, 1], [], []>} : vector<8x432xf32>, vector<432x128xf32>, vector<8x128xf32> -> vector<8x128xf32>
    %108 = arith.addf %103, %107 : vector<8x128xf32>
    %c0_148 = arith.constant 0 : index
    %c0_149 = arith.constant 0 : index
    %109 = vector.load %arg7[%c0_148, %c0_149] : memref<8x128xf32, #tpu.memory_space<vmem>>, vector<8x128xf32>
    tpu.vector_store %arg7[%c0_148, %c0_149], %108 {strides = array<i32>} : memref<8x128xf32, #tpu.memory_space<vmem>>, vector<8x128xf32>,
    %c2_i32 = arith.constant 2 : i32
    %110 = arith.cmpi eq, %arg1, %c2_i32 : i32
    %111 = arith.extui %110 : i1 to i32
    %c0_i32_150 = arith.constant 0 : i32
    %112 = arith.cmpi ne, %111, %c0_i32_150 : i32
    scf.if %112 {
      %c0_151 = arith.constant 0 : index
      %c0_152 = arith.constant 0 : index
      %113 = vector.load %arg7[%c0_151, %c0_152] : memref<8x128xf32, #tpu.memory_space<vmem>>, vector<8x128xf32>
      %c0_153 = arith.constant 0 : index
      %c0_154 = arith.constant 0 : index
      %114 = vector.load %arg4[%c0_153, %c0_154] : memref<8x1xf32, #tpu.memory_space<vmem>>, vector<8x1xf32>
      %115 = vector.broadcast %114 : vector<8x1xf32> to vector<8x128xf32>
      %116 = arith.addf %113, %115 : vector<8x128xf32>
      %c0_155 = arith.constant 0 : index
      %c0_156 = arith.constant 0 : index
      %c0_157 = arith.constant 0 : index
      %117 = vector.load %arg5[%c0_155, %c0_156, %c0_157] : memref<1x8x128xf32, #tpu.memory_space<vmem>>, vector<1x8x128xf32>
      %118 = vector.shape_cast %117 : vector<1x8x128xf32> to vector<8x128xf32>
      %119 = vector.shape_cast %116 : vector<8x128xf32> to vector<1x8x128xf32>
      tpu.vector_store %arg5[%c0_155, %c0_156, %c0_157], %119 {strides = array<i32>} : memref<1x8x128xf32, #tpu.memory_space<vmem>>, vector<1x8x128xf32>,
    } else {
    }
    return
  }
  func.func @transform_0(%arg0: i32, %arg1: i32) -> (i32, i32, i32, i32) {
    %c0_i32 = arith.constant 0 : i32
    %c0_i32_0 = arith.constant 0 : i32
    %c0_i32_1 = arith.constant 0 : i32
    return %arg1, %arg0, %c0_i32, %c0_i32_0 : i32, i32, i32, i32
  }
  func.func @transform_1(%arg0: i32, %arg1: i32) -> (i32, i32, i32) {
    %c0_i32 = arith.constant 0 : i32
    %c0_i32_0 = arith.constant 0 : i32
    %c0_i32_1 = arith.constant 0 : i32
    return %arg1, %c0_i32, %c0_i32_0 : i32, i32, i32
  }
  func.func @transform_2(%arg0: i32, %arg1: i32) -> (i32, i32) {
    %c0_i32 = arith.constant 0 : i32
    %c0_i32_0 = arith.constant 0 : i32
    %c0_i32_1 = arith.constant 0 : i32
    return %c0_i32, %c0_i32_0 : i32, i32
  }
  func.func @transform_3(%arg0: i32, %arg1: i32) -> (i32, i32, i32) {
    %c0_i32 = arith.constant 0 : i32
    %c0_i32_0 = arith.constant 0 : i32
    %c0_i32_1 = arith.constant 0 : i32
    return %arg0, %c0_i32, %c0_i32_0 : i32, i32, i32
  }
}

</mosaic_0001>

<bundles_post_ra>
// kernel: mlp_conv4d.2
= control target key start
LH: loop header
LB: loop body
LE: loop exit
PB: predicated region body
PF: predicated region fallthrough
CT: control target
= control target key end

     0   :  { %s1794_s12 = smov 0   ;;  %s1796_s13 = smov 0   ;;  %s2464_s0 = inlined_call_operand.vmem [shape: f32[24,2,8,512], index: 0, kind: input, shape index: {}]   ;;  %s2465_s1 = inlined_call_operand.vmem [shape: f32[3,16,216], index: 1, kind: input, shape index: {}]   ;;  %s2466_s2 = inlined_call_operand.vmem [shape: f32[16,1], index: 2, kind: input, shape index: {}]   ;;  %s2467_s3 = inlined_call_operand.vmem [shape: f32[2,16,512], index: 3, kind: output, shape index: {}]  }
   0x1   :  { %s1798_s14 = smov 0   ;;  %s1800_s15 = smov 0  }
   0x2   :  { %s1802_s16 = smov 0   ;;  %s1804_s17 = smov 0  }
   0x3   :  { %s1806_s18 = smov 0  }
   0x4 LB: > { %s22_s19 = sadd.s32 1, %s1754_s16  ;;  %s25_s20 = sadd.s32 1, %s1758_s17  ;;  %s1762_s18 = sphi %s1806_s18, %s13_s18   ;;  %s1758_s17 = sphi %s1804_s17, %s2473_s17   ;;  %s1754_s16 = sphi %s1802_s16, %s2472_s16   ;;  %s1750_s15 = sphi %s1800_s15, %s2471_s15   ;;  %s1746_s14 = sphi %s1798_s14, %s2470_s14   ;;  %s1742_s13 = sphi %s1796_s13, %s2469_s13   ;;  %s1738_s12 = sphi %s1794_s12, %s2468_s12  }
   0x5   : > { %p23_p0 = scmp.ge.s32.totalorder %s22_s19, 3  ;;  %p41_p1 = scmp.ne.s32.totalorder %s1742_s13, %s1738_s12 }
   0x6   : > { %p42_p2 = scmp.eq.s32.totalorder %s1762_s18, 0  ;;  %s34_s24 = sadd.s32 1, %s1742_s13 }
   0x7   : > { %s2475_s19 = smov (%p23_p0, %s22_s19), 0  ;;  %s2477_s20 = smov (!%p23_p0, %s25_s20), %s1758_s17 }
   0x8   : > { %p43_p3 = por %p42_p2, %p41_p1  ;;  %p27_p4 = scmp.ge.s32.totalorder %s2477_s20, 2 }
   0x9   : > { %s29_s21 = ssub.s32 %s1754_s16, %s2475_s19  ;;  %p1406_p6 = scmp.ge.s32.totalorder %s1762_s18, 6 }
   0xa   : > { %s2479_s20 = smov (%p27_p4, %s2477_s20), 0 }
   0xb   : > { %s30_s22 = ssub.s32 %s1758_s17, %s2479_s20  ;;  %143 = sbr.rel (%p1406_p6) target bundleno = 41 (0x29), region = 20 }
   0xc   : > { %s31_s23 = sor.u32 %s30_s22, %s29_s21 }
   0xd   : > { %p32_p5 = scmp.eq.s32.totalorder %s31_s23, 0 }
   0xf   : > { %s1845_s25 = scalar_select %p32_p5, %s1742_s13, %s34_s24  }
  0x12   : > { %146 = sbr.rel (!%p43_p3) target bundleno = 41 (0x29), region = 24  ;;  %s148_s26 = sand.u32 (%p43_p3), 1, %s1742_s13  }
  0x13   : > { %s1409_s27 = sshll.u32 (%p43_p3), %s1758_s17, 2  ;;  %s1407_s28 = sshll.u32 (%p43_p3), %s148_s26, 8 }
  0x14   : > { %s1502_s29 = sshll.u32 (%p43_p3), %s1754_s16, 6  ;;  %s1859_s8 = scalar_lea.vmem (%p43_p3), [#allocation4], %s1407_s28 }
  0x15   : > { %s154_s30 = sadd.s32 (%p43_p3), %s1502_s29, %s1409_s27 }
  0x16   : > { %s1411_s4 = sshll.u32 (%p43_p3), %s154_s30, 3 }
  0x17   : > { %s1854_s7 = scalar_lea.vmem (%p43_p3), %s2464_s0, %s1411_s4 }
  0x18   : > { %v169_v0 = vld [vmem:[%s1854_s7] sm:$0xff] (%p43_p3)  ;;  %v171_v1 = vld [vmem:[%s1854_s7 + $0x8] sm:$0xff] (%p43_p3)  ;;  %v173_v2 = vld [vmem:[%s1854_s7 + $0x10] sm:$0xff] (%p43_p3) }
  0x19   : > { %170 = vst [vmem:[%s1859_s8] sm:$0xff] %v169_v0  ;;  %172 = vst [vmem:[%s1859_s8 + $0x8] sm:$0xff] %v171_v1  ;;  %v175_v3 = vld [vmem:[%s1854_s7 + $0x18] sm:$0xff]  ;;  %v177_v4 = vld [vmem:[%s1854_s7 + $0x40] sm:$0xff] }
  0x1a   : > { %174 = vst [vmem:[%s1859_s8 + $0x10] sm:$0xff] %v173_v2  ;;  %v179_v5 = vld [vmem:[%s1854_s7 + $0x48] sm:$0xff]  ;;  %176 = vst [vmem:[%s1859_s8 + $0x18] sm:$0xff] %v175_v3  ;;  %v181_v6 = vld [vmem:[%s1854_s7 + $0x50] sm:$0xff] }
  0x1b   : > { %178 = vst [vmem:[%s1859_s8 + $0x20] sm:$0xff] %v177_v4  ;;  %180 = vst [vmem:[%s1859_s8 + $0x28] sm:$0xff] %v179_v5  ;;  %v183_v7 = vld [vmem:[%s1854_s7 + $0x58] sm:$0xff]  ;;  %v185_v8 = vld [vmem:[%s1854_s7 + $0x80] sm:$0xff] }
  0x1c   : > { %182 = vst [vmem:[%s1859_s8 + $0x30] sm:$0xff] %v181_v6  ;;  %184 = vst [vmem:[%s1859_s8 + $0x38] sm:$0xff] %v183_v7  ;;  %v187_v9 = vld [vmem:[%s1854_s7 + $0x88] sm:$0xff]  ;;  %v189_v10 = vld [vmem:[%s1854_s7 + $0x90] sm:$0xff] }
  0x1d   : > { %186 = vst [vmem:[%s1859_s8 + $0x40] sm:$0xff] %v185_v8  ;;  %v191_v11 = vld [vmem:[%s1854_s7 + $0x98] sm:$0xff]  ;;  %188 = vst [vmem:[%s1859_s8 + $0x48] sm:$0xff] %v187_v9  ;;  %v193_v12 = vld [vmem:[%s1854_s7 + $0xc0] sm:$0xff] }
  0x1e   : > { %190 = vst [vmem:[%s1859_s8 + $0x50] sm:$0xff] %v189_v10  ;;  %192 = vst [vmem:[%s1859_s8 + $0x58] sm:$0xff] %v191_v11  ;;  %v195_v13 = vld [vmem:[%s1854_s7 + $0xc8] sm:$0xff]  ;;  %v197_v14 = vld [vmem:[%s1854_s7 + $0xd0] sm:$0xff] }
  0x1f   : > { %194 = vst [vmem:[%s1859_s8 + $0x60] sm:$0xff] %v193_v12  ;;  %196 = vst [vmem:[%s1859_s8 + $0x68] sm:$0xff] %v195_v13  ;;  %v199_v15 = vld [vmem:[%s1854_s7 + $0xd8] sm:$0xff]  ;;  %v201_v16 = vld [vmem:[%s1854_s7 + $0x100] sm:$0xff] }
  0x20   : > { %198 = vst [vmem:[%s1859_s8 + $0x70] sm:$0xff] %v197_v14  ;;  %v203_v17 = vld [vmem:[%s1854_s7 + $0x108] sm:$0xff]  ;;  %200 = vst [vmem:[%s1859_s8 + $0x78] sm:$0xff] %v199_v15  ;;  %v205_v18 = vld [vmem:[%s1854_s7 + $0x110] sm:$0xff] }
  0x21   : > { %202 = vst [vmem:[%s1859_s8 + $0x80] sm:$0xff] %v201_v16  ;;  %204 = vst [vmem:[%s1859_s8 + $0x88] sm:$0xff] %v203_v17  ;;  %v207_v19 = vld [vmem:[%s1854_s7 + $0x118] sm:$0xff]  ;;  %v209_v20 = vld [vmem:[%s1854_s7 + $0x140] sm:$0xff] }
  0x22   : > { %206 = vst [vmem:[%s1859_s8 + $0x90] sm:$0xff] %v205_v18  ;;  %208 = vst [vmem:[%s1859_s8 + $0x98] sm:$0xff] %v207_v19  ;;  %v211_v21 = vld [vmem:[%s1854_s7 + $0x148] sm:$0xff]  ;;  %v213_v22 = vld [vmem:[%s1854_s7 + $0x150] sm:$0xff] }
  0x23   : > { %210 = vst [vmem:[%s1859_s8 + $0xa0] sm:$0xff] %v209_v20  ;;  %v215_v23 = vld [vmem:[%s1854_s7 + $0x158] sm:$0xff]  ;;  %212 = vst [vmem:[%s1859_s8 + $0xa8] sm:$0xff] %v211_v21  ;;  %v217_v24 = vld [vmem:[%s1854_s7 + $0x180] sm:$0xff] }
  0x24   : > { %214 = vst [vmem:[%s1859_s8 + $0xb0] sm:$0xff] %v213_v22  ;;  %216 = vst [vmem:[%s1859_s8 + $0xb8] sm:$0xff] %v215_v23  ;;  %v219_v25 = vld [vmem:[%s1854_s7 + $0x188] sm:$0xff]  ;;  %v221_v26 = vld [vmem:[%s1854_s7 + $0x190] sm:$0xff] }
  0x25   : > { %218 = vst [vmem:[%s1859_s8 + $0xc0] sm:$0xff] %v217_v24  ;;  %220 = vst [vmem:[%s1859_s8 + $0xc8] sm:$0xff] %v219_v25  ;;  %v223_v27 = vld [vmem:[%s1854_s7 + $0x198] sm:$0xff]  ;;  %v225_v28 = vld [vmem:[%s1854_s7 + $0x1c0] sm:$0xff] }
  0x26   : > { %222 = vst [vmem:[%s1859_s8 + $0xd0] sm:$0xff] %v221_v26  ;;  %v227_v29 = vld [vmem:[%s1854_s7 + $0x1c8] sm:$0xff]  ;;  %224 = vst [vmem:[%s1859_s8 + $0xd8] sm:$0xff] %v223_v27  ;;  %v229_v30 = vld [vmem:[%s1854_s7 + $0x1d0] sm:$0xff] }
  0x27   : > { %226 = vst [vmem:[%s1859_s8 + $0xe0] sm:$0xff] %v225_v28  ;;  %228 = vst [vmem:[%s1859_s8 + $0xe8] sm:$0xff] %v227_v29  ;;  %v231_v31 = vld [vmem:[%s1854_s7 + $0x1d8] sm:$0xff] }
  0x28   : > { %230 = vst [vmem:[%s1859_s8 + $0xf0] sm:$0xff] %v229_v30  ;;  %232 = vst [vmem:[%s1859_s8 + $0xf8] sm:$0xff] %v231_v31 }
  0x29 PF: > { %p1412_p7 = scmp.ge.s32.totalorder %s1762_s18, 1  ;;  %p245_p8 = scmp.lt.s32.totalorder %s1762_s18, 7 }
  0x2b   : > { %p246_p9 = pnand %p1412_p7, %p245_p8 }
  0x2c   : > { %s252_s9 = sand.u32 (!%p246_p9), 1, %s1738_s12   ;;  %s1764_s12 = smov (!%p246_p9), 127   ;;  %v320_v60 = vlaneseq (!%p246_p9) }
  0x2d   : > { %249 = sbr.rel (%p246_p9) target bundleno = 657 (0x291), region = 51  ;;  %s1413_s10 = sshll.u32 (!%p246_p9), %s252_s9, 8 }
  0x2e   : > { %s1925_s11 = scalar_lea.vmem (!%p246_p9), [#allocation4], %s1413_s10  ;;  %s1765_s21 = smov (!%p246_p9), 123   ;;  %v2085_v61 = vand.u32 (!%p246_p9), 127, %v320_v60 }
  0x2f   : > { %v1928_v32 = vld [vmem:[%s1925_s11 + $0x10] sm:$0xff] (!%p246_p9)  ;;  %v1931_v33 = vld [vmem:[%s1925_s11] sm:$0xff] (!%p246_p9)  ;;  %v1934_v34 = vld [vmem:[%s1925_s11 + $0x18] sm:$0xff] (!%p246_p9)  ;;  %s1766_s22 = smov (!%p246_p9), 122   ;;  %s1767_s23 = smov (!%p246_p9), 103  }
  0x30   : > { %316 = vrot.lane.b32.xlu1 (!%p246_p9), %v1928_v32, %s1764_s12  ;;  %312 = vrot.lane.b32.xlu0 (!%p246_p9), %v1931_v33, %s1764_s12  ;;  %v1941_v35 = vld [vmem:[%s1925_s11 + $0x8] sm:$0xff] (!%p246_p9)  ;;  %295 = vst [vmem:[#allocation2] sm:$0xff] (!%p246_p9), %v1931_v33  ;;  %297 = vst [vmem:[#allocation2 + $0x10] sm:$0xff] (!%p246_p9), %v1928_v32  ;;  %v1950_v37 = vld [vmem:[%s1925_s11 + $0x40] sm:$0xff] (!%p246_p9)  ;;  %s1768_s24 = smov (!%p246_p9), 102   ;;  %vm322_vm0 = vcmp.lt.s32.totalorder (!%p246_p9), %v2085_v61, 127 }
  0x31   : > { %v1944_v36 = vld [vmem:[%s1925_s11 + $0x48] sm:$0xff] (!%p246_p9)  ;;  %298 = vst [vmem:[#allocation2 + $0x18] sm:$0xff] (!%p246_p9), %v1934_v34  ;;  %v1953_v38 = vld [vmem:[%s1925_s11 + $0x58] sm:$0xff] (!%p246_p9)  ;;  %v1956_v39 = vld [vmem:[%s1925_s11 + $0x50] sm:$0xff] (!%p246_p9)  ;;  %s1769_s26 = smov (!%p246_p9), 98   ;;  %vm381_vm1 = vcmp.lt.s32.totalorder (!%p246_p9), %v2085_v61, 123 }
  0x32   : > { %296 = vst [vmem:[#allocation2 + $0x8] sm:$0xff] (!%p246_p9), %v1941_v35  ;;  %337 = vst [vmem:[#allocation2 + $0x68] sm:$0xff] (!%p246_p9), %v1944_v36  ;;  %v1961_v40 = vld [vmem:[%s1925_s11 + $0x28] sm:$0xff] (!%p246_p9)  ;;  %v1964_v41 = vld [vmem:[%s1925_s11 + $0x20] sm:$0xff] (!%p246_p9)  ;;  %p281_p10 = scmp.lt.s32.totalorder (!%p246_p9), %s1746_s14, 2  ;;  %p286_p11 = scmp.lt.s32.totalorder (!%p246_p9), %s1750_s15, 1 }
  0x33   : > { %v1967_v42 = vld [vmem:[%s1925_s11 + $0x38] sm:$0xff] (!%p246_p9)  ;;  %336 = vst [vmem:[#allocation2 + $0x60] sm:$0xff] (!%p246_p9), %v1950_v37  ;;  %338 = vst [vmem:[#allocation2 + $0x70] sm:$0xff] (!%p246_p9), %v1956_v39  ;;  %v1973_v43 = vld [vmem:[%s1925_s11 + $0x30] sm:$0xff] (!%p246_p9)  ;;  %vm422_vm2 = vcmp.lt.s32.totalorder (!%p246_p9), %v2085_v61, 122  ;;  %vm579_vm3 = vcmp.lt.s32.totalorder (!%p246_p9), %v2085_v61, 103 }
  0x34   : > { %339 = vst [vmem:[#allocation2 + $0x78] sm:$0xff] %v1953_v38  ;;  %v1976_v44 = vld [vmem:[%s1925_s11 + $0x88] sm:$0xff]  ;;  %v1979_v45 = vld [vmem:[%s1925_s11 + $0x80] sm:$0xff]  ;;  %304 = vst [vmem:[#allocation2 + $0x20] sm:$0xff] %v1964_v41  ;;  %318 = vrot.lane.b32.xlu1 %v1934_v34, %s1764_s12  ;;  %314 = vrot.lane.b32.xlu0 %v1941_v35, %s1764_s12  ;;  %s282_s27 = scalar_select %p281_p10, %s1746_s14, 2  ;;  %vm620_vm4 = vcmp.lt.s32.totalorder %v2085_v61, 102 }
  0x35   : > { %305 = vst [vmem:[#allocation2 + $0x28] sm:$0xff] %v1961_v40  ;;  %307 = vst [vmem:[#allocation2 + $0x38] sm:$0xff] %v1967_v42  ;;  %v1989_v46 = vld [vmem:[%s1925_s11 + $0x98] sm:$0xff]  ;;  %v1992_v47 = vld [vmem:[%s1925_s11 + $0x90] sm:$0xff]  ;;  %s2481_s15 = smov (!%p286_p11, %s1750_s15), 1  ;;  %vm701_vm5 = vcmp.lt.s32.totalorder %v2085_v61, 98 }
  0x36   : > { %306 = vst [vmem:[#allocation2 + $0x30] sm:$0xff] %v1973_v43  ;;  %436 = vst [vmem:[#allocation2 + $0x120] sm:$0xff] %v1979_v45  ;;  %v1459_v48 = vld [vmem:[%s1925_s11 + $0xc8] sm:$0xff]  ;;  %v1458_v49 = vld [vmem:[%s1925_s11 + $0xc0] sm:$0xff]  ;;  %s1503_s28 = sshll.u32 %s282_s27, 5  ;;  %s1504_s5 = sshll.u32 %s2481_s15, 6 }
  0x37   : > { %437 = vst [vmem:[#allocation2 + $0x128] sm:$0xff] %v1976_v44  ;;  %v1461_v50 = vld [vmem:[%s1925_s11 + $0xd8] sm:$0xff]  ;;  %438 = vst [vmem:[#allocation2 + $0x130] sm:$0xff] %v1992_v47  ;;  %v1460_v51 = vld [vmem:[%s1925_s11 + $0xd0] sm:$0xff]  ;;  %s2145_s4 = scalar_lea.vmem %s2465_s1, %s1503_s28  ;;  %s2151_s8 = scalar_lea.vmem %s2467_s3, %s1504_s5  ;;  %vm742_vm6 = vcmp.lt.s32.totalorder %v2085_v61, 97 }
  0x38   : > { %439 = vst [vmem:[#allocation2 + $0x138] sm:$0xff] %v1989_v46  ;;  %v1467_v52 = vld [vmem:[%s1925_s11 + $0xa8] sm:$0xff]  ;;  %v1466_v53 = vld [vmem:[%s1925_s11 + $0xa0] sm:$0xff]  ;;  %474 = vst [vmem:[#allocation2 + $0x180] sm:$0xff] %v1458_v49  ;;  %355 = vrot.lane.b32.xlu1 %v1944_v36, %s1764_s12  ;;  %353 = vrot.lane.b32.xlu0 %v1950_v37, %s1764_s12  ;;  %s1770_s15 = smov 97   ;;  %p1494_p12 = scmp.ne.s32.totalorder %s1746_s14, 0 }
  0x39   : > { %475 = vst [vmem:[#allocation2 + $0x188] sm:$0xff] %v1459_v48  ;;  %477 = vst [vmem:[#allocation2 + $0x198] sm:$0xff] %v1461_v50  ;;  %v1469_v54 = vld [vmem:[%s1925_s11 + $0xb8] sm:$0xff]  ;;  %v1468_v55 = vld [vmem:[%s1925_s11 + $0xb0] sm:$0xff] }
  0x3a   : > { %v2008_v56 = vld [vmem:[%s1925_s11 + $0x68] sm:$0xff]  ;;  %445 = vst [vmem:[#allocation2 + $0x140] sm:$0xff] %v1466_v53  ;;  %446 = vst [vmem:[#allocation2 + $0x148] sm:$0xff] %v1467_v52  ;;  %v2015_v57 = vld [vmem:[%s1925_s11 + $0x60] sm:$0xff] }
  0x3b   : > { %476 = vst [vmem:[#allocation2 + $0x190] sm:$0xff] %v1460_v51  ;;  %v2018_v58 = vld [vmem:[%s1925_s11 + $0x78] sm:$0xff]  ;;  %346 = vst [vmem:[#allocation2 + $0x88] sm:$0xff] %v2008_v56  ;;  %v2022_v59 = vld [vmem:[%s1925_s11 + $0x70] sm:$0xff] }
  0x3c   : > { %447 = vst [vmem:[#allocation2 + $0x150] sm:$0xff] %v1468_v55  ;;  %448 = vst [vmem:[#allocation2 + $0x158] sm:$0xff] %v1469_v54  ;;  %359 = vrot.lane.b32.xlu1 %v1953_v38, %s1764_s12  ;;  %357 = vrot.lane.b32.xlu0 %v1956_v39, %s1764_s12  ;;  %v1454_v22 = vld [vmem:[%s1925_s11 + $0xe0] sm:$0xff]  ;;  %v1455_v23 = vld [vmem:[%s1925_s11 + $0xe8] sm:$0xff] }
  0x3d   : > { %345 = vst [vmem:[#allocation2 + $0x80] sm:$0xff] %v2015_v57  ;;  %348 = vst [vmem:[#allocation2 + $0x98] sm:$0xff] %v2018_v58  ;;  %v1456_v24 = vld [vmem:[%s1925_s11 + $0xf0] sm:$0xff]  ;;  %v1457_v25 = vld [vmem:[%s1925_s11 + $0xf8] sm:$0xff] }
  0x3e   : > { %347 = vst [vmem:[#allocation2 + $0x90] sm:$0xff] %v2022_v59  ;;  %483 = vst [vmem:[#allocation2 + $0x1a0] sm:$0xff] %v1454_v22 }
  0x3f   : > { %484 = vst [vmem:[#allocation2 + $0x1a8] sm:$0xff] %v1455_v23  ;;  %485 = vst [vmem:[#allocation2 + $0x1b0] sm:$0xff] %v1456_v24 }
  0x40   : > { %375 = vrot.lane.b32.xlu1 %v1941_v35, %s1765_s21  ;;  %373 = vrot.lane.b32.xlu0 %v1931_v33, %s1765_s21  ;;  %486 = vst [vmem:[#allocation2 + $0x1b8] sm:$0xff] %v1457_v25 }
  0x44   : > { %379 = vrot.lane.b32.xlu1 %v1934_v34, %s1765_s21  ;;  %377 = vrot.lane.b32.xlu0 %v1928_v32, %s1765_s21 }
  0x48   : > { %396 = vrot.lane.b32.xlu1 %v1961_v40, %s1765_s21  ;;  %394 = vrot.lane.b32.xlu0 %v1964_v41, %s1765_s21 }
  0x4c   : > { %400 = vrot.lane.b32.xlu1 %v1967_v42, %s1765_s21  ;;  %398 = vrot.lane.b32.xlu0 %v1973_v43, %s1765_s21 }
  0x50   : > { %416 = vrot.lane.b32.xlu1 %v1941_v35, %s1766_s22  ;;  %414 = vrot.lane.b32.xlu0 %v1931_v33, %s1766_s22 }
  0x54   : > { %420 = vrot.lane.b32.xlu1 %v1934_v34, %s1766_s22  ;;  %418 = vrot.lane.b32.xlu0 %v1928_v32, %s1766_s22 }
  0x58   : > { %455 = vrot.lane.b32.xlu1 %v1976_v44, %s1764_s12  ;;  %453 = vrot.lane.b32.xlu0 %v1979_v45, %s1764_s12 }
  0x5c   : > { %459 = vrot.lane.b32.xlu1 %v1989_v46, %s1764_s12  ;;  %457 = vrot.lane.b32.xlu0 %v1992_v47, %s1764_s12 }
  0x60   : > { %493 = vrot.lane.b32.xlu1 %v1459_v48, %s1764_s12  ;;  %491 = vrot.lane.b32.xlu0 %v1458_v49, %s1764_s12 }
  0x64   : > { %497 = vrot.lane.b32.xlu1 %v1461_v50, %s1764_s12  ;;  %495 = vrot.lane.b32.xlu0 %v1460_v51, %s1764_s12 }
  0x68   : > { %513 = vrot.lane.b32.xlu1 %v1976_v44, %s1765_s21  ;;  %511 = vrot.lane.b32.xlu0 %v1979_v45, %s1765_s21 }
  0x6c   : > { %517 = vrot.lane.b32.xlu1 %v1989_v46, %s1765_s21  ;;  %515 = vrot.lane.b32.xlu0 %v1992_v47, %s1765_s21 }
  0x70   : > { %533 = vrot.lane.b32.xlu1 %v1467_v52, %s1765_s21  ;;  %531 = vrot.lane.b32.xlu0 %v1466_v53, %s1765_s21 }
  0x74   : > { %537 = vrot.lane.b32.xlu1 %v1469_v54, %s1765_s21  ;;  %535 = vrot.lane.b32.xlu0 %v1468_v55, %s1765_s21 }
  0x78   : > { %553 = vrot.lane.b32.xlu1 %v1976_v44, %s1766_s22  ;;  %551 = vrot.lane.b32.xlu0 %v1979_v45, %s1766_s22 }
  0x7c   : > { %557 = vrot.lane.b32.xlu1 %v1989_v46, %s1766_s22  ;;  %555 = vrot.lane.b32.xlu0 %v1992_v47, %s1766_s22 }
  0x80   : > { %573 = vrot.lane.b32.xlu1 %v1941_v35, %s1767_s23  ;;  %571 = vrot.lane.b32.xlu0 %v1931_v33, %s1767_s23 }
  0x84   : > { %577 = vrot.lane.b32.xlu1 %v1934_v34, %s1767_s23  ;;  %575 = vrot.lane.b32.xlu0 %v1928_v32, %s1767_s23 }
  0x88   : > { %594 = vrot.lane.b32.xlu1 %v1961_v40, %s1767_s23  ;;  %592 = vrot.lane.b32.xlu0 %v1964_v41, %s1767_s23 }
  0x8c   : > { %598 = vrot.lane.b32.xlu1 %v1967_v42, %s1767_s23  ;;  %596 = vrot.lane.b32.xlu0 %v1973_v43, %s1767_s23 }
  0x90   : > { %614 = vrot.lane.b32.xlu1 %v1941_v35, %s1768_s24  ;;  %612 = vrot.lane.b32.xlu0 %v1931_v33, %s1768_s24 }
  0x94   : > { %618 = vrot.lane.b32.xlu1 %v1934_v34, %s1768_s24  ;;  %616 = vrot.lane.b32.xlu0 %v1928_v32, %s1768_s24 }
  0x98   : > { %635 = vrot.lane.b32.xlu1 %v1944_v36, %s1767_s23  ;;  %633 = vrot.lane.b32.xlu0 %v1950_v37, %s1767_s23 }
  0x9c   : > { %639 = vrot.lane.b32.xlu1 %v1953_v38, %s1767_s23  ;;  %637 = vrot.lane.b32.xlu0 %v1956_v39, %s1767_s23 }
  0xa0   : > { %655 = vrot.lane.b32.xlu1 %v2008_v56, %s1767_s23  ;;  %653 = vrot.lane.b32.xlu0 %v2015_v57, %s1767_s23 }
  0xa2   : > { %v317_v62 = vpop.permute.xlu1 %316  ;;  %v313_v63 = vpop.permute.xlu0 %312 }
  0xa4   : > { %659 = vrot.lane.b32.xlu1 %v2018_v58, %s1767_s23  ;;  %657 = vrot.lane.b32.xlu0 %v2022_v59, %s1767_s23 }
  0xa6   : > { %v319_v0 = vpop.permute.xlu1 %318  ;;  %v315_v1 = vpop.permute.xlu0 %314 }
  0xa7   : > { %v323_v2 = vsel %vm322_vm0, %v317_v62, %v319_v0  ;;  %v326_v3 = vsel %vm322_vm0, %v319_v0, %v313_v63  ;;  %v324_v4 = vsel %vm322_vm0, %v315_v1, %v317_v62  ;;  %v325_v5 = vsel %vm322_vm0, %v313_v63, %v315_v1 }
  0xa8   : > { %329 = vst [vmem:[#allocation2 + $0x50] sm:$0xff] %v323_v2  ;;  %330 = vst [vmem:[#allocation2 + $0x58] sm:$0xff] %v326_v3  ;;  %675 = vrot.lane.b32.xlu1 %v1944_v36, %s1768_s24  ;;  %673 = vrot.lane.b32.xlu0 %v1950_v37, %s1768_s24 }
  0xa9   : > { %327 = vst [vmem:[#allocation2 + $0x40] sm:$0xff] %v325_v5  ;;  %328 = vst [vmem:[#allocation2 + $0x48] sm:$0xff] %v324_v4 }
  0xaa   : > { %v356_v6 = vpop.permute.xlu1 %355  ;;  %v354_v7 = vpop.permute.xlu0 %353 }
  0xab   : > { %v363_v8 = vsel %vm322_vm0, %v354_v7, %v356_v6 }
  0xac   : > { %365 = vst [vmem:[#allocation2 + $0xa0] sm:$0xff] %v363_v8  ;;  %679 = vrot.lane.b32.xlu1 %v1953_v38, %s1768_s24  ;;  %677 = vrot.lane.b32.xlu0 %v1956_v39, %s1768_s24 }
  0xae   : > { %v360_v9 = vpop.permute.xlu1 %359  ;;  %v358_v10 = vpop.permute.xlu0 %357 }
  0xaf   : > { %v364_v11 = vsel %vm322_vm0, %v360_v9, %v354_v7  ;;  %v361_v12 = vsel %vm322_vm0, %v358_v10, %v360_v9  ;;  %v362_v13 = vsel %vm322_vm0, %v356_v6, %v358_v10 }
  0xb0   : > { %368 = vst [vmem:[#allocation2 + $0xb8] sm:$0xff] %v364_v11  ;;  %366 = vst [vmem:[#allocation2 + $0xa8] sm:$0xff] %v362_v13  ;;  %695 = vrot.lane.b32.xlu1 %v1941_v35, %s1769_s26  ;;  %693 = vrot.lane.b32.xlu0 %v1931_v33, %s1769_s26 }
  0xb1   : > { %367 = vst [vmem:[#allocation2 + $0xb0] sm:$0xff] %v361_v12 }
  0xb2   : > { %v376_v14 = vpop.permute.xlu1 %375  ;;  %v374_v15 = vpop.permute.xlu0 %373 }
  0xb3   : > { %v384_v16 = vsel %vm381_vm1, %v374_v15, %v376_v14 }
  0xb4   : > { %386 = vst [vmem:[#allocation2 + $0xc0] sm:$0xff] %v384_v16  ;;  %699 = vrot.lane.b32.xlu1 %v1934_v34, %s1769_s26  ;;  %697 = vrot.lane.b32.xlu0 %v1928_v32, %s1769_s26 }
  0xb6   : > { %v380_v17 = vpop.permute.xlu1 %379  ;;  %v378_v18 = vpop.permute.xlu0 %377 }
  0xb7   : > { %v385_v19 = vsel %vm381_vm1, %v380_v17, %v374_v15  ;;  %v382_v20 = vsel %vm381_vm1, %v378_v18, %v380_v17  ;;  %v383_v21 = vsel %vm381_vm1, %v376_v14, %v378_v18 }
  0xb8   : > { %389 = vst [vmem:[#allocation2 + $0xd8] sm:$0xff] %v385_v19  ;;  %387 = vst [vmem:[#allocation2 + $0xc8] sm:$0xff] %v383_v21  ;;  %716 = vrot.lane.b32.xlu1 %v1961_v40, %s1769_s26  ;;  %714 = vrot.lane.b32.xlu0 %v1964_v41, %s1769_s26 }
  0xb9   : > { %388 = vst [vmem:[#allocation2 + $0xd0] sm:$0xff] %v382_v20 }
  0xba   : > { %v397_v26 = vpop.permute.xlu1 %396  ;;  %v395_v27 = vpop.permute.xlu0 %394 }
  0xbb   : > { %v404_v28 = vsel %vm381_vm1, %v395_v27, %v397_v26 }
  0xbc   : > { %406 = vst [vmem:[#allocation2 + $0xe0] sm:$0xff] %v404_v28  ;;  %720 = vrot.lane.b32.xlu1 %v1967_v42, %s1769_s26  ;;  %718 = vrot.lane.b32.xlu0 %v1973_v43, %s1769_s26 }
  0xbe   : > { %v401_v29 = vpop.permute.xlu1 %400  ;;  %v399_v30 = vpop.permute.xlu0 %398 }
  0xbf   : > { %v405_v31 = vsel %vm381_vm1, %v401_v29, %v395_v27  ;;  %v402_v36 = vsel %vm381_vm1, %v399_v30, %v401_v29  ;;  %v403_v37 = vsel %vm381_vm1, %v397_v26, %v399_v30 }
  0xc0   : > { %409 = vst [vmem:[#allocation2 + $0xf8] sm:$0xff] %v405_v31  ;;  %407 = vst [vmem:[#allocation2 + $0xe8] sm:$0xff] %v403_v37  ;;  %736 = vrot.lane.b32.xlu1 %v1941_v35, %s1770_s15  ;;  %734 = vrot.lane.b32.xlu0 %v1931_v33, %s1770_s15 }
  0xc1   : > { %408 = vst [vmem:[#allocation2 + $0xf0] sm:$0xff] %v402_v36 }
  0xc2   : > { %v417_v38 = vpop.permute.xlu1 %416  ;;  %v415_v39 = vpop.permute.xlu0 %414 }
  0xc3   : > { %v425_v40 = vsel %vm422_vm2, %v415_v39, %v417_v38 }
  0xc4   : > { %427 = vst [vmem:[#allocation2 + $0x100] sm:$0xff] %v425_v40  ;;  %740 = vrot.lane.b32.xlu1 %v1934_v34, %s1770_s15  ;;  %738 = vrot.lane.b32.xlu0 %v1928_v32, %s1770_s15 }
  0xc6   : > { %v421_v41 = vpop.permute.xlu1 %420  ;;  %v419_v42 = vpop.permute.xlu0 %418 }
  0xc7   : > { %v426_v43 = vsel %vm422_vm2, %v421_v41, %v415_v39  ;;  %v423_v33 = vsel %vm422_vm2, %v419_v42, %v421_v41  ;;  %v424_v35 = vsel %vm422_vm2, %v417_v38, %v419_v42 }
  0xc8   : > { %430 = vst [vmem:[#allocation2 + $0x118] sm:$0xff] %v426_v43  ;;  %428 = vst [vmem:[#allocation2 + $0x108] sm:$0xff] %v424_v35 }
  0xc9   : > { %429 = vst [vmem:[#allocation2 + $0x110] sm:$0xff] %v423_v33 }
  0xca   : > { %v456_v44 = vpop.permute.xlu1 %455  ;;  %v454_v45 = vpop.permute.xlu0 %453 }
  0xcb   : > { %v463_v34 = vsel %vm322_vm0, %v454_v45, %v456_v44 }
  0xcc   : > { %465 = vst [vmem:[#allocation2 + $0x160] sm:$0xff] %v463_v34 }
  0xce   : > { %v460_v32 = vpop.permute.xlu1 %459  ;;  %v458_v46 = vpop.permute.xlu0 %457 }
  0xcf   : > { %v464_v47 = vsel %vm322_vm0, %v460_v32, %v454_v45  ;;  %v461_v48 = vsel %vm322_vm0, %v458_v46, %v460_v32  ;;  %v462_v49 = vsel %vm322_vm0, %v456_v44, %v458_v46 }
  0xd0   : > { %468 = vst [vmem:[#allocation2 + $0x178] sm:$0xff] %v464_v47  ;;  %466 = vst [vmem:[#allocation2 + $0x168] sm:$0xff] %v462_v49 }
  0xd1   : > { %467 = vst [vmem:[#allocation2 + $0x170] sm:$0xff] %v461_v48 }
  0xd2   : > { %v494_v50 = vpop.permute.xlu1 %493  ;;  %v492_v51 = vpop.permute.xlu0 %491 }
  0xd3   : > { %v501_v52 = vsel %vm322_vm0, %v492_v51, %v494_v50 }
  0xd4   : > { %503 = vst [vmem:[#allocation2 + $0x1c0] sm:$0xff] %v501_v52 }
  0xd6   : > { %v498_v53 = vpop.permute.xlu1 %497  ;;  %v496_v54 = vpop.permute.xlu0 %495 }
  0xd7   : > { %v502_v55 = vsel %vm322_vm0, %v498_v53, %v492_v51  ;;  %v499_v56 = vsel %vm322_vm0, %v496_v54, %v498_v53  ;;  %v500_v57 = vsel %vm322_vm0, %v494_v50, %v496_v54 }
  0xd8   : > { %506 = vst [vmem:[#allocation2 + $0x1d8] sm:$0xff] %v502_v55  ;;  %504 = vst [vmem:[#allocation2 + $0x1c8] sm:$0xff] %v500_v57 }
  0xd9   : > { %505 = vst [vmem:[#allocation2 + $0x1d0] sm:$0xff] %v499_v56 }
  0xda   : > { %v514_v58 = vpop.permute.xlu1 %513  ;;  %v512_v59 = vpop.permute.xlu0 %511 }
  0xdb   : > { %v521_v60 = vsel %vm381_vm1, %v512_v59, %v514_v58 }
  0xdc   : > { %523 = vst [vmem:[#allocation2 + $0x1e0] sm:$0xff] %v521_v60 }
  0xde   : > { %v518_v62 = vpop.permute.xlu1 %517  ;;  %v516_v63 = vpop.permute.xlu0 %515 }
  0xdf   : > { %v522_v0 = vsel %vm381_vm1, %v518_v62, %v512_v59  ;;  %v519_v1 = vsel %vm381_vm1, %v516_v63, %v518_v62  ;;  %v520_v2 = vsel %vm381_vm1, %v514_v58, %v516_v63 }
  0xe0   : > { %526 = vst [vmem:[#allocation2 + $0x1f8] sm:$0xff] %v522_v0  ;;  %524 = vst [vmem:[#allocation2 + $0x1e8] sm:$0xff] %v520_v2 }
  0xe1   : > { %525 = vst [vmem:[#allocation2 + $0x1f0] sm:$0xff] %v519_v1 }
  0xe2   : > { %v534_v3 = vpop.permute.xlu1 %533  ;;  %v532_v4 = vpop.permute.xlu0 %531 }
  0xe3   : > { %v541_v5 = vsel %vm381_vm1, %v532_v4, %v534_v3 }
  0xe4   : > { %543 = vst [vmem:[#allocation2 + $0x200] sm:$0xff] %v541_v5 }
  0xe6   : > { %v538_v6 = vpop.permute.xlu1 %537  ;;  %v536_v7 = vpop.permute.xlu0 %535 }
  0xe7   : > { %v542_v8 = vsel %vm381_vm1, %v538_v6, %v532_v4  ;;  %v539_v9 = vsel %vm381_vm1, %v536_v7, %v538_v6  ;;  %v540_v10 = vsel %vm381_vm1, %v534_v3, %v536_v7 }
  0xe8   : > { %546 = vst [vmem:[#allocation2 + $0x218] sm:$0xff] %v542_v8  ;;  %544 = vst [vmem:[#allocation2 + $0x208] sm:$0xff] %v540_v10 }
  0xe9   : > { %545 = vst [vmem:[#allocation2 + $0x210] sm:$0xff] %v539_v9 }
  0xea   : > { %v554_v11 = vpop.permute.xlu1 %553  ;;  %v552_v12 = vpop.permute.xlu0 %551 }
  0xeb   : > { %v561_v13 = vsel %vm422_vm2, %v552_v12, %v554_v11 }
  0xec   : > { %563 = vst [vmem:[#allocation2 + $0x220] sm:$0xff] %v561_v13 }
  0xee   : > { %v558_v14 = vpop.permute.xlu1 %557  ;;  %v556_v15 = vpop.permute.xlu0 %555 }
  0xef   : > { %v562_v16 = vsel %vm422_vm2, %v558_v14, %v552_v12  ;;  %v559_v17 = vsel %vm422_vm2, %v556_v15, %v558_v14  ;;  %v560_v18 = vsel %vm422_vm2, %v554_v11, %v556_v15 }
  0xf0   : > { %566 = vst [vmem:[#allocation2 + $0x238] sm:$0xff] %v562_v16  ;;  %564 = vst [vmem:[#allocation2 + $0x228] sm:$0xff] %v560_v18 }
  0xf1   : > { %565 = vst [vmem:[#allocation2 + $0x230] sm:$0xff] %v559_v17 }
  0xf2   : > { %v574_v19 = vpop.permute.xlu1 %573  ;;  %v572_v20 = vpop.permute.xlu0 %571 }
  0xf3   : > { %v582_v21 = vsel %vm579_vm3, %v572_v20, %v574_v19 }
  0xf4   : > { %584 = vst [vmem:[#allocation2 + $0x240] sm:$0xff] %v582_v21 }
  0xf6   : > { %v578_v22 = vpop.permute.xlu1 %577  ;;  %v576_v23 = vpop.permute.xlu0 %575 }
  0xf7   : > { %v583_v24 = vsel %vm579_vm3, %v578_v22, %v572_v20  ;;  %v580_v25 = vsel %vm579_vm3, %v576_v23, %v578_v22  ;;  %v581_v26 = vsel %vm579_vm3, %v574_v19, %v576_v23 }
  0xf8   : > { %587 = vst [vmem:[#allocation2 + $0x258] sm:$0xff] %v583_v24  ;;  %585 = vst [vmem:[#allocation2 + $0x248] sm:$0xff] %v581_v26 }
  0xf9   : > { %586 = vst [vmem:[#allocation2 + $0x250] sm:$0xff] %v580_v25 }
  0xfa   : > { %v595_v27 = vpop.permute.xlu1 %594  ;;  %v593_v28 = vpop.permute.xlu0 %592 }
  0xfb   : > { %v602_v29 = vsel %vm579_vm3, %v593_v28, %v595_v27 }
  0xfc   : > { %604 = vst [vmem:[#allocation2 + $0x260] sm:$0xff] %v602_v29 }
  0xfe   : > { %v599_v30 = vpop.permute.xlu1 %598  ;;  %v597_v31 = vpop.permute.xlu0 %596 }
  0xff   : > { %v603_v36 = vsel %vm579_vm3, %v599_v30, %v593_v28  ;;  %v600_v37 = vsel %vm579_vm3, %v597_v31, %v599_v30  ;;  %v601_v38 = vsel %vm579_vm3, %v595_v27, %v597_v31  ;;  %v1771_v28 = vmov (!%p1494_p12), 0.0  }
 0x100   : > { %607 = vst [vmem:[#allocation2 + $0x278] sm:$0xff] %v603_v36  ;;  %605 = vst [vmem:[#allocation2 + $0x268] sm:$0xff] %v601_v38 }
 0x101   : > { %606 = vst [vmem:[#allocation2 + $0x270] sm:$0xff] %v600_v37  ;;  %755 = vst [vmem:[#allocation3] sm:$0xff] (!%p1494_p12), %v1771_v28 }
 0x102   : > { %v615_v39 = vpop.permute.xlu1 %614  ;;  %v613_v40 = vpop.permute.xlu0 %612  ;;  %756 = vst [vmem:[#allocation3 + $0x8] sm:$0xff] (!%p1494_p12), %v1771_v28  ;;  %757 = vst [vmem:[#allocation3 + $0x10] sm:$0xff] (!%p1494_p12), %v1771_v28 }
 0x103   : > { %v623_v41 = vsel %vm620_vm4, %v613_v40, %v615_v39  ;;  %758 = vst [vmem:[#allocation3 + $0x18] sm:$0xff] (!%p1494_p12), %v1771_v28  ;;  %759 = vst [vmem:[#allocation3 + $0x20] sm:$0xff] (!%p1494_p12), %v1771_v28 }
 0x104   : > { %625 = vst [vmem:[#allocation2 + $0x280] sm:$0xff] %v623_v41  ;;  %760 = vst [vmem:[#allocation3 + $0x28] sm:$0xff] (!%p1494_p12), %v1771_v28 }
 0x105   : > { %761 = vst [vmem:[#allocation3 + $0x30] sm:$0xff] (!%p1494_p12), %v1771_v28  ;;  %762 = vst [vmem:[#allocation3 + $0x38] sm:$0xff] (!%p1494_p12), %v1771_v28 }
 0x106   : > { %v619_v42 = vpop.permute.xlu1 %618  ;;  %v617_v43 = vpop.permute.xlu0 %616 }
 0x107   : > { %v624_v33 = vsel %vm620_vm4, %v619_v42, %v613_v40  ;;  %v621_v35 = vsel %vm620_vm4, %v617_v43, %v619_v42  ;;  %v622_v44 = vsel %vm620_vm4, %v615_v39, %v617_v43 }
 0x108   : > { %628 = vst [vmem:[#allocation2 + $0x298] sm:$0xff] %v624_v33  ;;  %626 = vst [vmem:[#allocation2 + $0x288] sm:$0xff] %v622_v44 }
 0x109   : > { %627 = vst [vmem:[#allocation2 + $0x290] sm:$0xff] %v621_v35 }
 0x10a   : > { %v636_v45 = vpop.permute.xlu1 %635  ;;  %v634_v34 = vpop.permute.xlu0 %633 }
 0x10b   : > { %v643_v32 = vsel %vm579_vm3, %v634_v34, %v636_v45 }
 0x10c   : > { %645 = vst [vmem:[#allocation2 + $0x2a0] sm:$0xff] %v643_v32 }
 0x10e   : > { %v640_v46 = vpop.permute.xlu1 %639  ;;  %v638_v47 = vpop.permute.xlu0 %637 }
 0x10f   : > { %v644_v48 = vsel %vm579_vm3, %v640_v46, %v634_v34  ;;  %v641_v49 = vsel %vm579_vm3, %v638_v47, %v640_v46  ;;  %v642_v50 = vsel %vm579_vm3, %v636_v45, %v638_v47 }
 0x110   : > { %648 = vst [vmem:[#allocation2 + $0x2b8] sm:$0xff] %v644_v48  ;;  %646 = vst [vmem:[#allocation2 + $0x2a8] sm:$0xff] %v642_v50 }
 0x111   : > { %647 = vst [vmem:[#allocation2 + $0x2b0] sm:$0xff] %v641_v49 }
 0x112   : > { %v656_v51 = vpop.permute.xlu1 %655  ;;  %v654_v52 = vpop.permute.xlu0 %653 }
 0x113   : > { %v663_v53 = vsel %vm579_vm3, %v654_v52, %v656_v51 }
 0x114   : > { %665 = vst [vmem:[#allocation2 + $0x2c0] sm:$0xff] %v663_v53 }
 0x116   : > { %v660_v54 = vpop.permute.xlu1 %659  ;;  %v658_v55 = vpop.permute.xlu0 %657 }
 0x117   : > { %v664_v56 = vsel %vm579_vm3, %v660_v54, %v654_v52  ;;  %v661_v57 = vsel %vm579_vm3, %v658_v55, %v660_v54  ;;  %v662_v58 = vsel %vm579_vm3, %v656_v51, %v658_v55 }
 0x118   : > { %668 = vst [vmem:[#allocation2 + $0x2d8] sm:$0xff] %v664_v56  ;;  %666 = vst [vmem:[#allocation2 + $0x2c8] sm:$0xff] %v662_v58 }
 0x119   : > { %667 = vst [vmem:[#allocation2 + $0x2d0] sm:$0xff] %v661_v57 }
 0x11a   : > { %v676_v59 = vpop.permute.xlu1 %675  ;;  %v674_v60 = vpop.permute.xlu0 %673 }
 0x11b   : > { %v683_v62 = vsel %vm620_vm4, %v674_v60, %v676_v59 }
 0x11c   : > { %685 = vst [vmem:[#allocation2 + $0x2e0] sm:$0xff] %v683_v62 }
 0x11e   : > { %v680_v63 = vpop.permute.xlu1 %679  ;;  %v678_v0 = vpop.permute.xlu0 %677 }
 0x11f   : > { %v684_v1 = vsel %vm620_vm4, %v680_v63, %v674_v60  ;;  %v681_v2 = vsel %vm620_vm4, %v678_v0, %v680_v63  ;;  %v682_v3 = vsel %vm620_vm4, %v676_v59, %v678_v0 }
 0x120   : > { %688 = vst [vmem:[#allocation2 + $0x2f8] sm:$0xff] %v684_v1  ;;  %686 = vst [vmem:[#allocation2 + $0x2e8] sm:$0xff] %v682_v3 }
 0x121   : > { %687 = vst [vmem:[#allocation2 + $0x2f0] sm:$0xff] %v681_v2 }
 0x122   : > { %v696_v4 = vpop.permute.xlu1 %695  ;;  %v694_v5 = vpop.permute.xlu0 %693 }
 0x123   : > { %v704_v6 = vsel %vm701_vm5, %v694_v5, %v696_v4 }
 0x124   : > { %706 = vst [vmem:[#allocation2 + $0x300] sm:$0xff] %v704_v6 }
 0x126   : > { %v700_v7 = vpop.permute.xlu1 %699  ;;  %v698_v8 = vpop.permute.xlu0 %697 }
 0x127   : > { %v705_v9 = vsel %vm701_vm5, %v700_v7, %v694_v5  ;;  %v702_v10 = vsel %vm701_vm5, %v698_v8, %v700_v7  ;;  %v703_v11 = vsel %vm701_vm5, %v696_v4, %v698_v8 }
 0x128   : > { %709 = vst [vmem:[#allocation2 + $0x318] sm:$0xff] %v705_v9  ;;  %707 = vst [vmem:[#allocation2 + $0x308] sm:$0xff] %v703_v11 }
 0x129   : > { %708 = vst [vmem:[#allocation2 + $0x310] sm:$0xff] %v702_v10 }
 0x12a   : > { %v717_v12 = vpop.permute.xlu1 %716  ;;  %v715_v13 = vpop.permute.xlu0 %714 }
 0x12b   : > { %v724_v14 = vsel %vm701_vm5, %v715_v13, %v717_v12 }
 0x12c   : > { %726 = vst [vmem:[#allocation2 + $0x320] sm:$0xff] %v724_v14 }
 0x12e   : > { %v721_v15 = vpop.permute.xlu1 %720  ;;  %v719_v16 = vpop.permute.xlu0 %718 }
 0x12f   : > { %v725_v17 = vsel %vm701_vm5, %v721_v15, %v715_v13  ;;  %v722_v18 = vsel %vm701_vm5, %v719_v16, %v721_v15  ;;  %v723_v19 = vsel %vm701_vm5, %v717_v12, %v719_v16 }
 0x130   : > { %729 = vst [vmem:[#allocation2 + $0x338] sm:$0xff] %v725_v17  ;;  %727 = vst [vmem:[#allocation2 + $0x328] sm:$0xff] %v723_v19 }
 0x131   : > { %728 = vst [vmem:[#allocation2 + $0x330] sm:$0xff] %v722_v18 }
 0x132   : > { %v737_v20 = vpop.permute.xlu1 %736  ;;  %v735_v21 = vpop.permute.xlu0 %734 }
 0x133   : > { %v745_v22 = vsel %vm742_vm6, %v735_v21, %v737_v20  ;;  %754 = sbr.rel (%p1494_p12) target bundleno = 314 (0x13a), region = 59 }
 0x134   : > { %747 = vst [vmem:[#allocation2 + $0x340] sm:$0xff] %v745_v22 }
 0x136   : > { %v741_v23 = vpop.permute.xlu1 %740  ;;  %v739_v24 = vpop.permute.xlu0 %738 }
 0x137   : > { %v746_v25 = vsel %vm742_vm6, %v741_v23, %v735_v21  ;;  %v743_v26 = vsel %vm742_vm6, %v739_v24, %v741_v23  ;;  %v744_v27 = vsel %vm742_vm6, %v737_v20, %v739_v24 }
 0x138   : > { %750 = vst [vmem:[#allocation2 + $0x358] sm:$0xff] %v746_v25  ;;  %748 = vst [vmem:[#allocation2 + $0x348] sm:$0xff] %v744_v27 }
 0x139   : > { %749 = vst [vmem:[#allocation2 + $0x350] sm:$0xff] %v743_v26 }
 0x13a PF: > { %v776_v61 = vld [vmem:[#allocation2 + $0x8] sm:$0xff]  ;;  %v778_v30 = vld [vmem:[#allocation2 + $0x18] sm:$0xff]  ;;  %v775_v37 = vld [vmem:[#allocation2] sm:$0xff]  ;;  %vm883_vm7 = vcmask 719872   ;;  %p1499_p13 = scmp.ne.s32.totalorder %s1746_s14, 2 }
 0x13b   : > { %v780_v29 = vld [vmem:[#allocation2 + $0x28] sm:$0xff]  ;;  %v782_v36 = vld [vmem:[#allocation2 + $0x38] sm:$0xff]  ;;  %v779_v38 = vld [vmem:[#allocation2 + $0x20] sm:$0xff] }
 0x13c   : > { %v1505_v31 = vpack.c.bf16 %v780_v29, %v776_v61  ;;  %v1557_v39 = vpack.c.bf16 %v782_v36, %v778_v30  ;;  %v1507_v40 = vpack.c.bf16 %v779_v38, %v775_v37  ;;  %v777_v41 = vld [vmem:[#allocation2 + $0x10] sm:$0xff]  ;;  %v784_v43 = vld [vmem:[#allocation2 + $0x48] sm:$0xff]  ;;  %v786_v44 = vld [vmem:[#allocation2 + $0x58] sm:$0xff] }
 0x13d   : > { %v781_v42 = vld [vmem:[#allocation2 + $0x30] sm:$0xff]  ;;  %v788_v35 = vld [vmem:[#allocation2 + $0x68] sm:$0xff]  ;;  %v790_v45 = vld [vmem:[#allocation2 + $0x78] sm:$0xff] }
 0x13e   : > { %1506 = vmatprep.subr.bf16.mxu0 %v1505_v31  ;;  %v1559_v33 = vpack.c.bf16 %v781_v42, %v777_v41  ;;  %1558 = vmatprep.subr.bf16.mxu1 %v1557_v39  ;;  %v1509_v34 = vpack.c.bf16 %v788_v35, %v784_v43  ;;  %v1561_v32 = vpack.c.bf16 %v790_v45, %v786_v44  ;;  %v783_v46 = vld [vmem:[#allocation2 + $0x40] sm:$0xff]  ;;  %v785_v48 = vld [vmem:[#allocation2 + $0x50] sm:$0xff]  ;;  %v792_v51 = vld [vmem:[#allocation2 + $0x88] sm:$0xff] }
 0x13f   : > { %1508 = vmatpush1.bf16.msra.mxu0 %v1507_v40  ;;  %v787_v47 = vld [vmem:[#allocation2 + $0x60] sm:$0xff]  ;;  %v789_v50 = vld [vmem:[#allocation2 + $0x70] sm:$0xff]  ;;  %v796_v52 = vld [vmem:[#allocation2 + $0xa8] sm:$0xff] }
 0x140   : > { %1560 = vmatpush1.bf16.msra.mxu1 %v1559_v33  ;;  %v1511_v49 = vpack.c.bf16 %v787_v47, %v783_v46  ;;  %1510 = vmatprep.subr.bf16.mxu0 %v1509_v34  ;;  %v1563_v53 = vpack.c.bf16 %v789_v50, %v785_v48  ;;  %v1513_v54 = vpack.c.bf16 %v796_v52, %v792_v51  ;;  %v794_v55 = vld [vmem:[#allocation2 + $0x98] sm:$0xff]  ;;  %v791_v57 = vld [vmem:[#allocation2 + $0x80] sm:$0xff]  ;;  %v793_v60 = vld [vmem:[#allocation2 + $0x90] sm:$0xff] }
 0x141   : > { %1562 = vmatprep.subr.bf16.mxu1 %v1561_v32  ;;  %v798_v56 = vld [vmem:[#allocation2 + $0xb8] sm:$0xff]  ;;  %v795_v59 = vld [vmem:[#allocation2 + $0xa0] sm:$0xff]  ;;  %v797_v62 = vld [vmem:[#allocation2 + $0xb0] sm:$0xff] }
 0x142   : > { %v1565_v58 = vpack.c.bf16 %v798_v56, %v794_v55  ;;  %v1515_v63 = vpack.c.bf16 %v795_v59, %v791_v57  ;;  %v800_v0 = vld [vmem:[#allocation2 + $0xc8] sm:$0xff]  ;;  %v802_v2 = vld [vmem:[#allocation2 + $0xd8] sm:$0xff]  ;;  %v1567_v3 = vpack.c.bf16 %v797_v62, %v793_v60  ;;  %v799_v6 = vld [vmem:[#allocation2 + $0xc0] sm:$0xff] }
 0x143   : > { %1512 = vmatpush1.bf16.msra.mxu0 %v1511_v49  ;;  %v804_v1 = vld [vmem:[#allocation2 + $0xe8] sm:$0xff]  ;;  %v806_v5 = vld [vmem:[#allocation2 + $0xf8] sm:$0xff]  ;;  %v803_v7 = vld [vmem:[#allocation2 + $0xe0] sm:$0xff] }
 0x144   : > { %1564 = vmatpush1.bf16.msra.mxu1 %v1563_v53  ;;  %1514 = vmatprep.subr.bf16.mxu0 %v1513_v54  ;;  %v1517_v4 = vpack.c.bf16 %v804_v1, %v800_v0  ;;  %v1569_v8 = vpack.c.bf16 %v806_v5, %v802_v2  ;;  %v801_v9 = vld [vmem:[#allocation2 + $0xd0] sm:$0xff]  ;;  %v808_v11 = vld [vmem:[#allocation2 + $0x108] sm:$0xff]  ;;  %v810_v13 = vld [vmem:[#allocation2 + $0x118] sm:$0xff]  ;;  %v1519_v15 = vpack.c.bf16 %v803_v7, %v799_v6 }
 0x145   : > { %1566 = vmatprep.subr.bf16.mxu1 %v1565_v58  ;;  %v805_v10 = vld [vmem:[#allocation2 + $0xf0] sm:$0xff]  ;;  %v812_v12 = vld [vmem:[#allocation2 + $0x128] sm:$0xff]  ;;  %v814_v14 = vld [vmem:[#allocation2 + $0x138] sm:$0xff] }
 0x146   : > { %v1571_v16 = vpack.c.bf16 %v805_v10, %v801_v9  ;;  %v1521_v17 = vpack.c.bf16 %v812_v12, %v808_v11  ;;  %v807_v18 = vld [vmem:[#allocation2 + $0x100] sm:$0xff]  ;;  %v809_v20 = vld [vmem:[#allocation2 + $0x110] sm:$0xff]  ;;  %v1573_v21 = vpack.c.bf16 %v814_v14, %v810_v13  ;;  %v816_v23 = vld [vmem:[#allocation2 + $0x148] sm:$0xff] }
 0x147   : > { %1516 = vmatpush1.bf16.msra.mxu0 %v1515_v63  ;;  %v811_v19 = vld [vmem:[#allocation2 + $0x120] sm:$0xff]  ;;  %v813_v22 = vld [vmem:[#allocation2 + $0x130] sm:$0xff]  ;;  %v820_v24 = vld [vmem:[#allocation2 + $0x168] sm:$0xff] }
 0x148   : > { %1568 = vmatpush1.bf16.msra.mxu1 %v1567_v3  ;;  %1518 = vmatprep.subr.bf16.mxu0 %v1517_v4  ;;  %v818_v25 = vld [vmem:[#allocation2 + $0x158] sm:$0xff]  ;;  %v1523_v27 = vpack.c.bf16 %v811_v19, %v807_v18  ;;  %v1575_v28 = vpack.c.bf16 %v813_v22, %v809_v20  ;;  %v1525_v61 = vpack.c.bf16 %v820_v24, %v816_v23  ;;  %v815_v29 = vld [vmem:[#allocation2 + $0x140] sm:$0xff]  ;;  %v817_v31 = vld [vmem:[#allocation2 + $0x150] sm:$0xff] }
 0x149   : > { %1570 = vmatprep.subr.bf16.mxu1 %v1569_v8  ;;  %v822_v26 = vld [vmem:[#allocation2 + $0x178] sm:$0xff]  ;;  %v819_v30 = vld [vmem:[#allocation2 + $0x160] sm:$0xff]  ;;  %v821_v37 = vld [vmem:[#allocation2 + $0x170] sm:$0xff] }
 0x14a   : > { %v1577_v36 = vpack.c.bf16 %v822_v26, %v818_v25  ;;  %v824_v38 = vld [vmem:[#allocation2 + $0x188] sm:$0xff]  ;;  %v826_v40 = vld [vmem:[#allocation2 + $0x198] sm:$0xff]  ;;  %v1527_v42 = vpack.c.bf16 %v819_v30, %v815_v29  ;;  %v1579_v43 = vpack.c.bf16 %v821_v37, %v817_v31  ;;  %v823_v35 = vld [vmem:[#allocation2 + $0x180] sm:$0xff] }
 0x14b   : > { %1520 = vmatpush1.bf16.msra.mxu0 %v1519_v15  ;;  %v828_v39 = vld [vmem:[#allocation2 + $0x1a8] sm:$0xff]  ;;  %v830_v41 = vld [vmem:[#allocation2 + $0x1b8] sm:$0xff]  ;;  %v827_v44 = vld [vmem:[#allocation2 + $0x1a0] sm:$0xff] }
 0x14c   : > { %1572 = vmatpush1.bf16.msra.mxu1 %v1571_v16  ;;  %1522 = vmatprep.subr.bf16.mxu0 %v1521_v17  ;;  %v1529_v33 = vpack.c.bf16 %v828_v39, %v824_v38  ;;  %v825_v45 = vld [vmem:[#allocation2 + $0x190] sm:$0xff]  ;;  %v1581_v34 = vpack.c.bf16 %v830_v41, %v826_v40  ;;  %v832_v46 = vld [vmem:[#allocation2 + $0x1c8] sm:$0xff]  ;;  %v834_v48 = vld [vmem:[#allocation2 + $0x1d8] sm:$0xff]  ;;  %v1531_v50 = vpack.c.bf16 %v827_v44, %v823_v35 }
 0x14d   : > { %1574 = vmatprep.subr.bf16.mxu1 %v1573_v21  ;;  %v829_v32 = vld [vmem:[#allocation2 + $0x1b0] sm:$0xff]  ;;  %v836_v47 = vld [vmem:[#allocation2 + $0x1e8] sm:$0xff]  ;;  %v838_v49 = vld [vmem:[#allocation2 + $0x1f8] sm:$0xff] }
 0x14e   : > { %v1583_v51 = vpack.c.bf16 %v829_v32, %v825_v45  ;;  %v1533_v52 = vpack.c.bf16 %v836_v47, %v832_v46  ;;  %v831_v53 = vld [vmem:[#allocation2 + $0x1c0] sm:$0xff]  ;;  %v833_v55 = vld [vmem:[#allocation2 + $0x1d0] sm:$0xff]  ;;  %v1585_v56 = vpack.c.bf16 %v838_v49, %v834_v48  ;;  %v840_v58 = vld [vmem:[#allocation2 + $0x208] sm:$0xff] }
 0x14f   : > { %1524 = vmatpush1.bf16.msra.mxu0 %v1523_v27  ;;  %v835_v54 = vld [vmem:[#allocation2 + $0x1e0] sm:$0xff]  ;;  %v837_v57 = vld [vmem:[#allocation2 + $0x1f0] sm:$0xff]  ;;  %v844_v59 = vld [vmem:[#allocation2 + $0x228] sm:$0xff] }
 0x150   : > { %1576 = vmatpush1.bf16.msra.mxu1 %v1575_v28  ;;  %1526 = vmatprep.subr.bf16.mxu0 %v1525_v61  ;;  %v842_v60 = vld [vmem:[#allocation2 + $0x218] sm:$0xff]  ;;  %v1535_v63 = vpack.c.bf16 %v835_v54, %v831_v53  ;;  %v1587_v0 = vpack.c.bf16 %v837_v57, %v833_v55  ;;  %v1537_v1 = vpack.c.bf16 %v844_v59, %v840_v58  ;;  %v839_v2 = vld [vmem:[#allocation2 + $0x200] sm:$0xff]  ;;  %v841_v4 = vld [vmem:[#allocation2 + $0x210] sm:$0xff] }
 0x151   : > { %1578 = vmatprep.subr.bf16.mxu1 %v1577_v36  ;;  %v846_v62 = vld [vmem:[#allocation2 + $0x238] sm:$0xff]  ;;  %v843_v3 = vld [vmem:[#allocation2 + $0x220] sm:$0xff]  ;;  %v845_v6 = vld [vmem:[#allocation2 + $0x230] sm:$0xff] }
 0x152   : > { %v1589_v5 = vpack.c.bf16 %v846_v62, %v842_v60  ;;  %v848_v7 = vld [vmem:[#allocation2 + $0x248] sm:$0xff]  ;;  %v850_v9 = vld [vmem:[#allocation2 + $0x258] sm:$0xff]  ;;  %v1539_v11 = vpack.c.bf16 %v843_v3, %v839_v2  ;;  %v1591_v12 = vpack.c.bf16 %v845_v6, %v841_v4  ;;  %v847_v14 = vld [vmem:[#allocation2 + $0x240] sm:$0xff] }
 0x153   : > { %1528 = vmatpush1.bf16.msra.mxu0 %v1527_v42  ;;  %v852_v8 = vld [vmem:[#allocation2 + $0x268] sm:$0xff]  ;;  %v854_v10 = vld [vmem:[#allocation2 + $0x278] sm:$0xff]  ;;  %v851_v15 = vld [vmem:[#allocation2 + $0x260] sm:$0xff] }
 0x154   : > { %1580 = vmatpush1.bf16.msra.mxu1 %v1579_v43  ;;  %1530 = vmatprep.subr.bf16.mxu0 %v1529_v33  ;;  %v1541_v13 = vpack.c.bf16 %v852_v8, %v848_v7  ;;  %v849_v16 = vld [vmem:[#allocation2 + $0x250] sm:$0xff]  ;;  %v1593_v17 = vpack.c.bf16 %v854_v10, %v850_v9  ;;  %v856_v19 = vld [vmem:[#allocation2 + $0x288] sm:$0xff]  ;;  %v858_v21 = vld [vmem:[#allocation2 + $0x298] sm:$0xff]  ;;  %v1543_v24 = vpack.c.bf16 %v851_v15, %v847_v14 }
 0x155   : > { %1582 = vmatprep.subr.bf16.mxu1 %v1581_v34  ;;  %v853_v18 = vld [vmem:[#allocation2 + $0x270] sm:$0xff]  ;;  %v860_v20 = vld [vmem:[#allocation2 + $0x2a8] sm:$0xff]  ;;  %v862_v22 = vld [vmem:[#allocation2 + $0x2b8] sm:$0xff] }
 0x156   : > { %v772_v23 = vld [vmem:[%s2145_s4 + $0x8] sm:$0xff]  ;;  %v1595_v25 = vpack.c.bf16 %v853_v18, %v849_v16  ;;  %v1545_v26 = vpack.c.bf16 %v860_v20, %v856_v19  ;;  %v855_v27 = vld [vmem:[#allocation2 + $0x280] sm:$0xff]  ;;  %v857_v61 = vld [vmem:[#allocation2 + $0x290] sm:$0xff]  ;;  %v1597_v29 = vpack.c.bf16 %v862_v22, %v858_v21 }
 0x157   : > { %1532 = vmatpush1.bf16.msra.mxu0 %v1531_v50  ;;  %1495 = vmatprep.mubr.msk.f32.mxu0 %vm883_vm7, %v772_v23  ;;  %v859_v28 = vld [vmem:[#allocation2 + $0x2a0] sm:$0xff]  ;;  %v861_v30 = vld [vmem:[#allocation2 + $0x2b0] sm:$0xff]  ;;  %v864_v31 = vld [vmem:[#allocation2 + $0x2c8] sm:$0xff] }
 0x158   : > { %1584 = vmatpush1.bf16.msra.mxu1 %v1583_v51  ;;  %1534 = vmatprep.subr.bf16.mxu0 %v1533_v52  ;;  %v868_v36 = vld [vmem:[#allocation2 + $0x2e8] sm:$0xff]  ;;  %v866_v37 = vld [vmem:[#allocation2 + $0x2d8] sm:$0xff]  ;;  %v1547_v39 = vpack.c.bf16 %v859_v28, %v855_v27  ;;  %v1599_v40 = vpack.c.bf16 %v861_v30, %v857_v61  ;;  %v863_v42 = vld [vmem:[#allocation2 + $0x2c0] sm:$0xff] }
 0x159   : > { %1586 = vmatprep.subr.bf16.mxu1 %v1585_v56  ;;  %1497 = vmatprep.mubr.msk.f32.mxu1 %vm883_vm7, %v772_v23  ;;  %v870_v38 = vld [vmem:[#allocation2 + $0x2f8] sm:$0xff]  ;;  %v1549_v41 = vpack.c.bf16 %v868_v36, %v864_v31  ;;  %v867_v43 = vld [vmem:[#allocation2 + $0x2e0] sm:$0xff]  ;;  %v865_v33 = vld [vmem:[#allocation2 + $0x2d0] sm:$0xff] }
 0x15a   : > { %v1601_v35 = vpack.c.bf16 %v870_v38, %v866_v37  ;;  %v869_v44 = vld [vmem:[#allocation2 + $0x2f0] sm:$0xff]  ;;  %v872_v45 = vld [vmem:[#allocation2 + $0x308] sm:$0xff]  ;;  %v874_v32 = vld [vmem:[#allocation2 + $0x318] sm:$0xff]  ;;  %v1551_v47 = vpack.c.bf16 %v867_v43, %v863_v42 }
 0x15b   : > { %1536 = vmatpush1.bf16.msra.mxu0 %v1535_v63  ;;  %v876_v34 = vld [vmem:[#allocation2 + $0x328] sm:$0xff]  ;;  %v878_v46 = vld [vmem:[#allocation2 + $0x338] sm:$0xff]  ;;  %v1603_v48 = vpack.c.bf16 %v869_v44, %v865_v33  ;;  %v871_v50 = vld [vmem:[#allocation2 + $0x300] sm:$0xff] }
 0x15c   : > { %1588 = vmatpush1.bf16.msra.mxu1 %v1587_v0  ;;  %1538 = vmatprep.subr.bf16.mxu0 %v1537_v1  ;;  %v1553_v49 = vpack.c.bf16 %v876_v34, %v872_v45  ;;  %v875_v51 = vld [vmem:[#allocation2 + $0x320] sm:$0xff]  ;;  %v1605_v52 = vpack.c.bf16 %v878_v46, %v874_v32  ;;  %v873_v53 = vld [vmem:[#allocation2 + $0x310] sm:$0xff]  ;;  %v880_v57 = vld [vmem:[#allocation2 + $0x348] sm:$0xff] }
 0x15d   : > { %1590 = vmatprep.subr.bf16.mxu1 %v1589_v5  ;;  %v877_v54 = vld [vmem:[#allocation2 + $0x330] sm:$0xff]  ;;  %v1555_v55 = vpack.c.bf16 %v875_v51, %v871_v50  ;;  %v882_v58 = vld [vmem:[#allocation2 + $0x358] sm:$0xff]  ;;  %v879_v59 = vld [vmem:[#allocation2 + $0x340] sm:$0xff] }
 0x15e   : > { %v1607_v56 = vpack.c.bf16 %v877_v54, %v873_v53  ;;  %v881_v60 = vld [vmem:[#allocation2 + $0x350] sm:$0xff]  ;;  %v771_v62 = vld [vmem:[%s2145_s4] sm:$0xff]  ;;  %v774_v63 = vld [vmem:[%s2145_s4 + $0x18] sm:$0xff] }
 0x15f   : > { %1540 = vmatpush1.bf16.msra.mxu0 %v1539_v11  ;;  %v773_v0 = vld [vmem:[%s2145_s4 + $0x10] sm:$0xff]  ;;  %v763_v1 = vld [vmem:[#allocation3] sm:$0xff]  ;;  %v764_v3 = vld [vmem:[#allocation3 + $0x8] sm:$0xff] }
 0x160   : > { %1592 = vmatpush1.bf16.msra.mxu1 %v1591_v12  ;;  %1542 = vmatprep.subr.bf16.mxu0 %v1541_v13  ;;  %v765_v2 = vld [vmem:[#allocation3 + $0x10] sm:$0xff]  ;;  %v766_v5 = vld [vmem:[#allocation3 + $0x18] sm:$0xff]  ;;  %v767_v12 = vld [vmem:[#allocation3 + $0x20] sm:$0xff] }
 0x161   : > { %1594 = vmatprep.subr.bf16.mxu1 %v1593_v17  ;;  %v769_v14 = vld [vmem:[#allocation3 + $0x30] sm:$0xff]  ;;  %v768_v15 = vld [vmem:[#allocation3 + $0x28] sm:$0xff]  ;;  %v770_v17 = vld [vmem:[#allocation3 + $0x38] sm:$0xff] }
 0x162   : > { %v1073_v27 = vld [vmem:[%s2466_s2 + $0x8] sm:$0xff] (!%p1499_p13) }
 0x163   : > { %1544 = vmatpush1.bf16.msra.mxu0 %v1543_v24 }
 0x164   : > { %1596 = vmatpush1.bf16.msra.mxu1 %v1595_v25  ;;  %1546 = vmatprep.subr.bf16.mxu0 %v1545_v26  ;;  %v1072_v25 = vld [vmem:[%s2466_s2] sm:$0xff] (!%p1499_p13)  ;;  %v1772_v26 = vmov (!%p1499_p13), 0  }
 0x165   : > { %1598 = vmatprep.subr.bf16.mxu1 %v1597_v29  ;;  %1675 = vset.pattern.permute.xlu0 (!%p1499_p13), %v1772_v26 }
 0x166   : > { %1076 = vperm.xlu0 (!%p1499_p13), %1675, %v1072_v25  }
 0x167   : > { %1548 = vmatpush1.bf16.msra.mxu0 %v1547_v39 }
 0x168   : > { %1600 = vmatpush1.bf16.msra.mxu1 %v1599_v40  ;;  %1550 = vmatprep.subr.bf16.mxu0 %v1549_v41 }
 0x169   : > { %1602 = vmatprep.subr.bf16.mxu1 %v1601_v35 }
 0x16a   : > { %1081 = vperm.xlu0 (!%p1499_p13), %1675, %v1073_v27  }
 0x16b   : > { %1552 = vmatpush1.bf16.msra.mxu0 %v1551_v47 }
 0x16c   : > { %1604 = vmatpush1.bf16.msra.mxu1 %v1603_v48  ;;  %1554 = vmatprep.subr.bf16.mxu0 %v1553_v49 }
 0x16d   : > { %1606 = vmatprep.subr.bf16.mxu1 %v1605_v52 }
 0x16f   : > { %1556 = vmatpush1.bf16.msra.mxu0 %v1555_v55 }
 0x170   : > { %1608 = vmatpush1.bf16.msra.mxu1 %v1607_v56  ;;  %942 = vmatprep.subr.mxu0 %v880_v57 }
 0x171   : > { %1019 = vmatprep.subr.mxu1 %v882_v58 }
 0x173   : > { %943 = vmatpush1.msra.mxu0 %v879_v59 }
 0x174   : > { %1020 = vmatpush1.msra.mxu1 %v881_v60  ;;  %955 = vmatmul.mubr.f32.vlgmr.msra.gmra.mrb[0].mxu0 %v771_v62 }
 0x175   : > { %1032 = vmatmul.mubr.f32.vlgmr.msra.gmra.mrb[0].mxu1 %v771_v62  ;;  %1496 = vmatprep.mubr.msk.f32.mxu0 %vm883_vm7, %v774_v63 }
 0x176   : > { %1498 = vmatprep.mubr.msk.f32.mxu1 %vm883_vm7, %v774_v63 }
 0x178   : > { %961 = vmatmul.mubr.f32.gmra.mrb[2].mxu0 %v773_v0 }
 0x179   : > { %1038 = vmatmul.mubr.f32.gmra.mrb[2].mxu1 %v773_v0 }
 0x1e5   : > { %v1077_v31 = vpop.permute.xlu0 (!%p1499_p13), %1076 }
 0x1e9   : > { %v1082_v45 = vpop.permute.xlu0 (!%p1499_p13), %1081 }
 0x247   : > { %v956_v4 = vpop.f32.mrb[0].mxu0 }
 0x248   : > { %v1044_v6 = vadd.f32 %v956_v4, %v763_v1  ;;  %v1033_v7 = vpop.f32.mrb[0].mxu1  ;;  %v958_v8 = vpop.f32.mrb[1].mxu0 }
 0x249   : > { %v1046_v9 = vadd.f32 %v1033_v7, %v765_v2  ;;  %v1045_v10 = vadd.f32 %v958_v8, %v764_v3  ;;  %v1035_v11 = vpop.f32.mrb[1].mxu1 }
 0x24a   : > { %1052 = vst [vmem:[#allocation3] sm:$0xff] %v1044_v6  ;;  %v1047_v13 = vadd.f32 %v1035_v11, %v766_v5  ;;  %1063 = sbr.rel (%p1499_p13) target bundleno = 657 (0x291), region = 63 }
 0x24b   : > { %1054 = vst [vmem:[#allocation3 + $0x10] sm:$0xff] %v1046_v9  ;;  %1053 = vst [vmem:[#allocation3 + $0x8] sm:$0xff] %v1045_v10  ;;  %v962_v16 = vpop.f32.mrb[2].mxu0 }
 0x24c   : > { %1055 = vst [vmem:[#allocation3 + $0x18] sm:$0xff] %v1047_v13  ;;  %v1048_v18 = vadd.f32 %v962_v16, %v767_v12  ;;  %v1039_v19 = vpop.f32.mrb[2].mxu1  ;;  %v964_v20 = vpop.f32.mrb[3].mxu0  ;;  %v1773_v12 = vmov (!%p1499_p13), -1.0  }
 0x24d   : > { %v1050_v21 = vadd.f32 %v1039_v19, %v769_v14  ;;  %v1049_v22 = vadd.f32 %v964_v20, %v768_v15  ;;  %v1041_v23 = vpop.f32.mrb[3].mxu1 }
 0x24e   : > { %1056 = vst [vmem:[#allocation3 + $0x20] sm:$0xff] %v1048_v18  ;;  %v1051_v24 = vadd.f32 %v1041_v23, %v770_v17 }
 0x24f   : > { %1058 = vst [vmem:[#allocation3 + $0x30] sm:$0xff] %v1050_v21  ;;  %1057 = vst [vmem:[#allocation3 + $0x28] sm:$0xff] %v1049_v22 }
 0x250   : > { %1059 = vst [vmem:[#allocation3 + $0x38] sm:$0xff] %v1051_v24 }
 0x251   : > { %v1064_v28 = vld [vmem:[#allocation3] sm:$0xff] }
 0x252   : > { %v1065_v61 = vld [vmem:[#allocation3 + $0x8] sm:$0xff]  ;;  %v1066_v29 = vld [vmem:[#allocation3 + $0x10] sm:$0xff]  ;;  %v1084_v36 = vadd.f32 %v1077_v31, %v1064_v28 }
 0x253   : > { %v1067_v30 = vld [vmem:[#allocation3 + $0x18] sm:$0xff]  ;;  %v1085_v37 = vadd.f32 %v1077_v31, %v1065_v61  ;;  %v1086_v38 = vadd.f32 %v1077_v31, %v1066_v29 }
 0x254   : > { %v1087_v39 = vadd.f32 %v1077_v31, %v1067_v30  ;;  %v1100_v40 = vmul.f32 0.70710677, %v1084_v36  ;;  %v2328_v7 = vmul.f32 0.5, %v1084_v36 }
 0x255   : > { %v1101_v41 = vmul.f32 0.70710677, %v1085_v37  ;;  %v2302_v42 = vmul.f32 0.70710677, %v1086_v38  ;;  %v1068_v34 = vld [vmem:[#allocation3 + $0x20] sm:$0xff]  ;;  %v2330_v8 = vmul.f32 0.5, %v1085_v37 }
 0x256   : > { %v2304_v43 = vmul.f32 0.70710677, %v1087_v39  ;;  %v1124_v33 = vand.u32 2147483647, %v1100_v40  ;;  %v1069_v32 = vld [vmem:[#allocation3 + $0x28] sm:$0xff]  ;;  %v1070_v50 = vld [vmem:[#allocation3 + $0x30] sm:$0xff]  ;;  %v2308_v54 = vadd.f32 %v1082_v45, %v1068_v34 }
 0x257   : > { %v1125_v35 = vand.u32 2147483647, %v1101_v41  ;;  %v1126_v44 = vand.u32 2147483647, %v2302_v42  ;;  %v1071_v51 = vld [vmem:[#allocation3 + $0x38] sm:$0xff]  ;;  %v2310_v55 = vadd.f32 %v1082_v45, %v1069_v32  ;;  %v2312_v62 = vadd.f32 %v1082_v45, %v1070_v50 }
 0x258   : > { %v1127_v46 = vand.u32 2147483647, %v2304_v43  ;;  %v1132_v47 = vmul.f32 0.3275911, %v1124_v33  ;;  %v1236_v58 = vsub.f32 0.0, %v1124_v33  ;;  %v2314_v63 = vadd.f32 %v1082_v45, %v1071_v51 }
 0x259   : > { %v1133_v48 = vmul.f32 0.3275911, %v1125_v35  ;;  %v1134_v49 = vmul.f32 0.3275911, %v1126_v44  ;;  %v1237_v59 = vsub.f32 0.0, %v1125_v35  ;;  %v1238_v0 = vsub.f32 0.0, %v1126_v44 }
 0x25a   : > { %v1135_v52 = vmul.f32 0.3275911, %v1127_v46  ;;  %v1140_v53 = vadd.f32 1.0, %v1132_v47  ;;  %vm1108_vm8 = vcmp.ge.f32.partialorder %v1100_v40, 0.0  ;;  %v1244_v1 = vmul.f32 %v1236_v58, %v1124_v33 }
 0x25b   : > { %v1141_v56 = vadd.f32 1.0, %v1133_v48  ;;  %v1142_v57 = vadd.f32 1.0, %v1134_v49  ;;  %v1245_v2 = vmul.f32 %v1237_v59, %v1125_v35  ;;  %v2317_v3 = vmul.f32 0.70710677, %v2308_v54 }
 0x25c   : > { %v1143_v60 = vadd.f32 1.0, %v1135_v52  ;;  %1676 = vrcp.f32 %v1140_v53  ;;  %v2320_v4 = vmul.f32 0.70710677, %v2310_v55  ;;  %v2323_v5 = vmul.f32 0.70710677, %v2312_v62 }
 0x25d   : > { %1678 = vrcp.f32 %v1141_v56  ;;  %v2326_v6 = vmul.f32 0.70710677, %v2314_v63  ;;  %v2332_v9 = vmul.f32 0.5, %v1086_v38  ;;  %v1246_v10 = vmul.f32 %v1238_v0, %v1126_v44 }
 0x25e   : > { %1680 = vrcp.f32 %v1142_v57  ;;  %v2334_v11 = vmul.f32 0.5, %v1087_v39  ;;  %vm1109_vm9 = vcmp.ge.f32.partialorder %v1101_v41, 0.0  ;;  %v2338_v13 = vsel %vm1108_vm8, 1.0, %v1773_v12 }
 0x25f   : > { %1682 = vrcp.f32 %v1143_v60  ;;  %v1239_v14 = vsub.f32 0.0, %v1127_v46  ;;  %v1252_v15 = vmul.f32 1.442695, %v1244_v1  ;;  %v1254_v16 = vmul.f32 1.442695, %v1245_v2 }
 0x260   : > { %v1128_v17 = vand.u32 2147483647, %v2317_v3  ;;  %v1129_v18 = vand.u32 2147483647, %v2320_v4  ;;  %v1130_v19 = vand.u32 2147483647, %v2323_v5 }
 0x261   : > { %v1131_v20 = vand.u32 2147483647, %v2326_v6  ;;  %v2345_v21 = vsel %vm1109_vm9, 1.0, %v1773_v12  ;;  %v1256_v22 = vmul.f32 1.442695, %v1246_v10  ;;  %v1247_v26 = vmul.f32 %v1239_v14, %v1127_v46 }
 0x262   : > { %v1136_v23 = vmul.f32 0.3275911, %v1128_v17  ;;  %v1240_v24 = vsub.f32 0.0, %v1128_v17  ;;  %v1137_v27 = vmul.f32 0.3275911, %v1129_v18  ;;  %vm1110_vm10 = vcmp.ge.f32.partialorder %v2302_v42, 0.0 }
 0x263   : > { %v1138_v28 = vmul.f32 0.3275911, %v1130_v19  ;;  %v1139_v61 = vmul.f32 0.3275911, %v1131_v20  ;;  %v1241_v36 = vsub.f32 0.0, %v1129_v18  ;;  %v1242_v37 = vsub.f32 0.0, %v1130_v19 }
 0x264   : > { %v1144_v31 = vadd.f32 1.0, %v1136_v23  ;;  %vm1111_vm11 = vcmp.ge.f32.partialorder %v2304_v43, 0.0  ;;  %v1145_v40 = vadd.f32 1.0, %v1137_v27  ;;  %v1243_v34 = vsub.f32 0.0, %v1131_v20 }
 0x265   : > { %v1146_v41 = vadd.f32 1.0, %v1138_v28  ;;  %v1147_v33 = vadd.f32 1.0, %v1139_v61  ;;  %v1248_v47 = vmul.f32 %v1240_v24, %v1128_v17  ;;  %v1249_v50 = vmul.f32 %v1241_v36, %v1129_v18 }
 0x266   : > { %v2347_v25 = vpop.eup %1676  ;;  %1684 = vrcp.f32 %v1144_v31  ;;  %v1250_v53 = vmul.f32 %v1242_v37, %v1130_v19  ;;  %v1258_v58 = vmul.f32 1.442695, %v1247_v26  ;;  %v1251_v59 = vmul.f32 %v1243_v34, %v1131_v20 }
 0x267   : > { %v2349_v29 = vpop.eup %1678  ;;  %v1164_v30 = vmul.f32 1.0614054, %v2347_v25  ;;  %1686 = vrcp.f32 %v1145_v40  ;;  %v1260_v1 = vmul.f32 1.442695, %v1248_v47  ;;  %v1262_v14 = vmul.f32 1.442695, %v1249_v50 }
 0x268   : > { %v2353_v38 = vpop.eup %1680  ;;  %v1165_v39 = vmul.f32 1.0614054, %v2349_v29  ;;  %1688 = vrcp.f32 %v1146_v41  ;;  %v1264_v19 = vmul.f32 1.442695, %v1250_v53  ;;  %v1266_v20 = vmul.f32 1.442695, %v1251_v59 }
 0x269   : > { %v2357_v35 = vpop.eup %1682  ;;  %v1166_v44 = vmul.f32 1.0614054, %v2353_v38  ;;  %v1172_v45 = vadd.f32 -1.4531521, %v1164_v30  ;;  %1690 = vrcp.f32 %v1147_v33  ;;  %vm1112_vm12 = vcmp.ge.f32.partialorder %v2317_v3, 0.0 }
 0x26a   : > { %v1167_v32 = vmul.f32 1.0614054, %v2357_v35  ;;  %v1173_v46 = vadd.f32 -1.4531521, %v1165_v39  ;;  %1692 = vpow2.f32 %v1252_v15  ;;  %v2371_v15 = vsel %vm1110_vm10, 1.0, %v1773_v12 }
 0x26b   : > { %v1174_v48 = vadd.f32 -1.4531521, %v1166_v44  ;;  %v1180_v49 = vmul.f32 %v2347_v25, %v1172_v45  ;;  %1694 = vpow2.f32 %v1254_v16  ;;  %vm1113_vm13 = vcmp.ge.f32.partialorder %v2320_v4, 0.0 }
 0x26c   : > { %v1175_v51 = vadd.f32 -1.4531521, %v1167_v32  ;;  %v1181_v52 = vmul.f32 %v2349_v29, %v1173_v46  ;;  %1696 = vpow2.f32 %v1256_v22  ;;  %v2379_v22 = vsel %vm1111_vm11, 1.0, %v1773_v12 }
 0x26d   : > { %v1182_v56 = vmul.f32 %v2353_v38, %v1174_v48  ;;  %v1188_v57 = vadd.f32 1.4214138, %v1180_v49  ;;  %1698 = vpow2.f32 %v1258_v58  ;;  %vm1114_vm14 = vcmp.ge.f32.partialorder %v2323_v5, 0.0 }
 0x26e   : > { %v1183_v60 = vmul.f32 %v2357_v35, %v1175_v51  ;;  %v1189_v0 = vadd.f32 1.4214138, %v1181_v52  ;;  %1700 = vpow2.f32 %v1260_v1  ;;  %vm1115_vm15 = vcmp.ge.f32.partialorder %v2326_v6, 0.0 }
 0x26f   : > { %v1190_v2 = vadd.f32 1.4214138, %v1182_v56  ;;  %v1196_v10 = vmul.f32 %v2347_v25, %v1188_v57  ;;  %1702 = vpow2.f32 %v1262_v14  ;;  %v1121_v3 = vsel %vm1113_vm13, 1.0, %v1773_v12 }
 0x270   : > { %v1191_v17 = vadd.f32 1.4214138, %v1183_v60  ;;  %v1197_v18 = vmul.f32 %v2349_v29, %v1189_v0  ;;  %v2374_v16 = vpop.eup %1684  ;;  %1704 = vpow2.f32 %v1264_v19  ;;  %v1123_v5 = vsel %vm1115_vm15, 1.0, %v1773_v12 }
 0x271   : > { %v1198_v23 = vmul.f32 %v2353_v38, %v1190_v2  ;;  %v1204_v24 = vadd.f32 -0.28449672, %v1196_v10  ;;  %v2382_v30 = vpop.eup %1686  ;;  %v1168_v36 = vmul.f32 1.0614054, %v2374_v16  ;;  %1706 = vpow2.f32 %v1266_v20 }
 0x272   : > { %v1199_v26 = vmul.f32 %v2357_v35, %v1191_v17  ;;  %v1205_v27 = vadd.f32 -0.28449672, %v1197_v18  ;;  %v2386_v37 = vpop.eup %1688  ;;  %v1169_v43 = vmul.f32 1.0614054, %v2382_v30 }
 0x273   : > { %v1206_v28 = vadd.f32 -0.28449672, %v1198_v23  ;;  %v1212_v61 = vmul.f32 %v2347_v25, %v1204_v24  ;;  %v2390_v41 = vpop.eup %1690  ;;  %v1170_v45 = vmul.f32 1.0614054, %v2386_v37  ;;  %v1176_v34 = vadd.f32 -1.4531521, %v1168_v36 }
 0x274   : > { %v1207_v42 = vadd.f32 -0.28449672, %v1199_v26  ;;  %v1213_v31 = vmul.f32 %v2349_v29, %v1205_v27  ;;  %v1171_v47 = vmul.f32 1.0614054, %v2390_v41  ;;  %v1177_v48 = vadd.f32 -1.4531521, %v1169_v43  ;;  %v1693_v49 = vpop.eup %1692 }
 0x275   : > { %v1214_v39 = vmul.f32 %v2353_v38, %v1206_v28  ;;  %v1220_v40 = vadd.f32 0.2548296, %v1212_v61  ;;  %v1178_v52 = vadd.f32 -1.4531521, %v1170_v45  ;;  %v1184_v53 = vmul.f32 %v2374_v16, %v1176_v34  ;;  %v1695_v56 = vpop.eup %1694 }
 0x276   : > { %v1215_v33 = vmul.f32 %v2357_v35, %v1207_v42  ;;  %v1221_v44 = vadd.f32 0.2548296, %v1213_v31  ;;  %v1179_v59 = vadd.f32 -1.4531521, %v1171_v47  ;;  %v1185_v60 = vmul.f32 %v2382_v30, %v1177_v48  ;;  %v1697_v0 = vpop.eup %1696 }
 0x277   : > { %v1222_v32 = vadd.f32 0.2548296, %v1214_v39  ;;  %v1228_v46 = vmul.f32 %v2347_v25, %v1220_v40  ;;  %v1186_v2 = vmul.f32 %v2386_v37, %v1178_v52  ;;  %v1192_v10 = vadd.f32 1.4214138, %v1184_v53  ;;  %v1699_v14 = vpop.eup %1698 }
 0x278   : > { %v1223_v50 = vadd.f32 0.2548296, %v1215_v33  ;;  %v1229_v51 = vmul.f32 %v2349_v29, %v1221_v44  ;;  %v1187_v18 = vmul.f32 %v2390_v41, %v1179_v59  ;;  %v1193_v19 = vadd.f32 1.4214138, %v1185_v60  ;;  %v1701_v23 = vpop.eup %1700 }
 0x279   : > { %v1230_v57 = vmul.f32 %v2353_v38, %v1222_v32  ;;  %v1268_v58 = vmul.f32 %v1693_v49, %v1228_v46  ;;  %v1194_v20 = vadd.f32 1.4214138, %v1186_v2  ;;  %v1200_v26 = vmul.f32 %v2374_v16, %v1192_v10  ;;  %v1703_v27 = vpop.eup %1702 }
 0x27a   : > { %v1231_v25 = vmul.f32 %v2357_v35, %v1223_v50  ;;  %v1269_v1 = vmul.f32 %v1695_v56, %v1229_v51  ;;  %v1195_v61 = vadd.f32 1.4214138, %v1187_v18  ;;  %v1201_v42 = vmul.f32 %v2382_v30, %v1193_v19  ;;  %v1705_v31 = vpop.eup %1704 }
 0x27b   : > { %v1270_v17 = vmul.f32 %v1697_v0, %v1230_v57  ;;  %v1276_v29 = vsub.f32 1.0, %v1268_v58  ;;  %v1202_v40 = vmul.f32 %v2386_v37, %v1194_v20  ;;  %v1208_v43 = vadd.f32 -0.28449672, %v1200_v26  ;;  %v1707_v33 = vpop.eup %1706 }
 0x27c   : > { %v1271_v24 = vmul.f32 %v1699_v14, %v1231_v25  ;;  %v1277_v38 = vsub.f32 1.0, %v1269_v1  ;;  %v1203_v34 = vmul.f32 %v2390_v41, %v1195_v61  ;;  %v1209_v32 = vadd.f32 -0.28449672, %v1201_v42 }
 0x27d   : > { %v1278_v28 = vsub.f32 1.0, %v1270_v17  ;;  %v1284_v35 = vmul.f32 %v1276_v29, %v2338_v13  ;;  %v1210_v47 = vadd.f32 -0.28449672, %v1202_v40  ;;  %v1216_v48 = vmul.f32 %v2374_v16, %v1208_v43 }
 0x27e   : > { %v1279_v36 = vsub.f32 1.0, %v1271_v24  ;;  %v1285_v39 = vmul.f32 %v1277_v38, %v2345_v21  ;;  %v1211_v50 = vadd.f32 -0.28449672, %v1203_v34  ;;  %v1217_v51 = vmul.f32 %v2382_v30, %v1209_v32 }
 0x27f   : > { %v1286_v44 = vmul.f32 %v1278_v28, %v2371_v15  ;;  %v1292_v45 = vadd.f32 1.0, %v1284_v35  ;;  %v1218_v53 = vmul.f32 %v2386_v37, %v1210_v47  ;;  %v1224_v56 = vadd.f32 0.2548296, %v1216_v48 }
 0x280   : > { %v1287_v13 = vmul.f32 %v1279_v36, %v2379_v22  ;;  %v1293_v46 = vadd.f32 1.0, %v1285_v39  ;;  %v1219_v57 = vmul.f32 %v2390_v41, %v1211_v50  ;;  %v1225_v58 = vadd.f32 0.2548296, %v1217_v51 }
 0x281   : > { %v1294_v49 = vadd.f32 1.0, %v1286_v44  ;;  %v1300_v21 = vmul.f32 %v1292_v45, %v2328_v7  ;;  %v1226_v7 = vadd.f32 0.2548296, %v1218_v53  ;;  %v1232_v60 = vmul.f32 %v2374_v16, %v1224_v56 }
 0x282   : > { %v1295_v15 = vadd.f32 1.0, %v1287_v13  ;;  %v1301_v52 = vmul.f32 %v1293_v46, %v2330_v8  ;;  %v1227_v0 = vadd.f32 0.2548296, %v1219_v57  ;;  %v1233_v25 = vmul.f32 %v2382_v30, %v1225_v58 }
 0x283   : > { %v1302_v22 = vmul.f32 %v1294_v49, %v2332_v9  ;;  %1308 = vst [vmem:[%s2151_s8] sm:$0xff] %v1300_v21  ;;  %v1234_v8 = vmul.f32 %v2386_v37, %v1226_v7  ;;  %v1272_v9 = vmul.f32 %v1701_v23, %v1232_v60  ;;  %v1120_v16 = vsel %vm1112_vm12, 1.0, %v1773_v12 }
 0x284   : > { %v1303_v59 = vmul.f32 %v1295_v15, %v2334_v11  ;;  %1309 = vst [vmem:[%s2151_s8 + $0x8] sm:$0xff] %v1301_v52  ;;  %v1235_v1 = vmul.f32 %v2390_v41, %v1227_v0  ;;  %v1273_v2 = vmul.f32 %v1703_v27, %v1233_v25  ;;  %v1122_v29 = vsel %vm1114_vm14, 1.0, %v1773_v12 }
 0x285   : > { %1310 = vst [vmem:[%s2151_s8 + $0x10] sm:$0xff] %v1302_v22  ;;  %v1274_v11 = vmul.f32 %v1705_v31, %v1234_v8  ;;  %v1280_v10 = vsub.f32 1.0, %v1272_v9  ;;  %v1096_v18 = vmul.f32 0.5, %v2308_v54  ;;  %v1097_v23 = vmul.f32 0.5, %v2310_v55 }
 0x286   : > { %1311 = vst [vmem:[%s2151_s8 + $0x18] sm:$0xff] %v1303_v59  ;;  %v1275_v30 = vmul.f32 %v1707_v33, %v1235_v1  ;;  %v1281_v14 = vsub.f32 1.0, %v1273_v2  ;;  %v1098_v20 = vmul.f32 0.5, %v2312_v62  ;;  %v1099_v28 = vmul.f32 0.5, %v2314_v63 }
 0x287   : > { %v1282_v17 = vsub.f32 1.0, %v1274_v11  ;;  %v1288_v37 = vmul.f32 %v1280_v10, %v1120_v16 }
 0x288   : > { %v1283_v4 = vsub.f32 1.0, %v1275_v30  ;;  %v1289_v41 = vmul.f32 %v1281_v14, %v1121_v3 }
 0x289   : > { %v1290_v6 = vmul.f32 %v1282_v17, %v1122_v29  ;;  %v1296_v19 = vadd.f32 1.0, %v1288_v37 }
 0x28a   : > { %v1291_v24 = vmul.f32 %v1283_v4, %v1123_v5  ;;  %v1297_v38 = vadd.f32 1.0, %v1289_v41 }
 0x28b   : > { %v1298_v26 = vadd.f32 1.0, %v1290_v6  ;;  %v1304_v27 = vmul.f32 %v1296_v19, %v1096_v18 }
 0x28c   : > { %v1299_v35 = vadd.f32 1.0, %v1291_v24  ;;  %v1305_v61 = vmul.f32 %v1297_v38, %v1097_v23 }
 0x28d   : > { %v1306_v54 = vmul.f32 %v1298_v26, %v1098_v20  ;;  %1312 = vst [vmem:[%s2151_s8 + $0x20] sm:$0xff] %v1304_v27 }
 0x28e   : > { %v1307_v42 = vmul.f32 %v1299_v35, %v1099_v28  ;;  %1313 = vst [vmem:[%s2151_s8 + $0x28] sm:$0xff] %v1305_v61 }
 0x28f   : > { %1314 = vst [vmem:[%s2151_s8 + $0x30] sm:$0xff] %v1306_v54 }
 0x290   : > { %1315 = vst [vmem:[%s2151_s8 + $0x38] sm:$0xff] %v1307_v42 }
 0x291 PF: > { %s13_s18 = sadd.s32 1, %s1762_s18   ;;  %s2468_s12 = smov %s1742_s13 }
 0x292   : > { %p10_p0 = scmp.ge.s32.totalorder %s13_s18, 8   ;;  %s2469_s13 = smov %s1845_s25 }
 0x293   : > { %s2470_s14 = smov %s1754_s16  ;;  %s2471_s15 = smov %s1758_s17 }
 0x294   : > { %s2472_s16 = smov %s2475_s19  ;;  %s2473_s17 = smov %s2479_s20 }
 0x295   :  { %12 = sbr.rel (!%p10_p0) target bundleno = 4 (0x4), region = 108 }

// kernel: mlp_conv4d.3
= control target key start
LH: loop header
LB: loop body
LE: loop exit
PB: predicated region body
PF: predicated region fallthrough
CT: control target
= control target key end

     0   :  { %s1113_s12 = smov 0   ;;  %s1115_s13 = smov 0   ;;  %s1320_s0 = inlined_call_operand.vmem [shape: f32[24,2,16,128], index: 0, kind: input, shape index: {}]   ;;  %s1321_s1 = inlined_call_operand.vmem [shape: f32[3,8,432], index: 1, kind: input, shape index: {}]   ;;  %s1322_s2 = inlined_call_operand.vmem [shape: f32[8,1], index: 2, kind: input, shape index: {}]   ;;  %s1323_s3 = inlined_call_operand.vmem [shape: f32[2,8,128], index: 3, kind: output, shape index: {}]  }
   0x1   :  { %s1117_s14 = smov 0   ;;  %s1119_s15 = smov 0  }
   0x2   :  { %s1121_s16 = smov 0   ;;  %s1123_s17 = smov 0  }
   0x3   :  { %s1125_s18 = smov 0  }
   0x4 LB: > { %s22_s19 = sadd.s32 1, %s1073_s16  ;;  %s25_s20 = sadd.s32 1, %s1077_s17  ;;  %s1081_s18 = sphi %s1125_s18, %s13_s18   ;;  %s1077_s17 = sphi %s1123_s17, %s1329_s17   ;;  %s1073_s16 = sphi %s1121_s16, %s1328_s16   ;;  %s1069_s15 = sphi %s1119_s15, %s1327_s15   ;;  %s1065_s14 = sphi %s1117_s14, %s1326_s14   ;;  %s1061_s13 = sphi %s1115_s13, %s1325_s13   ;;  %s1057_s12 = sphi %s1113_s12, %s1324_s12  }
   0x5   : > { %p23_p0 = scmp.ge.s32.totalorder %s22_s19, 3  ;;  %p41_p1 = scmp.ne.s32.totalorder %s1061_s13, %s1057_s12 }
   0x6   : > { %p42_p2 = scmp.eq.s32.totalorder %s1081_s18, 0  ;;  %s34_s24 = sadd.s32 1, %s1061_s13 }
   0x7   : > { %s1331_s19 = smov (%p23_p0, %s22_s19), 0  ;;  %s1333_s20 = smov (!%p23_p0, %s25_s20), %s1077_s17 }
   0x8   : > { %p43_p3 = por %p42_p2, %p41_p1  ;;  %p27_p4 = scmp.ge.s32.totalorder %s1333_s20, 2 }
   0x9   : > { %s29_s21 = ssub.s32 %s1073_s16, %s1331_s19  ;;  %p804_p6 = scmp.ge.s32.totalorder %s1081_s18, 6 }
   0xa   : > { %s1335_s20 = smov (%p27_p4, %s1333_s20), 0 }
   0xb   : > { %s30_s22 = ssub.s32 %s1077_s17, %s1335_s20  ;;  %143 = sbr.rel (%p804_p6) target bundleno = 33 (0x21), region = 20 }
   0xc   : > { %s31_s23 = sor.u32 %s30_s22, %s29_s21 }
   0xd   : > { %p32_p5 = scmp.eq.s32.totalorder %s31_s23, 0 }
   0xf   : > { %s1164_s25 = scalar_select %p32_p5, %s1061_s13, %s34_s24  }
  0x12   : > { %146 = sbr.rel (!%p43_p3) target bundleno = 33 (0x21), region = 24  ;;  %s148_s26 = sand.u32 (%p43_p3), 1, %s1061_s13  }
  0x13   : > { %s807_s27 = sshll.u32 (%p43_p3), %s1077_s17, 1  ;;  %s805_s28 = sshll.u32 (%p43_p3), %s148_s26, 7 }
  0x14   : > { %s858_s29 = sshll.u32 (%p43_p3), %s1073_s16, 5  ;;  %s150_s8 = scalar_lea.vmem (%p43_p3), [#allocation4], %s805_s28 }
  0x15   : > { %s154_s30 = sadd.s32 (%p43_p3), %s858_s29, %s807_s27 }
  0x16   : > { %s809_s4 = sshll.u32 (%p43_p3), %s154_s30, 3 }
  0x17   : > { %s1173_s7 = scalar_lea.vmem (%p43_p3), %s1320_s0, %s809_s4 }
  0x18   : > { %v214_v0 = vld [vmem:[%s1173_s7] sm:$0xff] (%p43_p3)  ;;  %v216_v1 = vld [vmem:[%s1173_s7 + $0x8] sm:$0xff] (%p43_p3) }
  0x19   : > { %v218_v2 = vld [vmem:[%s1173_s7 + $0x20] sm:$0xff]  ;;  %215 = vst [vmem:[%s150_s8] sm:$0xff] %v214_v0  ;;  %217 = vst [vmem:[%s150_s8 + $0x8] sm:$0xff] %v216_v1  ;;  %v220_v3 = vld [vmem:[%s1173_s7 + $0x28] sm:$0xff] }
  0x1a   : > { %219 = vst [vmem:[%s150_s8 + $0x10] sm:$0xff] %v218_v2  ;;  %v222_v4 = vld [vmem:[%s1173_s7 + $0x40] sm:$0xff]  ;;  %v224_v5 = vld [vmem:[%s1173_s7 + $0x48] sm:$0xff]  ;;  %221 = vst [vmem:[%s150_s8 + $0x18] sm:$0xff] %v220_v3 }
  0x1b   : > { %223 = vst [vmem:[%s150_s8 + $0x20] sm:$0xff] %v222_v4  ;;  %225 = vst [vmem:[%s150_s8 + $0x28] sm:$0xff] %v224_v5  ;;  %v226_v6 = vld [vmem:[%s1173_s7 + $0x60] sm:$0xff]  ;;  %v228_v7 = vld [vmem:[%s1173_s7 + $0x68] sm:$0xff] }
  0x1c   : > { %v230_v8 = vld [vmem:[%s1173_s7 + $0x80] sm:$0xff]  ;;  %227 = vst [vmem:[%s150_s8 + $0x30] sm:$0xff] %v226_v6  ;;  %229 = vst [vmem:[%s150_s8 + $0x38] sm:$0xff] %v228_v7  ;;  %v232_v9 = vld [vmem:[%s1173_s7 + $0x88] sm:$0xff] }
  0x1d   : > { %231 = vst [vmem:[%s150_s8 + $0x40] sm:$0xff] %v230_v8  ;;  %v234_v10 = vld [vmem:[%s1173_s7 + $0xa0] sm:$0xff]  ;;  %v236_v11 = vld [vmem:[%s1173_s7 + $0xa8] sm:$0xff]  ;;  %233 = vst [vmem:[%s150_s8 + $0x48] sm:$0xff] %v232_v9 }
  0x1e   : > { %235 = vst [vmem:[%s150_s8 + $0x50] sm:$0xff] %v234_v10  ;;  %237 = vst [vmem:[%s150_s8 + $0x58] sm:$0xff] %v236_v11  ;;  %v238_v12 = vld [vmem:[%s1173_s7 + $0xc0] sm:$0xff]  ;;  %v240_v13 = vld [vmem:[%s1173_s7 + $0xc8] sm:$0xff] }
  0x1f   : > { %v242_v14 = vld [vmem:[%s1173_s7 + $0xe0] sm:$0xff]  ;;  %239 = vst [vmem:[%s150_s8 + $0x60] sm:$0xff] %v238_v12  ;;  %241 = vst [vmem:[%s150_s8 + $0x68] sm:$0xff] %v240_v13  ;;  %v244_v15 = vld [vmem:[%s1173_s7 + $0xe8] sm:$0xff] }
  0x20   : > { %243 = vst [vmem:[%s150_s8 + $0x70] sm:$0xff] %v242_v14  ;;  %245 = vst [vmem:[%s150_s8 + $0x78] sm:$0xff] %v244_v15 }
  0x21 PF: > { %p810_p7 = scmp.ge.s32.totalorder %s1081_s18, 1  ;;  %p258_p8 = scmp.lt.s32.totalorder %s1081_s18, 7 }
  0x23   : > { %p259_p9 = pnand %p810_p7, %p258_p8 }
  0x24   : > { %s265_s9 = sand.u32 (!%p259_p9), 1, %s1057_s12   ;;  %s1083_s12 = smov (!%p259_p9), 127  }
  0x25   : > { %262 = sbr.rel (%p259_p9) target bundleno = 502 (0x1f6), region = 66  ;;  %s811_s10 = sshll.u32 (!%p259_p9), %s265_s9, 7 }
  0x26   : > { %s1194_s11 = scalar_lea.vmem (!%p259_p9), [#allocation4], %s811_s10  ;;  %s1084_s21 = smov (!%p259_p9), 125  }
  0x27   : > { %v1197_v16 = vld [vmem:[%s1194_s11 + $0x20] sm:$0xff] (!%p259_p9)  ;;  %v1203_v18 = vld [vmem:[%s1194_s11 + $0x28] sm:$0xff] (!%p259_p9)  ;;  %v1213_v20 = vld [vmem:[%s1194_s11 + $0x18] sm:$0xff] (!%p259_p9)  ;;  %s1085_s22 = smov (!%p259_p9), 124   ;;  %s1086_s23 = smov (!%p259_p9), 119  }
  0x28   : > { %v1200_v17 = vld [vmem:[%s1194_s11] sm:$0xff] (!%p259_p9)  ;;  %331 = vrot.lane.b32.xlu1 (!%p259_p9), %v1197_v16, %s1083_s12  ;;  %v1210_v19 = vld [vmem:[%s1194_s11 + $0x8] sm:$0xff] (!%p259_p9)  ;;  %322 = vst [vmem:[#allocation2 + $0x30] sm:$0xff] (!%p259_p9), %v1197_v16  ;;  %323 = vst [vmem:[#allocation2 + $0x38] sm:$0xff] (!%p259_p9), %v1203_v18  ;;  %s1087_s24 = smov (!%p259_p9), 118   ;;  %p293_p10 = scmp.lt.s32.totalorder (!%p259_p9), %s1065_s14, 2 }
  0x29   : > { %313 = vrot.lane.b32.xlu0 (!%p259_p9), %v1200_v17, %s1083_s12  ;;  %304 = vst [vmem:[#allocation2] sm:$0xff] (!%p259_p9), %v1200_v17  ;;  %v1219_v21 = vld [vmem:[%s1194_s11 + $0x10] sm:$0xff] (!%p259_p9)  ;;  %v830_v22 = vld [vmem:[%s1194_s11 + $0x48] sm:$0xff] (!%p259_p9)  ;;  %v829_v23 = vld [vmem:[%s1194_s11 + $0x40] sm:$0xff] (!%p259_p9)  ;;  %p298_p11 = scmp.lt.s32.totalorder (!%p259_p9), %s1069_s15, 1  ;;  %s1088_s8 = smov (!%p259_p9), 116  }
  0x2a   : > { %305 = vst [vmem:[#allocation2 + $0x8] sm:$0xff] (!%p259_p9), %v1210_v19  ;;  %310 = vst [vmem:[#allocation2 + $0x18] sm:$0xff] (!%p259_p9), %v1213_v20  ;;  %v836_v24 = vld [vmem:[%s1194_s11 + $0x68] sm:$0xff] (!%p259_p9)  ;;  %v835_v25 = vld [vmem:[%s1194_s11 + $0x60] sm:$0xff] (!%p259_p9)  ;;  %p853_p12 = scmp.ne.s32.totalorder (!%p259_p9), %s1065_s14, 0 }
  0x2b   : > { %v840_v26 = vld [vmem:[%s1194_s11 + $0x58] sm:$0xff] (!%p259_p9)  ;;  %309 = vst [vmem:[#allocation2 + $0x10] sm:$0xff] (!%p259_p9), %v1219_v21  ;;  %364 = vst [vmem:[#allocation2 + $0x90] sm:$0xff] (!%p259_p9), %v829_v23  ;;  %v839_v27 = vld [vmem:[%s1194_s11 + $0x50] sm:$0xff] (!%p259_p9) }
  0x2c   : > { %365 = vst [vmem:[#allocation2 + $0x98] sm:$0xff] %v830_v22  ;;  %v848_v28 = vld [vmem:[%s1194_s11 + $0x38] sm:$0xff]  ;;  %v847_v29 = vld [vmem:[%s1194_s11 + $0x30] sm:$0xff]  ;;  %370 = vst [vmem:[#allocation2 + $0xa8] sm:$0xff] %v840_v26  ;;  %333 = vrot.lane.b32.xlu1 %v1203_v18, %s1083_s12  ;;  %s294_s26 = scalar_select %p293_p10, %s1065_s14, 2 }
  0x2d   : > { %382 = vst [vmem:[#allocation2 + $0xc0] sm:$0xff] %v835_v25  ;;  %383 = vst [vmem:[#allocation2 + $0xc8] sm:$0xff] %v836_v24  ;;  %315 = vrot.lane.b32.xlu0 %v1210_v19, %s1083_s12  ;;  %s1337_s15 = smov (!%p298_p11, %s1069_s15), 1  ;;  %v833_v30 = vld [vmem:[%s1194_s11 + $0x70] sm:$0xff]  ;;  %v834_v31 = vld [vmem:[%s1194_s11 + $0x78] sm:$0xff]  ;;  %v1090_v6 = vmov (!%p853_p12), 0.0  }
  0x2e   : > { %327 = vst [vmem:[#allocation2 + $0x40] sm:$0xff] %v847_v29  ;;  %328 = vst [vmem:[#allocation2 + $0x48] sm:$0xff] %v848_v28  ;;  %s859_s27 = sshll.u32 %s294_s26, 5  ;;  %s814_s4 = sshll.u32 %s1337_s15, 3 }
  0x2f   : > { %369 = vst [vmem:[#allocation2 + $0xa0] sm:$0xff] %v839_v27  ;;  %s1263_s30 = scalar_lea.vmem %s1321_s1, %s859_s27  ;;  %387 = vst [vmem:[#allocation2 + $0xd0] sm:$0xff] %v833_v30  ;;  %s1270_s7 = scalar_lea.vmem %s1323_s3, %s814_s4 }
  0x30   : > { %341 = vrot.lane.b32.xlu1 %v1210_v19, %s1084_s21  ;;  %388 = vst [vmem:[#allocation2 + $0xd8] sm:$0xff] %v834_v31  ;;  %s1089_s15 = smov 115   ;;  %497 = vst [vmem:[#allocation3] sm:$0xff] (!%p853_p12), %v1090_v6 }
  0x31   : > { %339 = vrot.lane.b32.xlu0 %v1200_v17, %s1084_s21 }
  0x34   : > { %349 = vrot.lane.b32.xlu1 %v1213_v20, %s1084_s21 }
  0x35   : > { %347 = vrot.lane.b32.xlu0 %v1219_v21, %s1084_s21 }
  0x38   : > { %357 = vrot.lane.b32.xlu1 %v1210_v19, %s1085_s22 }
  0x39   : > { %355 = vrot.lane.b32.xlu0 %v1200_v17, %s1085_s22 }
  0x3c   : > { %375 = vrot.lane.b32.xlu1 %v830_v22, %s1083_s12 }
  0x3d   : > { %373 = vrot.lane.b32.xlu0 %v829_v23, %s1083_s12 }
  0x40   : > { %393 = vrot.lane.b32.xlu1 %v836_v24, %s1083_s12 }
  0x41   : > { %391 = vrot.lane.b32.xlu0 %v835_v25, %s1083_s12 }
  0x44   : > { %401 = vrot.lane.b32.xlu1 %v830_v22, %s1084_s21 }
  0x45   : > { %399 = vrot.lane.b32.xlu0 %v829_v23, %s1084_s21 }
  0x48   : > { %409 = vrot.lane.b32.xlu1 %v840_v26, %s1084_s21 }
  0x49   : > { %407 = vrot.lane.b32.xlu0 %v839_v27, %s1084_s21 }
  0x4c   : > { %417 = vrot.lane.b32.xlu1 %v830_v22, %s1085_s22 }
  0x4d   : > { %415 = vrot.lane.b32.xlu0 %v829_v23, %s1085_s22 }
  0x50   : > { %425 = vrot.lane.b32.xlu1 %v1210_v19, %s1086_s23 }
  0x51   : > { %423 = vrot.lane.b32.xlu0 %v1200_v17, %s1086_s23 }
  0x54   : > { %433 = vrot.lane.b32.xlu1 %v1213_v20, %s1086_s23 }
  0x55   : > { %431 = vrot.lane.b32.xlu0 %v1219_v21, %s1086_s23 }
  0x58   : > { %441 = vrot.lane.b32.xlu1 %v1210_v19, %s1087_s24 }
  0x59   : > { %439 = vrot.lane.b32.xlu0 %v1200_v17, %s1087_s24 }
  0x5c   : > { %449 = vrot.lane.b32.xlu1 %v1203_v18, %s1086_s23 }
  0x5d   : > { %447 = vrot.lane.b32.xlu0 %v1197_v16, %s1086_s23 }
  0x60   : > { %457 = vrot.lane.b32.xlu1 %v848_v28, %s1086_s23 }
  0x61   : > { %455 = vrot.lane.b32.xlu0 %v847_v29, %s1086_s23 }
  0x64   : > { %465 = vrot.lane.b32.xlu1 %v1203_v18, %s1087_s24 }
  0x65   : > { %463 = vrot.lane.b32.xlu0 %v1197_v16, %s1087_s24 }
  0x68   : > { %473 = vrot.lane.b32.xlu1 %v1210_v19, %s1088_s8 }
  0x69   : > { %471 = vrot.lane.b32.xlu0 %v1200_v17, %s1088_s8 }
  0x6c   : > { %481 = vrot.lane.b32.xlu1 %v1213_v20, %s1088_s8 }
  0x6d   : > { %479 = vrot.lane.b32.xlu0 %v1219_v21, %s1088_s8 }
  0x70   : > { %489 = vrot.lane.b32.xlu1 %v1210_v19, %s1089_s15 }
  0x71   : > { %487 = vrot.lane.b32.xlu0 %v1200_v17, %s1089_s15 }
  0x9a   : > { %v332_v32 = vpop.permute.xlu1 %331 }
  0x9b   : > { %v314_v33 = vpop.permute.xlu0 %313  ;;  %335 = vst [vmem:[#allocation2 + $0x50] sm:$0xff] %v332_v32 }
  0x9c   : > { %317 = vst [vmem:[#allocation2 + $0x20] sm:$0xff] %v314_v33 }
  0x9e   : > { %v334_v34 = vpop.permute.xlu1 %333 }
  0x9f   : > { %v316_v35 = vpop.permute.xlu0 %315  ;;  %336 = vst [vmem:[#allocation2 + $0x58] sm:$0xff] %v334_v34 }
  0xa0   : > { %318 = vst [vmem:[#allocation2 + $0x28] sm:$0xff] %v316_v35 }
  0xa2   : > { %v342_v36 = vpop.permute.xlu1 %341 }
  0xa3   : > { %v340_v37 = vpop.permute.xlu0 %339  ;;  %344 = vst [vmem:[#allocation2 + $0x68] sm:$0xff] %v342_v36 }
  0xa4   : > { %343 = vst [vmem:[#allocation2 + $0x60] sm:$0xff] %v340_v37 }
  0xa6   : > { %v350_v38 = vpop.permute.xlu1 %349 }
  0xa7   : > { %v348_v39 = vpop.permute.xlu0 %347  ;;  %352 = vst [vmem:[#allocation2 + $0x78] sm:$0xff] %v350_v38 }
  0xa8   : > { %351 = vst [vmem:[#allocation2 + $0x70] sm:$0xff] %v348_v39 }
  0xaa   : > { %v358_v40 = vpop.permute.xlu1 %357 }
  0xab   : > { %v356_v41 = vpop.permute.xlu0 %355  ;;  %360 = vst [vmem:[#allocation2 + $0x88] sm:$0xff] %v358_v40 }
  0xac   : > { %359 = vst [vmem:[#allocation2 + $0x80] sm:$0xff] %v356_v41 }
  0xae   : > { %v376_v42 = vpop.permute.xlu1 %375 }
  0xaf   : > { %v374_v43 = vpop.permute.xlu0 %373  ;;  %378 = vst [vmem:[#allocation2 + $0xb8] sm:$0xff] %v376_v42 }
  0xb0   : > { %377 = vst [vmem:[#allocation2 + $0xb0] sm:$0xff] %v374_v43 }
  0xb2   : > { %v394_v44 = vpop.permute.xlu1 %393 }
  0xb3   : > { %v392_v45 = vpop.permute.xlu0 %391  ;;  %396 = vst [vmem:[#allocation2 + $0xe8] sm:$0xff] %v394_v44 }
  0xb4   : > { %395 = vst [vmem:[#allocation2 + $0xe0] sm:$0xff] %v392_v45 }
  0xb6   : > { %v402_v46 = vpop.permute.xlu1 %401 }
  0xb7   : > { %v400_v47 = vpop.permute.xlu0 %399  ;;  %404 = vst [vmem:[#allocation2 + $0xf8] sm:$0xff] %v402_v46 }
  0xb8   : > { %403 = vst [vmem:[#allocation2 + $0xf0] sm:$0xff] %v400_v47 }
  0xba   : > { %v410_v48 = vpop.permute.xlu1 %409 }
  0xbb   : > { %v408_v49 = vpop.permute.xlu0 %407  ;;  %412 = vst [vmem:[#allocation2 + $0x108] sm:$0xff] %v410_v48 }
  0xbc   : > { %411 = vst [vmem:[#allocation2 + $0x100] sm:$0xff] %v408_v49 }
  0xbe   : > { %v418_v50 = vpop.permute.xlu1 %417 }
  0xbf   : > { %v416_v51 = vpop.permute.xlu0 %415  ;;  %420 = vst [vmem:[#allocation2 + $0x118] sm:$0xff] %v418_v50 }
  0xc0   : > { %419 = vst [vmem:[#allocation2 + $0x110] sm:$0xff] %v416_v51 }
  0xc2   : > { %v426_v52 = vpop.permute.xlu1 %425 }
  0xc3   : > { %v424_v53 = vpop.permute.xlu0 %423  ;;  %428 = vst [vmem:[#allocation2 + $0x128] sm:$0xff] %v426_v52 }
  0xc4   : > { %427 = vst [vmem:[#allocation2 + $0x120] sm:$0xff] %v424_v53 }
  0xc6   : > { %v434_v54 = vpop.permute.xlu1 %433 }
  0xc7   : > { %v432_v55 = vpop.permute.xlu0 %431  ;;  %436 = vst [vmem:[#allocation2 + $0x138] sm:$0xff] %v434_v54 }
  0xc8   : > { %435 = vst [vmem:[#allocation2 + $0x130] sm:$0xff] %v432_v55 }
  0xca   : > { %v442_v56 = vpop.permute.xlu1 %441 }
  0xcb   : > { %v440_v57 = vpop.permute.xlu0 %439  ;;  %444 = vst [vmem:[#allocation2 + $0x148] sm:$0xff] %v442_v56 }
  0xcc   : > { %443 = vst [vmem:[#allocation2 + $0x140] sm:$0xff] %v440_v57 }
  0xce   : > { %v450_v58 = vpop.permute.xlu1 %449 }
  0xcf   : > { %v448_v59 = vpop.permute.xlu0 %447  ;;  %452 = vst [vmem:[#allocation2 + $0x158] sm:$0xff] %v450_v58 }
  0xd0   : > { %451 = vst [vmem:[#allocation2 + $0x150] sm:$0xff] %v448_v59 }
  0xd2   : > { %v458_v60 = vpop.permute.xlu1 %457 }
  0xd3   : > { %v456_v61 = vpop.permute.xlu0 %455  ;;  %460 = vst [vmem:[#allocation2 + $0x168] sm:$0xff] %v458_v60 }
  0xd4   : > { %459 = vst [vmem:[#allocation2 + $0x160] sm:$0xff] %v456_v61 }
  0xd6   : > { %v466_v62 = vpop.permute.xlu1 %465 }
  0xd7   : > { %v464_v63 = vpop.permute.xlu0 %463  ;;  %468 = vst [vmem:[#allocation2 + $0x178] sm:$0xff] %v466_v62 }
  0xd8   : > { %467 = vst [vmem:[#allocation2 + $0x170] sm:$0xff] %v464_v63 }
  0xda   : > { %v474_v0 = vpop.permute.xlu1 %473 }
  0xdb   : > { %v472_v1 = vpop.permute.xlu0 %471  ;;  %476 = vst [vmem:[#allocation2 + $0x188] sm:$0xff] %v474_v0 }
  0xdc   : > { %475 = vst [vmem:[#allocation2 + $0x180] sm:$0xff] %v472_v1 }
  0xde   : > { %v482_v2 = vpop.permute.xlu1 %481  ;;  %496 = sbr.rel (%p853_p12) target bundleno = 229 (0xe5), region = 74 }
  0xdf   : > { %v480_v3 = vpop.permute.xlu0 %479  ;;  %484 = vst [vmem:[#allocation2 + $0x198] sm:$0xff] %v482_v2 }
  0xe0   : > { %483 = vst [vmem:[#allocation2 + $0x190] sm:$0xff] %v480_v3 }
  0xe2   : > { %v490_v4 = vpop.permute.xlu1 %489 }
  0xe3   : > { %v488_v5 = vpop.permute.xlu0 %487  ;;  %492 = vst [vmem:[#allocation2 + $0x1a8] sm:$0xff] %v490_v4 }
  0xe4   : > { %491 = vst [vmem:[#allocation2 + $0x1a0] sm:$0xff] %v488_v5 }
  0xe5 PF: > { %v535_v7 = vld [vmem:[#allocation2 + $0x100] sm:$0xff]  ;;  %v536_v8 = vld [vmem:[#allocation2 + $0x108] sm:$0xff]  ;;  %v537_v9 = vld [vmem:[#allocation2 + $0x110] sm:$0xff]  ;;  %v1091_v10 = vmov 0.0|0.0   ;;  %vm557_vm0 = vcmask 392192   ;;  %p855_p13 = scmp.ne.s32.totalorder %s1065_s14, 2 }
  0xe6   : > { %927 = vmatprep.subr.bf16.mxu1 %v1091_v10  ;;  %v928_v11 = vpack.c.bf16 %v536_v8, %v535_v7  ;;  %v538_v12 = vld [vmem:[#allocation2 + $0x118] sm:$0xff]  ;;  %v519_v13 = vld [vmem:[#allocation2 + $0x80] sm:$0xff]  ;;  %v520_v14 = vld [vmem:[#allocation2 + $0x88] sm:$0xff] }
  0xe7   : > { %v895_v15 = vpack.c.bf16 %v520_v14, %v519_v13  ;;  %v503_v16 = vld [vmem:[#allocation2] sm:$0xff]  ;;  %v504_v17 = vld [vmem:[#allocation2 + $0x8] sm:$0xff]  ;;  %v931_v18 = vpack.c.bf16 %v538_v12, %v537_v9  ;;  %v521_v21 = vld [vmem:[#allocation2 + $0x90] sm:$0xff] }
  0xe8   : > { %929 = vmatpush1.bf16.msra.mxu1 %v928_v11  ;;  %v897_v19 = vpack.c.bf16 %v504_v17, %v503_v16  ;;  %v539_v20 = vld [vmem:[#allocation2 + $0x120] sm:$0xff]  ;;  %v522_v22 = vld [vmem:[#allocation2 + $0x98] sm:$0xff]  ;;  %v540_v23 = vld [vmem:[#allocation2 + $0x128] sm:$0xff] }
  0xe9   : > { %930 = vmatprep.subr.bf16.mxu1 %v1091_v10  ;;  %896 = vmatprep.subr.bf16.mxu0 %v895_v15  ;;  %v899_v24 = vpack.c.bf16 %v522_v22, %v521_v21  ;;  %v505_v25 = vld [vmem:[#allocation2 + $0x10] sm:$0xff]  ;;  %v506_v26 = vld [vmem:[#allocation2 + $0x18] sm:$0xff]  ;;  %v523_v28 = vld [vmem:[#allocation2 + $0xa0] sm:$0xff]  ;;  %v934_v33 = vpack.c.bf16 %v540_v23, %v539_v20 }
  0xea   : > { %898 = vmatpush3.bf16.msra.mxu0 %v897_v19  ;;  %v901_v27 = vpack.c.bf16 %v506_v26, %v505_v25  ;;  %v524_v29 = vld [vmem:[#allocation2 + $0xa8] sm:$0xff]  ;;  %v507_v31 = vld [vmem:[#allocation2 + $0x20] sm:$0xff]  ;;  %v525_v34 = vld [vmem:[#allocation2 + $0xb0] sm:$0xff] }
  0xeb   : > { %900 = vmatprep.subr.bf16.mxu0 %v899_v24  ;;  %v903_v30 = vpack.c.bf16 %v524_v29, %v523_v28  ;;  %v508_v32 = vld [vmem:[#allocation2 + $0x28] sm:$0xff]  ;;  %v526_v35 = vld [vmem:[#allocation2 + $0xb8] sm:$0xff]  ;;  %v541_v36 = vld [vmem:[#allocation2 + $0x130] sm:$0xff] }
  0xec   : > { %932 = vmatpush1.bf16.msra.mxu1 %v931_v18  ;;  %v542_v37 = vld [vmem:[#allocation2 + $0x138] sm:$0xff]  ;;  %v905_v38 = vpack.c.bf16 %v508_v32, %v507_v31  ;;  %v907_v39 = vpack.c.bf16 %v526_v35, %v525_v34  ;;  %v509_v40 = vld [vmem:[#allocation2 + $0x30] sm:$0xff]  ;;  %v527_v43 = vld [vmem:[#allocation2 + $0xc0] sm:$0xff] }
  0xed   : > { %933 = vmatprep.subr.bf16.mxu1 %v1091_v10  ;;  %v510_v41 = vld [vmem:[#allocation2 + $0x38] sm:$0xff]  ;;  %v937_v42 = vpack.c.bf16 %v542_v37, %v541_v36  ;;  %v528_v44 = vld [vmem:[#allocation2 + $0xc8] sm:$0xff]  ;;  %v543_v45 = vld [vmem:[#allocation2 + $0x140] sm:$0xff] }
  0xee   : > { %902 = vmatpush3.bf16.msra.mxu0 %v901_v27  ;;  %v544_v46 = vld [vmem:[#allocation2 + $0x148] sm:$0xff]  ;;  %v909_v47 = vpack.c.bf16 %v510_v41, %v509_v40  ;;  %v911_v48 = vpack.c.bf16 %v528_v44, %v527_v43  ;;  %v511_v49 = vld [vmem:[#allocation2 + $0x40] sm:$0xff]  ;;  %v529_v52 = vld [vmem:[#allocation2 + $0xd0] sm:$0xff] }
  0xef   : > { %904 = vmatprep.subr.bf16.mxu0 %v903_v30  ;;  %v512_v50 = vld [vmem:[#allocation2 + $0x48] sm:$0xff]  ;;  %v940_v51 = vpack.c.bf16 %v544_v46, %v543_v45  ;;  %v530_v53 = vld [vmem:[#allocation2 + $0xd8] sm:$0xff]  ;;  %v545_v54 = vld [vmem:[#allocation2 + $0x150] sm:$0xff] }
  0xf0   : > { %935 = vmatpush1.bf16.msra.mxu1 %v934_v33  ;;  %v546_v55 = vld [vmem:[#allocation2 + $0x158] sm:$0xff]  ;;  %v913_v56 = vpack.c.bf16 %v512_v50, %v511_v49  ;;  %v500_v57 = vld [vmem:[%s1263_s30 + $0x8] sm:$0xff]  ;;  %v915_v58 = vpack.c.bf16 %v530_v53, %v529_v52  ;;  %v513_v59 = vld [vmem:[#allocation2 + $0x50] sm:$0xff] }
  0xf1   : > { %936 = vmatprep.subr.bf16.mxu1 %v1091_v10  ;;  %v514_v60 = vld [vmem:[#allocation2 + $0x58] sm:$0xff]  ;;  %625 = vmatprep.mubr.f32.mxu0 %v500_v57  ;;  %v943_v62 = vpack.c.bf16 %v546_v55, %v545_v54  ;;  %v531_v63 = vld [vmem:[#allocation2 + $0xe0] sm:$0xff]  ;;  %v532_v0 = vld [vmem:[#allocation2 + $0xe8] sm:$0xff] }
  0xf2   : > { %906 = vmatpush3.bf16.msra.mxu0 %v905_v38  ;;  %v502_v61 = vld [vmem:[%s1263_s30 + $0x18] sm:$0xff]  ;;  %v547_v1 = vld [vmem:[#allocation2 + $0x160] sm:$0xff]  ;;  %v548_v2 = vld [vmem:[#allocation2 + $0x168] sm:$0xff]  ;;  %v917_v3 = vpack.c.bf16 %v514_v60, %v513_v59  ;;  %v919_v4 = vpack.c.bf16 %v532_v0, %v531_v63  ;;  %v1092_v38 = vmov (!%p855_p13), 0  }
  0xf3   : > { %908 = vmatprep.subr.bf16.mxu0 %v907_v39  ;;  %854 = vmatprep.mubr.msk.f32.mxu1 %vm557_vm0, %v502_v61  ;;  %v515_v5 = vld [vmem:[#allocation2 + $0x60] sm:$0xff]  ;;  %v516_v6 = vld [vmem:[#allocation2 + $0x68] sm:$0xff]  ;;  %v946_v7 = vpack.c.bf16 %v548_v2, %v547_v1  ;;  %v533_v8 = vld [vmem:[#allocation2 + $0xf0] sm:$0xff] }
  0xf4   : > { %938 = vmatpush1.bf16.msra.mxu1 %v937_v42  ;;  %v534_v9 = vld [vmem:[#allocation2 + $0xf8] sm:$0xff]  ;;  %v549_v11 = vld [vmem:[#allocation2 + $0x170] sm:$0xff]  ;;  %v921_v13 = vpack.c.bf16 %v516_v6, %v515_v5  ;;  %v551_v18 = vld [vmem:[#allocation2 + $0x180] sm:$0xff]  ;;  %1026 = vset.pattern.permute.xlu0 (!%p855_p13), %v1092_v38 }
  0xf5   : > { %939 = vmatprep.subr.bf16.mxu1 %v1091_v10  ;;  %v550_v12 = vld [vmem:[#allocation2 + $0x178] sm:$0xff]  ;;  %v923_v14 = vpack.c.bf16 %v534_v9, %v533_v8  ;;  %v517_v15 = vld [vmem:[#allocation2 + $0x70] sm:$0xff]  ;;  %v552_v19 = vld [vmem:[#allocation2 + $0x188] sm:$0xff] }
  0xf6   : > { %910 = vmatpush3.bf16.msra.mxu0 %v909_v47  ;;  %v518_v16 = vld [vmem:[#allocation2 + $0x78] sm:$0xff]  ;;  %v949_v17 = vpack.c.bf16 %v550_v12, %v549_v11  ;;  %v952_v21 = vpack.c.bf16 %v552_v19, %v551_v18  ;;  %v553_v22 = vld [vmem:[#allocation2 + $0x190] sm:$0xff]  ;;  %v499_v24 = vld [vmem:[%s1263_s30] sm:$0xff] }
  0xf7   : > { %912 = vmatprep.subr.bf16.mxu0 %v911_v48  ;;  %v925_v20 = vpack.c.bf16 %v518_v16, %v517_v15  ;;  %v554_v23 = vld [vmem:[#allocation2 + $0x198] sm:$0xff]  ;;  %v555_v26 = vld [vmem:[#allocation2 + $0x1a0] sm:$0xff]  ;;  %v556_v27 = vld [vmem:[#allocation2 + $0x1a8] sm:$0xff] }
  0xf8   : > { %941 = vmatpush1.bf16.msra.mxu1 %v940_v51  ;;  %v955_v25 = vpack.c.bf16 %v554_v23, %v553_v22  ;;  %v958_v28 = vpack.c.bf16 %v556_v27, %v555_v26  ;;  %v501_v29 = vld [vmem:[%s1263_s30 + $0x10] sm:$0xff] }
  0xf9   : > { %942 = vmatprep.subr.bf16.mxu1 %v1091_v10  ;;  %v498_v33 = vld [vmem:[#allocation3] sm:$0xff] }
  0xfa   : > { %914 = vmatpush3.bf16.msra.mxu0 %v913_v56 }
  0xfb   : > { %916 = vmatprep.subr.bf16.mxu0 %v915_v58 }
  0xfc   : > { %944 = vmatpush1.bf16.msra.mxu1 %v943_v62 }
  0xfd   : > { %945 = vmatprep.subr.bf16.mxu1 %v1091_v10 }
  0xfe   : > { %918 = vmatpush3.bf16.msra.mxu0 %v917_v3 }
  0xff   : > { %920 = vmatprep.subr.bf16.mxu0 %v919_v4 }
 0x100   : > { %947 = vmatpush1.bf16.msra.mxu1 %v946_v7 }
 0x101   : > { %948 = vmatprep.subr.bf16.mxu1 %v1091_v10 }
 0x102   : > { %922 = vmatpush3.bf16.msra.mxu0 %v921_v13 }
 0x103   : > { %924 = vmatprep.subr.bf16.mxu0 %v923_v14 }
 0x104   : > { %950 = vmatpush1.bf16.msra.mxu1 %v949_v17 }
 0x105   : > { %951 = vmatprep.subr.bf16.mxu1 %v1091_v10 }
 0x106   : > { %926 = vmatpush3.bf16.msra.mxu0 %v925_v20 }
 0x108   : > { %953 = vmatpush1.bf16.msra.mxu1 %v952_v21 }
 0x109   : > { %954 = vmatprep.subr.bf16.mxu1 %v1091_v10  ;;  %626 = vmatmul.mubr.f32.vlgmr.msra.gmra.mrb[0].mxu0 %v499_v24 }
 0x10c   : > { %956 = vmatpush1.bf16.msra.mxu1 %v955_v25 }
 0x10d   : > { %957 = vmatprep.subr.bf16.mxu1 %v1091_v10  ;;  %v708_v10 = vld [vmem:[%s1322_s2] sm:$0xff] (!%p855_p13) }
 0x10e   : > { %711 = vperm.xlu0 (!%p855_p13), %1026, %v708_v10  }
 0x110   : > { %959 = vmatpush1.bf16.msra.mxu1 %v958_v28 }
 0x113   : > { %696 = vmatmul.mubr.f32.vlgmr.msra.gmra.mrb[0].mxu1 %v501_v29 }
 0x18d   : > { %v712_v40 = vpop.permute.xlu0 (!%p855_p13), %711 }
 0x1dc   : > { %v892_v30 = vpop.f32.mrb[0].mxu0 }
 0x1dd   : > { %v893_v31 = vpop.f32.mrb[1].mxu0 }
 0x1de   : > { %v894_v32 = vadd.f32 %v893_v31, %v892_v30 }
 0x1e5   : > { %706 = sbr.rel (%p855_p13) target bundleno = 502 (0x1f6), region = 78 }
 0x1e6   : > { %v697_v34 = vpop.f32.mrb[0].mxu1 }
 0x1e7   : > { %v698_v35 = vadd.f32 %v894_v32, %v697_v34  ;;  %v699_v36 = vpop.f32.mrb[1].mxu1 }
 0x1e9   : > { %v701_v37 = vadd.f32 %v698_v35, %v498_v33 }
 0x1eb   : > { %702 = vst [vmem:[#allocation3] sm:$0xff] %v701_v37 }
 0x1f2   : > { %v707_v39 = vld [vmem:[#allocation3] sm:$0xff] }
 0x1f3   : > { %v714_v41 = vadd.f32 %v712_v40, %v707_v39 }
 0x1f5   : > { %715 = vst [vmem:[%s1270_s7] sm:$0xff] %v714_v41 }
 0x1f6 PF: > { %s13_s18 = sadd.s32 1, %s1081_s18   ;;  %s1324_s12 = smov %s1061_s13 }
 0x1f7   : > { %p10_p0 = scmp.ge.s32.totalorder %s13_s18, 8   ;;  %s1325_s13 = smov %s1164_s25 }
 0x1f8   : > { %s1326_s14 = smov %s1073_s16  ;;  %s1327_s15 = smov %s1077_s17 }
 0x1f9   : > { %s1328_s16 = smov %s1331_s19  ;;  %s1329_s17 = smov %s1335_s20 }
 0x1fa   :  { %12 = sbr.rel (!%p10_p0) target bundleno = 4 (0x4), region = 123 }

</bundles_post_ra>
